<compile_context>
chip_gen: v5e
topology: v5e:2x2
jax: 0.10.0
libtpu: 0.0.40
codegen_flags: <defaults>
</compile_context>

<pallas_src>
import math

import jax
import jax.numpy as jnp
from jax import lax
from jax.experimental import pallas as pl
from jax.experimental.pallas import tpu as pltpu


def _gelu_exact(x):
    # nn.GELU() default = exact erf-based GELU (computed in f32).
    return 0.5 * x * (1.0 + lax.erf(x * (1.0 / math.sqrt(2.0))))


def _vmem_limit_bytes():
    """Per-generation VMEM ceiling with headroom (v7x: 64 MiB/TC, v5e/v6e: 128 MiB)."""
    try:
        total = int(pltpu.get_tpu_info().vmem_capacity_bytes)
    except Exception:
        return 48 * 1024 * 1024          # conservative, safe on every generation
    headroom = 16 * 1024 * 1024
    return max(32 * 1024 * 1024, min(total - headroom, 100 * 1024 * 1024))


# ----------------------------------------------------------------------------
# Kernel 1: projection MLP + L2-normalize (whole batch, no grid)
# ----------------------------------------------------------------------------
def mlp_kernel(x_ref, w1_ref, b1_ref, w2_ref, b2_ref, w3_ref, b3_ref, h_ref):
    x = x_ref[...].astype(jnp.bfloat16)
    h = jnp.dot(x, w1_ref[...], preferred_element_type=jnp.float32) + b1_ref[...]
    h = _gelu_exact(h)
    h = jnp.dot(h.astype(jnp.bfloat16), w2_ref[...],
                preferred_element_type=jnp.float32) + b2_ref[...]
    h = _gelu_exact(h)
    h = jnp.dot(h.astype(jnp.bfloat16), w3_ref[...],
                preferred_element_type=jnp.float32) + b3_ref[...]
    # F.normalize(h, dim=-1, eps=1e-12) == h * rsqrt(max(sum(h*h), eps^2))
    ss = jnp.sum(h * h, axis=-1, keepdims=True)
    h = h * lax.rsqrt(jnp.maximum(ss, 1e-24))
    h_ref[...] = h.astype(h_ref.dtype)


# ----------------------------------------------------------------------------
# Kernel 2: weight-normalized last layer, N-tiled over out_dim ("parallel")
# ----------------------------------------------------------------------------
def last_layer_kernel(h_ref, vT_ref, g_ref, o_ref):
    vt = vT_ref[...]                                   # (bot, tn) bf16 tile
    vf = vt.astype(jnp.float32)
    # Fused weight-norm column scale g / ||v_col|| (no eps: matches weight_norm).
    # Sublane reduce -> XLU slot, rsqrt -> EUP slot: hidden under the MXU/HBM stream.
    inv_norm = lax.rsqrt(jnp.sum(vf * vf, axis=0, keepdims=True))   # (1, tn)
    cs = g_ref[...] * inv_norm
    acc = jnp.dot(h_ref[...], vt, preferred_element_type=jnp.float32)
    o_ref[...] = (acc * cs).astype(o_ref.dtype)


def head_forward(x, params, *, tn=None, out_dtype=jnp.float32):
    (w1, b1, w2, b2, w3, b3, vT, g) = params
    n, in_dim = x.shape
    hid = w1.shape[1]
    bot, out_dim = vT.shape
    vmem_limit = _vmem_limit_bytes()

    # ---- Kernel 1: MLP + L2 normalize -> bottleneck activations (bf16) -----
    mlp_flops = 2 * n * (in_dim * hid + hid * hid + hid * bot)
    mlp_trans = n * (2 * hid + 1)                 # 2x erf GELU rows + 1 rsqrt/row
    mlp_bytes = sum(int(a.size) * a.dtype.itemsize
                    for a in (x, w1, b1, w2, b2, w3, b3)) + n * bot * 2
    h = pl.pallas_call(
        mlp_kernel,
        out_shape=jax.ShapeDtypeStruct((n, bot), jnp.bfloat16),
        compiler_params=pltpu.CompilerParams(vmem_limit_bytes=vmem_limit),
        cost_estimate=pl.CostEstimate(flops=mlp_flops,
                                      transcendentals=mlp_trans,
                                      bytes_accessed=mlp_bytes),
    )(x, w1, b1, w2, b2, w3, b3)

    # ---- Kernel 2: last layer, lane-dense N tiles over out_dim -------------
    if tn is None:
        tn = min(out_dim, 2048)
        while out_dim % tn != 0:                  # keep tn a lane-dense divisor
            tn -= 128
    assert tn > 0 and tn % 128 == 0 and out_dim % tn == 0, \
        "out_dim tile must be a lane-dense divisor of out_dim"
    n_tiles = out_dim // tn

    ll_flops = 2 * n * bot * out_dim + 3 * bot * out_dim
    ll_trans = out_dim                            # one rsqrt per output column
    ll_bytes = (n * bot * 2
                + int(vT.size) * vT.dtype.itemsize
                + int(g.size) * g.dtype.itemsize
                + n * out_dim * jnp.dtype(out_dtype).itemsize)

    return pl.pallas_call(
        last_layer_kernel,
        out_shape=jax.ShapeDtypeStruct((n, out_dim), out_dtype),
        grid=(n_tiles,),
        in_specs=[pl.BlockSpec((n, bot), lambda j: (0, 0)),    # h: small, resident
                  pl.BlockSpec((bot, tn), lambda j: (0, j)),   # vT: streamed tiles
                  pl.BlockSpec((1, tn), lambda j: (0, j))],    # g:  streamed tiles
        out_specs=pl.BlockSpec((n, tn), lambda j: (0, j)),
        compiler_params=pltpu.CompilerParams(
            # Output tiles are fully independent -> megacore (v7x, 2 TCs) may
            # shard this axis; each TC streams half of vT and half of the logits.
            dimension_semantics=("parallel",),
            vmem_limit_bytes=vmem_limit),
        cost_estimate=pl.CostEstimate(flops=ll_flops,
                                      transcendentals=ll_trans,
                                      bytes_accessed=ll_bytes),
    )(h, vT, g)


def multi_crop_forward(crops, params):
    """MultiCropWrapper.forward: concat crops -> backbone -> head -> chunk."""
    n_crops = len(crops)
    concatenated = jnp.concatenate(crops, axis=0)
    # TODO(synk): backbone (external ViT) forward is not part of this module's
    # translatable compute; treated as identity on the cls embeddings here.
    cls_embedding = concatenated
    logits = head_forward(cls_embedding, params)
    return jnp.split(logits, n_crops, axis=0)


def init_head_params(key, in_dim, out_dim, hidden_dim, bottleneck_dim):
    """Parameter init mirroring the DINO Head shapes.

    Linear weights ~ N(0, 0.02) (stored transposed, bf16), biases = 0 (f32).
    last_layer: weight_v ~ N(0, 0.02) (transposed, bf16), weight_g = 1.
    """
    k1, k2, k3, k4 = jax.random.split(key, 4)
    std = 0.02
    w1 = (jax.random.normal(k1, (in_dim, hidden_dim), jnp.float32) * std
          ).astype(jnp.bfloat16)
    b1 = jnp.zeros((1, hidden_dim), jnp.float32)
    w2 = (jax.random.normal(k2, (hidden_dim, hidden_dim), jnp.float32) * std
          ).astype(jnp.bfloat16)
    b2 = jnp.zeros((1, hidden_dim), jnp.float32)
    w3 = (jax.random.normal(k3, (hidden_dim, bottleneck_dim), jnp.float32) * std
          ).astype(jnp.bfloat16)
    b3 = jnp.zeros((1, bottleneck_dim), jnp.float32)
    vT = (jax.random.normal(k4, (bottleneck_dim, out_dim), jnp.float32) * std
          ).astype(jnp.bfloat16)
    g = jnp.ones((1, out_dim), jnp.float32)   # weight_g filled with 1
    return (w1, b1, w2, b2, w3, b3, vT, g)


def head_reference(x, params):
    """Plain-JAX f32 reference (bf16 weights upcast) for a correctness check."""
    (w1, b1, w2, b2, w3, b3, vT, g) = params
    f32 = lambda a: a.astype(jnp.float32)
    hi = lax.Precision.HIGHEST
    h = jax.nn.gelu(jnp.dot(x, f32(w1), precision=hi) + b1, approximate=False)
    h = jax.nn.gelu(jnp.dot(h, f32(w2), precision=hi) + b2, approximate=False)
    h = jnp.dot(h, f32(w3), precision=hi) + b3
    h = h / jnp.maximum(jnp.linalg.norm(h, axis=-1, keepdims=True), 1e-12)
    vTf = f32(vT)
    weffT = vTf * (g / jnp.linalg.norm(vTf, axis=0, keepdims=True))
    return jnp.dot(h, weffT, precision=hi)


if __name__ == "__main__":
    # Small but lane/sublane-dense shapes: 2 crops x 64 rows = 128 batch rows,
    # feature dims multiples of 128.  out_dim=4096 with the default tn=2048
    # gives a 2-step "parallel" grid for the last-layer kernel.
    n_per_crop, n_crops = 64, 2
    in_dim, hidden_dim, bottleneck_dim, out_dim = 256, 256, 128, 4096

    key = jax.random.PRNGKey(0)
    kx, kp = jax.random.split(key)
    crops = [jax.random.normal(k, (n_per_crop, in_dim), jnp.float32)
             for k in jax.random.split(kx, n_crops)]
    params = init_head_params(kp, in_dim, out_dim, hidden_dim, bottleneck_dim)

    chunks = multi_crop_forward(crops, params)
    chunks = jax.block_until_ready(chunks)

    assert len(chunks) == n_crops
    out = jnp.concatenate(chunks, axis=0)
    assert out.shape == (n_per_crop * n_crops, out_dim)

    ref = head_reference(jnp.concatenate(crops, axis=0), params)
    rel_err = float(jnp.max(jnp.abs(out - ref)) /
                    jnp.maximum(jnp.max(jnp.abs(ref)), 1e-6))
    # bf16 dot inputs -> loosened tolerance (relative to max |ref|).
    assert rel_err < 5e-2, f"relative error too large: {rel_err}"

    print("KERNEL_OK")
</pallas_src>

<mosaic_0001>
module attributes {stable_mosaic.version = 11 : i64} {
  func.func @mlp_kernel(%arg0: memref<128x256xf32, #tpu.memory_space<vmem>>, %arg1: memref<256x256xbf16, #tpu.memory_space<vmem>>, %arg2: memref<1x256xf32, #tpu.memory_space<vmem>>, %arg3: memref<256x256xbf16, #tpu.memory_space<vmem>>, %arg4: memref<1x256xf32, #tpu.memory_space<vmem>>, %arg5: memref<256x128xbf16, #tpu.memory_space<vmem>>, %arg6: memref<1x128xf32, #tpu.memory_space<vmem>>, %arg7: memref<128x128xbf16, #tpu.memory_space<vmem>>) attributes {dimension_semantics = [], scalar_prefetch = 0 : i64, scratch_operands = 0 : i64, tpu.core_type = #tpu.core_type<tc>} {
    %c0 = arith.constant 0 : index
    %c0_0 = arith.constant 0 : index
    %0 = vector.load %arg0[%c0, %c0_0] : memref<128x256xf32, #tpu.memory_space<vmem>>, vector<128x256xf32>
    %1 = arith.truncf %0 : vector<128x256xf32> to vector<128x256xbf16>
    %c0_1 = arith.constant 0 : index
    %c0_2 = arith.constant 0 : index
    %2 = vector.load %arg1[%c0_1, %c0_2] : memref<256x256xbf16, #tpu.memory_space<vmem>>, vector<256x256xbf16>
    %cst = arith.constant dense<0.000000e+00> : vector<128x256xf32>
    %3 = tpu.matmul %1, %2, %cst {dimension_numbers = #tpu.dot_dimension_numbers<[1], [0], [0], [1], [0, 0, 1, 1], [], []>} : vector<128x256xbf16>, vector<256x256xbf16>, vector<128x256xf32> -> vector<128x256xf32>
    %c0_3 = arith.constant 0 : index
    %c0_4 = arith.constant 0 : index
    %4 = vector.load %arg2[%c0_3, %c0_4] : memref<1x256xf32, #tpu.memory_space<vmem>>, vector<1x256xf32>
    %5 = vector.broadcast %4 : vector<1x256xf32> to vector<128x256xf32>
    %6 = arith.addf %3, %5 : vector<128x256xf32>
    %cst_5 = arith.constant 5.000000e-01 : f32
    %7 = vector.broadcast %cst_5 : f32 to vector<128x256xf32>
    %8 = arith.mulf %7, %6 : vector<128x256xf32>
    %cst_6 = arith.constant 0.707106769 : f32
    %9 = vector.broadcast %cst_6 : f32 to vector<128x256xf32>
    %10 = arith.mulf %6, %9 : vector<128x256xf32>
    %11 = math.erf %10 : vector<128x256xf32>
    %cst_7 = arith.constant 1.000000e+00 : f32
    %12 = vector.broadcast %cst_7 : f32 to vector<128x256xf32>
    %13 = arith.addf %12, %11 : vector<128x256xf32>
    %14 = arith.mulf %8, %13 : vector<128x256xf32>
    %15 = arith.truncf %14 : vector<128x256xf32> to vector<128x256xbf16>
    %c0_8 = arith.constant 0 : index
    %c0_9 = arith.constant 0 : index
    %16 = vector.load %arg3[%c0_8, %c0_9] : memref<256x256xbf16, #tpu.memory_space<vmem>>, vector<256x256xbf16>
    %cst_10 = arith.constant dense<0.000000e+00> : vector<128x256xf32>
    %17 = tpu.matmul %15, %16, %cst_10 {dimension_numbers = #tpu.dot_dimension_numbers<[1], [0], [0], [1], [0, 0, 1, 1], [], []>} : vector<128x256xbf16>, vector<256x256xbf16>, vector<128x256xf32> -> vector<128x256xf32>
    %c0_11 = arith.constant 0 : index
    %c0_12 = arith.constant 0 : index
    %18 = vector.load %arg4[%c0_11, %c0_12] : memref<1x256xf32, #tpu.memory_space<vmem>>, vector<1x256xf32>
    %19 = vector.broadcast %18 : vector<1x256xf32> to vector<128x256xf32>
    %20 = arith.addf %17, %19 : vector<128x256xf32>
    %cst_13 = arith.constant 5.000000e-01 : f32
    %21 = vector.broadcast %cst_13 : f32 to vector<128x256xf32>
    %22 = arith.mulf %21, %20 : vector<128x256xf32>
    %cst_14 = arith.constant 0.707106769 : f32
    %23 = vector.broadcast %cst_14 : f32 to vector<128x256xf32>
    %24 = arith.mulf %20, %23 : vector<128x256xf32>
    %25 = math.erf %24 : vector<128x256xf32>
    %cst_15 = arith.constant 1.000000e+00 : f32
    %26 = vector.broadcast %cst_15 : f32 to vector<128x256xf32>
    %27 = arith.addf %26, %25 : vector<128x256xf32>
    %28 = arith.mulf %22, %27 : vector<128x256xf32>
    %29 = arith.truncf %28 : vector<128x256xf32> to vector<128x256xbf16>
    %c0_16 = arith.constant 0 : index
    %c0_17 = arith.constant 0 : index
    %30 = vector.load %arg5[%c0_16, %c0_17] : memref<256x128xbf16, #tpu.memory_space<vmem>>, vector<256x128xbf16>
    %cst_18 = arith.constant dense<0.000000e+00> : vector<128x128xf32>
    %31 = tpu.matmul %29, %30, %cst_18 {dimension_numbers = #tpu.dot_dimension_numbers<[1], [0], [0], [1], [0, 0, 1, 1], [], []>} : vector<128x256xbf16>, vector<256x128xbf16>, vector<128x128xf32> -> vector<128x128xf32>
    %c0_19 = arith.constant 0 : index
    %c0_20 = arith.constant 0 : index
    %32 = vector.load %arg6[%c0_19, %c0_20] : memref<1x128xf32, #tpu.memory_space<vmem>>, vector<1x128xf32>
    %33 = vector.broadcast %32 : vector<1x128xf32> to vector<128x128xf32>
    %34 = arith.addf %31, %33 : vector<128x128xf32>
    %35 = arith.mulf %34, %34 : vector<128x128xf32>
    %cst_21 = arith.constant dense<0.000000e+00> : vector<128xf32>
    %36 = vector.multi_reduction <add>, %35, %cst_21 [1] : vector<128x128xf32> to vector<128xf32>
    %37 = vector.shape_cast %36 : vector<128xf32> to vector<128x1xf32>
    %cst_22 = arith.constant 1.000000e-24 : f32
    %38 = vector.broadcast %cst_22 : f32 to vector<128x1xf32>
    %39 = arith.maximumf %37, %38 : vector<128x1xf32>
    %40 = math.rsqrt %39 : vector<128x1xf32>
    %41 = vector.broadcast %40 : vector<128x1xf32> to vector<128x128xf32>
    %42 = arith.mulf %34, %41 : vector<128x128xf32>
    %43 = arith.truncf %42 : vector<128x128xf32> to vector<128x128xbf16>
    %c0_23 = arith.constant 0 : index
    %c0_24 = arith.constant 0 : index
    %44 = vector.load %arg7[%c0_23, %c0_24] : memref<128x128xbf16, #tpu.memory_space<vmem>>, vector<128x128xbf16>
    tpu.vector_store %arg7[%c0_23, %c0_24], %43 {strides = array<i32>} : memref<128x128xbf16, #tpu.memory_space<vmem>>, vector<128x128xbf16>,
    return
  }
}

</mosaic_0001>

<bundles_post_ra>
// kernel: tpu_custom_call.1
= control target key start
LH: loop header
LB: loop body
LE: loop exit
PB: predicated region body
PF: predicated region fallthrough
CT: control target
= control target key end

     0   :  { %12 = vsyncpa [#allocation3], 0  ;;  %s8558_s0 = inlined_call_operand.hbm [shape: f32[128,256], index: 0, kind: input, shape index: {}]   ;;  %s8559_s1 = inlined_call_operand.hbm [shape: bf16[256,256], index: 1, kind: input, shape index: {}]   ;;  %s8560_s2 = inlined_call_operand.hbm [shape: f32[1,256], index: 2, kind: input, shape index: {}]   ;;  %s8561_s3 = inlined_call_operand.hbm [shape: bf16[256,256], index: 3, kind: input, shape index: {}]   ;;  %s8562_s4 = inlined_call_operand.vmem [shape: f32[1,256], index: 4, kind: input, shape index: {}]   ;;  %s8563_s5 = inlined_call_operand.hbm [shape: bf16[256,128], index: 5, kind: input, shape index: {}]   ;;  %s8564_s6 = inlined_call_operand.vmem [shape: f32[1,128], index: 6, kind: input, shape index: {}]   ;;  %s8565_s7 = inlined_call_operand.hbm [shape: bf16[128,128], index: 7, kind: output, shape index: {}]  }
   0x1   :  { %13 = vsyncpa [#allocation6], 0 }
   0x2   :  { %14 = vsyncpa [#allocation9], 0  ;;  %s33_s26 = sshll.u32 %s8559_s1, 4  ;;  %s34_s26 = int_to_ptr.hbm [resolvable:$true] %s33_s26 }
   0x3   :  { %15 = vsyncpa [#allocation4], 0  ;;  %s5162_s27 = smov [#allocation5]   ;;  %s57_s8 = sshll.u32 %s8561_s3, 4  ;;  %s58_s8 = int_to_ptr.hbm [resolvable:$true] %s57_s8 }
   0x4   :  { %s35_s28 = sshll.u32 %s5162_s27, 4  ;;  %s5163_s9 = smov 128   ;;  %s36_s28 = int_to_ptr.vmem [resolvable:$true] %s35_s28 }
   0x5   :  { %s5164_s10 = smov 8   ;;  %s5165_s11 = smov [#allocation8]  }
   0x6   :  { %41 = dma.hbm_to_vmem [thread:$0]  %s34_s26, 4096, %s36_s28, [#allocation6], %s5163_s9, %s5163_s9, %s5164_s10  }
   0x7   :  { %s59_s12 = sshll.u32 %s5165_s11, 4  ;;  %s20_s15 = sshll.u32 %s8558_s0, 4  ;;  %s60_s12 = int_to_ptr.vmem [resolvable:$true] %s59_s12  ;;  %s21_s15 = int_to_ptr.hbm [resolvable:$true] %s20_s15 }
   0x8   :  { %65 = dma.hbm_to_vmem [thread:$0]  %s58_s8, 4096, %s60_s12, [#allocation9], %s5163_s9, %s5163_s9, %s5164_s10  }
   0x9   :  { %s5166_s1 = smov [#allocation2]   ;;  %s47_s3 = sshll.u32 %s8560_s2, 4  ;;  %s48_s3 = int_to_ptr.hbm [resolvable:$true] %s47_s3 }
   0xa   :  { %s22_s16 = sshll.u32 %s5166_s1, 4  ;;  %s5167_s19 = smov 256   ;;  %s23_s16 = int_to_ptr.vmem [resolvable:$true] %s22_s16 }
   0xb   :  { %s5168_s20 = smov 16   ;;  %s5169_s21 = smov [#allocation7]  }
   0xc   :  { %28 = dma.hbm_to_vmem [thread:$0]  %s21_s15, 4096, %s23_s16, [#allocation3], %s5167_s19, %s5167_s19, %s5168_s20  }
   0xd   :  { %s49_s22 = sshll.u32 %s5169_s21, 4  ;;  %s72_s0 = sshll.u32 %s8563_s5, 4  ;;  %s50_s22 = int_to_ptr.vmem [resolvable:$true] %s49_s22  ;;  %s73_s0 = int_to_ptr.hbm [resolvable:$true] %s72_s0 }
   0xe   :  { %52 = dma.hbm_to_vmem [thread:$0]  %s48_s3, 32, %s50_s22, [#allocation6]  }
   0xf   :  { %s5170_s25 = smov [#allocation10]   ;;  %s5171_s27 = smov 64  }
  0x10   :  { %s74_s26 = sshll.u32 %s5170_s25, 4  ;;  %s5172_s28 = smov 4   ;;  %s75_s26 = int_to_ptr.vmem [resolvable:$true] %s74_s26 }
  0x11   :  { %80 = dma.hbm_to_vmem [thread:$0]  %s73_s0, 2048, %s75_s26, [#allocation9], %s5171_s27, %s5171_s27, %s5172_s28  }
  0x12   :  { %5154 = dma.done.wait [#allocation3], 4096  }
  0x13   :  { %5155 = vsyncadd [#allocation3], 4294963200 }
  0x14   :  { %5156 = dma.done.wait [#allocation6], 4128  }
  0x15   :  { %5157 = vsyncadd [#allocation6], 4294963168 }
  0x16   :  { %5158 = dma.done.wait [#allocation9], 6144  }
  0x17   :  { %5159 = vsyncadd [#allocation9], 4294961152  ;;  %v4368_v0 = vld [vmem:[#allocation5 + $0x70] sm:$0xf]  ;;  %v4709_v1 = vld [vmem:[#allocation5 + $0x74] sm:$0xf0] }
  0x18   :  { %v4432_v2 = vld [vmem:[#allocation5 + $0xf0] sm:$0xf]  ;;  %v4369_v3 = vor.u32 %v4709_v1, %v4368_v0  ;;  %v4725_v4 = vld [vmem:[#allocation5 + $0xf4] sm:$0xf0]  ;;  %v4360_v5 = vld [vmem:[#allocation5 + $0x60] sm:$0xf] }
  0x19   :  { %v4707_v6 = vld [vmem:[#allocation5 + $0x64] sm:$0xf0]  ;;  %v4433_v7 = vor.u32 %v4725_v4, %v4432_v2  ;;  %v4424_v8 = vld [vmem:[#allocation5 + $0xe0] sm:$0xf]  ;;  %v4352_v12 = vld [vmem:[#allocation5 + $0x50] sm:$0xf] }
  0x1a   :  { %v4723_v9 = vld [vmem:[#allocation5 + $0xe4] sm:$0xf0]  ;;  %349 = vmatpush.bf16.msra.mxu0 %v4369_v3  ;;  %4821 = vmatpush.bf16.msra.mxu2 %v4369_v3  ;;  %v4361_v10 = vor.u32 %v4707_v6, %v4360_v5  ;;  %v4705_v13 = vld [vmem:[#allocation5 + $0x54] sm:$0xf0]  ;;  %v4416_v14 = vld [vmem:[#allocation5 + $0xd0] sm:$0xf] }
  0x1b   :  { %4829 = vmatpush.bf16.msra.mxu3 %v4433_v7  ;;  %398 = vmatpush.bf16.msra.mxu1 %v4433_v7  ;;  %v4425_v11 = vor.u32 %v4723_v9, %v4424_v8  ;;  %v4721_v15 = vld [vmem:[#allocation5 + $0xd4] sm:$0xf0]  ;;  %v4353_v16 = vor.u32 %v4705_v13, %v4352_v12  ;;  %v4344_v18 = vld [vmem:[#allocation5 + $0x40] sm:$0xf]  ;;  %v4703_v19 = vld [vmem:[#allocation5 + $0x44] sm:$0xf0] }
  0x1c   :  { %v4417_v17 = vor.u32 %v4721_v15, %v4416_v14  ;;  %v4408_v20 = vld [vmem:[#allocation5 + $0xc0] sm:$0xf]  ;;  %v4719_v21 = vld [vmem:[#allocation5 + $0xc4] sm:$0xf0]  ;;  %v4345_v22 = vor.u32 %v4703_v19, %v4344_v18  ;;  %v4336_v24 = vld [vmem:[#allocation5 + $0x30] sm:$0xf] }
  0x1d   :  { %v4409_v23 = vor.u32 %v4719_v21, %v4408_v20  ;;  %v4701_v25 = vld [vmem:[#allocation5 + $0x34] sm:$0xf0]  ;;  %v4400_v26 = vld [vmem:[#allocation5 + $0xb0] sm:$0xf]  ;;  %v4328_v30 = vld [vmem:[#allocation5 + $0x20] sm:$0xf] }
  0x1e   :  { %350 = vmatpush.bf16.msra.mxu0 %v4361_v10  ;;  %4822 = vmatpush.bf16.msra.mxu2 %v4361_v10  ;;  %v4717_v27 = vld [vmem:[#allocation5 + $0xb4] sm:$0xf0]  ;;  %v4337_v28 = vor.u32 %v4701_v25, %v4336_v24  ;;  %v4699_v31 = vld [vmem:[#allocation5 + $0x24] sm:$0xf0]  ;;  %v4392_v32 = vld [vmem:[#allocation5 + $0xa0] sm:$0xf] }
  0x1f   :  { %4830 = vmatpush.bf16.msra.mxu3 %v4425_v11  ;;  %399 = vmatpush.bf16.msra.mxu1 %v4425_v11  ;;  %v4401_v29 = vor.u32 %v4717_v27, %v4400_v26  ;;  %v4715_v33 = vld [vmem:[#allocation5 + $0xa4] sm:$0xf0]  ;;  %v4329_v34 = vor.u32 %v4699_v31, %v4328_v30  ;;  %v4320_v36 = vld [vmem:[#allocation5 + $0x10] sm:$0xf]  ;;  %v4697_v37 = vld [vmem:[#allocation5 + $0x14] sm:$0xf0] }
  0x20   :  { %v4393_v35 = vor.u32 %v4715_v33, %v4392_v32  ;;  %v4384_v38 = vld [vmem:[#allocation5 + $0x90] sm:$0xf]  ;;  %v4713_v39 = vld [vmem:[#allocation5 + $0x94] sm:$0xf0]  ;;  %v4321_v40 = vor.u32 %v4697_v37, %v4320_v36  ;;  %v4312_v41 = vld [vmem:[#allocation5] sm:$0xf] }
  0x21   :  { %v4385_v42 = vor.u32 %v4713_v39, %v4384_v38  ;;  %v4695_v43 = vld [vmem:[#allocation5 + $0x4] sm:$0xf0]  ;;  %v4376_v44 = vld [vmem:[#allocation5 + $0x80] sm:$0xf]  ;;  %v105_v47 = vld [vmem:[#allocation2 + $0x10] sm:$0xff]  ;;  %s4295_s10 = sshll.u32 %s8565_s7, 4  ;;  %s4296_s10 = int_to_ptr.hbm [resolvable:$true] %s4295_s10 }
  0x22   :  { %351 = vmatpush.bf16.msra.mxu0 %v4353_v16  ;;  %4823 = vmatpush.bf16.msra.mxu2 %v4353_v16  ;;  %v4711_v45 = vld [vmem:[#allocation5 + $0x84] sm:$0xf0]  ;;  %v103_v46 = vld [vmem:[#allocation2] sm:$0xff]  ;;  %v4708_v48 = vld [vmem:[#allocation5 + $0x74] sm:$0xf]  ;;  %v4313_v52 = vor.u32 %v4695_v43, %v4312_v41 }
  0x23   :  { %4831 = vmatpush.bf16.msra.mxu3 %v4417_v17  ;;  %400 = vmatpush.bf16.msra.mxu1 %v4417_v17  ;;  %v4370_v49 = vld [vmem:[#allocation5 + $0x78] sm:$0xf0]  ;;  %v4724_v50 = vld [vmem:[#allocation5 + $0xf4] sm:$0xf]  ;;  %v119_v53 = vld [vmem:[#allocation2 + $0x80] sm:$0xff]  ;;  %v4377_v56 = vor.u32 %v4711_v45, %v4376_v44  ;;  %v5232_v63 = vpack.c.bf16 %v105_v47, %v103_v46 }
  0x24   :  { %v4434_v51 = vld [vmem:[#allocation5 + $0xf8] sm:$0xf0]  ;;  %v121_v54 = vld [vmem:[#allocation2 + $0x90] sm:$0xff]  ;;  %v120_v55 = vld [vmem:[#allocation2 + $0x88] sm:$0xff]  ;;  %v4373_v60 = vor.u32 %v4708_v48, %v4370_v49 }
  0x25   :  { %v122_v57 = vld [vmem:[#allocation2 + $0x98] sm:$0xff]  ;;  %v104_v58 = vld [vmem:[#allocation2 + $0x8] sm:$0xff]  ;;  %v4437_v61 = vor.u32 %v4724_v50, %v4434_v51  ;;  %v4706_v62 = vld [vmem:[#allocation5 + $0x64] sm:$0xf]  ;;  %v5234_v0 = vpack.c.bf16 %v121_v54, %v119_v53 }
  0x26   :  { %352 = vmatpush.bf16.msra.mxu0 %v4345_v22  ;;  %4824 = vmatpush.bf16.msra.mxu2 %v4345_v22  ;;  %v106_v59 = vld [vmem:[#allocation2 + $0x18] sm:$0xff]  ;;  %v4362_v1 = vld [vmem:[#allocation5 + $0x68] sm:$0xf0]  ;;  %v4722_v2 = vld [vmem:[#allocation5 + $0xe4] sm:$0xf]  ;;  %v5236_v4 = vpack.c.bf16 %v122_v57, %v120_v55 }
  0x27   :  { %4832 = vmatpush.bf16.msra.mxu3 %v4409_v23  ;;  %401 = vmatpush.bf16.msra.mxu1 %v4409_v23  ;;  %v4426_v3 = vld [vmem:[#allocation5 + $0xe8] sm:$0xf0]  ;;  %v5238_v5 = vpack.c.bf16 %v106_v59, %v104_v58  ;;  %v4365_v6 = vor.u32 %v4706_v62, %v4362_v1  ;;  %v4704_v8 = vld [vmem:[#allocation5 + $0x54] sm:$0xf]  ;;  %v4354_v9 = vld [vmem:[#allocation5 + $0x58] sm:$0xf0] }
  0x28   :  { %v4429_v7 = vor.u32 %v4722_v2, %v4426_v3  ;;  %v4720_v10 = vld [vmem:[#allocation5 + $0xd4] sm:$0xf]  ;;  %v4418_v11 = vld [vmem:[#allocation5 + $0xd8] sm:$0xf0]  ;;  %v4357_v12 = vor.u32 %v4704_v8, %v4354_v9  ;;  %v4702_v14 = vld [vmem:[#allocation5 + $0x44] sm:$0xf] }
  0x29   :  { %v4421_v13 = vor.u32 %v4720_v10, %v4418_v11  ;;  %v4346_v15 = vld [vmem:[#allocation5 + $0x48] sm:$0xf0]  ;;  %v4718_v16 = vld [vmem:[#allocation5 + $0xc4] sm:$0xf]  ;;  %v109_v19 = vld [vmem:[#allocation2 + $0x30] sm:$0xff] }
  0x2a   :  { %353 = vmatpush.bf16.msra.mxu0 %v4337_v28  ;;  %4825 = vmatpush.bf16.msra.mxu2 %v4337_v28  ;;  %v4410_v17 = vld [vmem:[#allocation5 + $0xc8] sm:$0xf0]  ;;  %v107_v18 = vld [vmem:[#allocation2 + $0x20] sm:$0xff]  ;;  %v4349_v20 = vor.u32 %v4702_v14, %v4346_v15  ;;  %v4700_v22 = vld [vmem:[#allocation5 + $0x34] sm:$0xf] }
  0x2b   :  { %4833 = vmatpush.bf16.msra.mxu3 %v4401_v29  ;;  %402 = vmatpush.bf16.msra.mxu1 %v4401_v29  ;;  %v4413_v21 = vor.u32 %v4718_v16, %v4410_v17  ;;  %v4338_v23 = vld [vmem:[#allocation5 + $0x38] sm:$0xf0]  ;;  %v4716_v24 = vld [vmem:[#allocation5 + $0xb4] sm:$0xf]  ;;  %v123_v26 = vld [vmem:[#allocation2 + $0xa0] sm:$0xff] }
  0x2c   :  { %v4402_v25 = vld [vmem:[#allocation5 + $0xb8] sm:$0xf0]  ;;  %v125_v27 = vld [vmem:[#allocation2 + $0xb0] sm:$0xff]  ;;  %v124_v28 = vld [vmem:[#allocation2 + $0xa8] sm:$0xff]  ;;  %v4341_v32 = vor.u32 %v4700_v22, %v4338_v23 }
  0x2d   :  { %v126_v29 = vld [vmem:[#allocation2 + $0xb8] sm:$0xff]  ;;  %v108_v30 = vld [vmem:[#allocation2 + $0x28] sm:$0xff]  ;;  %v4405_v33 = vor.u32 %v4716_v24, %v4402_v25  ;;  %v5246_v36 = vpack.c.bf16 %v125_v27, %v123_v26  ;;  %v4714_v38 = vld [vmem:[#allocation5 + $0xa4] sm:$0xf] }
  0x2e   :  { %354 = vmatpush.bf16.msra.mxu0 %v4329_v34  ;;  %4826 = vmatpush.bf16.msra.mxu2 %v4329_v34  ;;  %v110_v31 = vld [vmem:[#allocation2 + $0x38] sm:$0xff]  ;;  %v4698_v34 = vld [vmem:[#allocation5 + $0x24] sm:$0xf]  ;;  %v4330_v37 = vld [vmem:[#allocation5 + $0x28] sm:$0xf0] }
  0x2f   :  { %4834 = vmatpush.bf16.msra.mxu3 %v4393_v35  ;;  %403 = vmatpush.bf16.msra.mxu1 %v4393_v35  ;;  %v5244_v35 = vpack.c.bf16 %v109_v19, %v107_v18  ;;  %v4394_v39 = vld [vmem:[#allocation5 + $0xa8] sm:$0xf0]  ;;  %v138_v41 = vpack.c.bf16 %v110_v31, %v108_v30  ;;  %v4696_v44 = vld [vmem:[#allocation5 + $0x14] sm:$0xf]  ;;  %v4322_v45 = vld [vmem:[#allocation5 + $0x18] sm:$0xf0] }
  0x30   :  { %v4397_v43 = vor.u32 %v4714_v38, %v4394_v39  ;;  %v4712_v46 = vld [vmem:[#allocation5 + $0x94] sm:$0xf]  ;;  %v4386_v47 = vld [vmem:[#allocation5 + $0x98] sm:$0xf0]  ;;  %v4325_v48 = vor.u32 %v4696_v44, %v4322_v45  ;;  %v4694_v50 = vld [vmem:[#allocation5 + $0x4] sm:$0xf] }
  0x31   :  { %v4389_v49 = vor.u32 %v4712_v46, %v4386_v47  ;;  %v4314_v51 = vld [vmem:[#allocation5 + $0x8] sm:$0xf0]  ;;  %v113_v57 = vld [vmem:[#allocation2 + $0x50] sm:$0xff]  ;;  %v127_v58 = vld [vmem:[#allocation2 + $0xc0] sm:$0xff] }
  0x32   :  { %355 = vmatpush.bf16.msra.mxu0 %v4321_v40  ;;  %4827 = vmatpush.bf16.msra.mxu2 %v4321_v40  ;;  %v5248_v40 = vpack.c.bf16 %v126_v29, %v124_v28  ;;  %v4378_v53 = vld [vmem:[#allocation5 + $0x88] sm:$0xf0]  ;;  %v4317_v54 = vor.u32 %v4694_v50, %v4314_v51  ;;  %v129_v59 = vld [vmem:[#allocation2 + $0xd0] sm:$0xff]  ;;  %v114_v1 = vld [vmem:[#allocation2 + $0x58] sm:$0xff] }
  0x33   :  { %4835 = vmatpush.bf16.msra.mxu3 %v4385_v42  ;;  %404 = vmatpush.bf16.msra.mxu1 %v4385_v42  ;;  %v4333_v42 = vor.u32 %v4698_v34, %v4330_v37  ;;  %v112_v62 = vld [vmem:[#allocation2 + $0x48] sm:$0xff]  ;;  %v5253_v3 = vpack.c.bf16 %v129_v59, %v127_v58  ;;  %v115_v8 = vld [vmem:[#allocation2 + $0x60] sm:$0xff]  ;;  %v117_v9 = vld [vmem:[#allocation2 + $0x70] sm:$0xff] }
  0x34   :  { %v131_v10 = vld [vmem:[#allocation2 + $0xe0] sm:$0xff]  ;;  %v133_v11 = vld [vmem:[#allocation2 + $0xf0] sm:$0xff]  ;;  %v116_v14 = vld [vmem:[#allocation2 + $0x68] sm:$0xff]  ;;  %v141_v16 = vpack.c.bf16 %v117_v9, %v115_v8 }
  0x35   :  { %v118_v15 = vld [vmem:[#allocation2 + $0x78] sm:$0xff]  ;;  %v5259_v17 = vpack.c.bf16 %v133_v11, %v131_v10  ;;  %v4528_v38 = vld [vmem:[#allocation8 + $0x70] sm:$0xf] }
  0x36   :  { %356 = vmatpush.bf16.msra.mxu0 %v4313_v52  ;;  %4828 = vmatpush.bf16.msra.mxu2 %v4313_v52  ;;  %v4710_v52 = vld [vmem:[#allocation5 + $0x84] sm:$0xf]  ;;  %v142_v19 = vpack.c.bf16 %v118_v15, %v116_v14  ;;  %v4740_v25 = vld [vmem:[#allocation8 + $0x74] sm:$0xf]  ;;  %v4741_v39 = vld [vmem:[#allocation8 + $0x74] sm:$0xf0] }
  0x37   :  { %4836 = vmatpush.bf16.msra.mxu3 %v4377_v56  ;;  %405 = vmatpush.bf16.msra.mxu1 %v4377_v56  ;;  %v4381_v55 = vor.u32 %v4710_v52, %v4378_v53  ;;  %v111_v56 = vld [vmem:[#allocation2 + $0x40] sm:$0xff] }
  0x38   :  { %v139_v2 = vpack.c.bf16 %v113_v57, %v111_v56  ;;  %v4756_v57 = vld [vmem:[#allocation8 + $0xf4] sm:$0xf]  ;;  %v4594_v58 = vld [vmem:[#allocation8 + $0xf8] sm:$0xf0] }
  0x39   :  { %357 = vmatmul.bf16.vlgmr.msra.gmra.mxu0 %v5232_v63  ;;  %377 = vmatmul.bf16.vlgmr.msra.gmra.mxu2 %v5234_v0 }
  0x3a   :  { %447 = vmatpush.bf16.msrb.mxu2 %v4373_v60  ;;  %426 = vmatmul.bf16.vlgmr.msra.gmra.mxu3 %v5236_v4  ;;  %v128_v60 = vld [vmem:[#allocation2 + $0xc8] sm:$0xff] }
  0x3b   :  { %496 = vmatpush.bf16.msrb.mxu3 %v4437_v61  ;;  %406 = vmatmul.bf16.vlgmr.msra.gmra.mxu1 %v5238_v5  ;;  %v130_v61 = vld [vmem:[#allocation2 + $0xd8] sm:$0xff] }
  0x3e   :  { %448 = vmatpush.bf16.msrb.mxu2 %v4365_v6  ;;  %v5255_v6 = vpack.c.bf16 %v130_v61, %v128_v60  ;;  %v4597_v61 = vor.u32 %v4756_v57, %v4594_v58 }
  0x3f   :  { %497 = vmatpush.bf16.msrb.mxu3 %v4429_v7  ;;  %v140_v7 = vpack.c.bf16 %v114_v1, %v112_v62 }
  0x42   :  { %449 = vmatpush.bf16.msrb.mxu2 %v4357_v12  ;;  %v132_v12 = vld [vmem:[#allocation2 + $0xe8] sm:$0xff] }
  0x43   :  { %498 = vmatpush.bf16.msrb.mxu3 %v4421_v13  ;;  %v134_v13 = vld [vmem:[#allocation2 + $0xf8] sm:$0xff] }
  0x44   :  { %v5261_v18 = vpack.c.bf16 %v134_v13, %v132_v12 }
  0x46   :  { %450 = vmatpush.bf16.msrb.mxu2 %v4349_v20  ;;  %v5268_v20 = vld [vmem:[#allocation7] sm:$0x3] }
  0x47   :  { %499 = vmatpush.bf16.msrb.mxu3 %v4413_v21  ;;  %v5271_v21 = vperm.slane %v5268_v20, 0 }
  0x49   :  { %362 = vmatmul.bf16.gmra.mxu0 %v5244_v35  ;;  %382 = vmatmul.bf16.gmra.mxu2 %v5246_v36 }
  0x4a   :  { %451 = vmatpush.bf16.msrb.mxu2 %v4341_v32  ;;  %431 = vmatmul.bf16.gmra.mxu3 %v5248_v40 }
  0x4b   :  { %500 = vmatpush.bf16.msrb.mxu3 %v4405_v33  ;;  %411 = vmatmul.bf16.gmra.mxu1 %v138_v41 }
  0x4e   :  { %452 = vmatpush.bf16.msrb.mxu2 %v4333_v42 }
  0x4f   :  { %501 = vmatpush.bf16.msrb.mxu3 %v4397_v43  ;;  %v4529_v43 = vor.u32 %v4741_v39, %v4528_v38 }
  0x51   :  { %2167 = vmatpush.bf16.msrb.mxu0 %v4529_v43 }
  0x52   :  { %453 = vmatpush.bf16.msrb.mxu2 %v4325_v48  ;;  %v4738_v48 = vld [vmem:[#allocation8 + $0x64] sm:$0xf] }
  0x53   :  { %502 = vmatpush.bf16.msrb.mxu3 %v4389_v49  ;;  %v4522_v49 = vld [vmem:[#allocation8 + $0x68] sm:$0xf0] }
  0x54   :  { %v4525_v50 = vor.u32 %v4738_v48, %v4522_v49 }
  0x56   :  { %454 = vmatpush.bf16.msrb.mxu2 %v4317_v54 }
  0x57   :  { %503 = vmatpush.bf16.msrb.mxu3 %v4381_v55 }
  0x59   :  { %367 = vmatmul.bf16.gmra.mxu0 %v139_v2  ;;  %387 = vmatmul.bf16.gmra.mxu2 %v5253_v3 }
  0x5a   :  { %436 = vmatmul.bf16.gmra.mxu3 %v5255_v6 }
  0x5b   :  { %416 = vmatmul.bf16.gmra.mxu1 %v140_v7  ;;  %2314 = vmatpush.bf16.msra.mxu3 %v4597_v61 }
  0x69   :  { %372 = vmatmul.bf16.gmra.mxu0 %v141_v16  ;;  %392 = vmatmul.bf16.gmra.mxu2 %v5259_v17 }
  0x6a   :  { %441 = vmatmul.bf16.gmra.mxu3 %v5261_v18 }
  0x6b   :  { %421 = vmatmul.bf16.gmra.mxu1 %v142_v19 }
  0x79   :  { %455 = vmatmul.bf16.vlgmr.msrb.gmra.mxu2 %v5232_v63  ;;  %v4530_v63 = vld [vmem:[#allocation8 + $0x78] sm:$0xf0] }
  0x7a   :  { %504 = vmatmul.bf16.vlgmr.msrb.gmra.mxu3 %v5238_v5  ;;  %v4533_v5 = vor.u32 %v4740_v25, %v4530_v63 }
  0x7c   :  { %2265 = vmatpush.bf16.msra.mxu2 %v4533_v5 }
  0x80   :  { %2266 = vmatpush.bf16.msra.mxu2 %v4525_v50 }
  0x89   :  { %460 = vmatmul.bf16.gmra.mxu2 %v5244_v35 }
  0x8a   :  { %509 = vmatmul.bf16.gmra.mxu3 %v138_v41 }
  0x99   :  { %465 = vmatmul.bf16.gmra.mxu2 %v139_v2 }
  0x9a   :  { %514 = vmatmul.bf16.gmra.mxu3 %v140_v7 }
  0xa9   :  { %470 = vmatmul.bf16.gmra.mxu2 %v141_v16 }
  0xaa   :  { %519 = vmatmul.bf16.gmra.mxu3 %v142_v19 }
  0xb6   :  { %v358_v22 = vpop.f32.mrf.mxu0 }
  0xb7   :  { %v359_v23 = vadd.f32 %v358_v22, %v5271_v21 }
  0xb8   :  { %v407_v24 = vpop.f32.mrf.mxu1 }
  0xb9   :  { %v5274_v26 = vadd.f32 %v407_v24, %v359_v23  ;;  %475 = vmatmul.bf16.gmra.mxu2 %v5234_v0 }
  0xba   :  { %524 = vmatmul.bf16.gmra.mxu3 %v5236_v4 }
  0xbb   :  { %v5279_v27 = vmul.f32 0.70710677, %v5274_v26 }
  0xbc   :  { %v378_v28 = vpop.f32.mrf.mxu2 }
  0xbd   :  { %v609_v29 = vmul.f32 %v5279_v27, %v5279_v27  ;;  %v379_v30 = vadd.f32 %v378_v28, %v5271_v21  ;;  %v427_v31 = vpop.f32.mrf.mxu3  ;;  %v4754_v28 = vld [vmem:[#allocation8 + $0xe4] sm:$0xf] }
  0xbe   :  { %v360_v32 = vpop.f32.mrf.mxu0 }
  0xbf   :  { %v5284_v33 = vmin.f32 %v609_v29, 16.0  ;;  %v5286_v34 = vadd.f32 %v427_v31, %v379_v30  ;;  %v361_v0 = vadd.f32 %v360_v32, %v5271_v21 }
  0xc0   :  { %v409_v35 = vpop.f32.mrf.mxu1 }
  0xc1   :  { %v622_v4 = vmul.f32 3.8918573e-05, %v5284_v33  ;;  %v5290_v37 = vadd.f32 %v409_v35, %v361_v0  ;;  %v611_v54 = vmul.f32 2.1237322e-06, %v5284_v33  ;;  %v5318_v19 = vmul.f32 0.70710677, %v5286_v34 }
  0xc2   :  { %v4586_v0 = vld [vmem:[#allocation8 + $0xe8] sm:$0xf0] }
  0xc3   :  { %v623_v41 = vadd.f32 0.001143296, %v622_v4  ;;  %v5293_v42 = vmul.f32 0.70710677, %v5290_v37  ;;  %v612_v1 = vadd.f32 0.00028619796, %v611_v54  ;;  %v1249_v30 = vmul.f32 %v5318_v19, %v5318_v19 }
  0xc4   :  { %v380_v44 = vpop.f32.mrf.mxu2  ;;  %v4589_v4 = vor.u32 %v4754_v28, %v4586_v0  ;;  %v4752_v0 = vld [vmem:[#allocation8 + $0xd4] sm:$0xf] }
  0xc5   :  { %v624_v45 = vmul.f32 %v623_v41, %v5284_v33  ;;  %v689_v46 = vmul.f32 %v5293_v42, %v5293_v42  ;;  %v429_v47 = vpop.f32.mrf.mxu3  ;;  %v381_v12 = vadd.f32 %v380_v44, %v5271_v21  ;;  %v5337_v41 = vmin.f32 %v1249_v30, 16.0 }
  0xc6   :  { %2315 = vmatpush.bf16.msra.mxu3 %v4589_v4  ;;  %v363_v44 = vpop.f32.mrf.mxu0  ;;  %v4578_v4 = vld [vmem:[#allocation8 + $0xd8] sm:$0xf0] }
  0xc7   :  { %v625_v51 = vadd.f32 0.014752088, %v624_v45  ;;  %v5298_v52 = vmin.f32 %v689_v46, 16.0  ;;  %v5320_v24 = vadd.f32 %v429_v47, %v381_v12  ;;  %v1251_v47 = vmul.f32 2.1237322e-06, %v5337_v41 }
  0xc8   :  { %v364_v48 = vadd.f32 %v363_v44, %v5271_v21 }
  0xc9   :  { %v626_v53 = vmul.f32 %v625_v51, %v5284_v33  ;;  %480 = vmatmul.bf16.gmra.mxu2 %v5246_v36  ;;  %v702_v55 = vmul.f32 3.8918573e-05, %v5298_v52  ;;  %v691_v36 = vmul.f32 2.1237322e-06, %v5298_v52  ;;  %v5334_v35 = vmul.f32 0.70710677, %v5320_v24  ;;  %v412_v51 = vpop.f32.mrf.mxu1 }
  0xca   :  { %529 = vmatmul.bf16.gmra.mxu3 %v5248_v40  ;;  %v613_v40 = vmul.f32 %v612_v1, %v5284_v33  ;;  %v5353_v57 = vadd.f32 %v412_v51, %v364_v48  ;;  %v4512_v48 = vld [vmem:[#allocation8 + $0x50] sm:$0xf] }
  0xcb   :  { %v627_v56 = vadd.f32 0.112945676, %v626_v53  ;;  %v703_v2 = vadd.f32 0.001143296, %v702_v55  ;;  %v692_v13 = vadd.f32 0.00028619796, %v691_v36 }
  0xcc   :  { %v383_v59 = vpop.f32.mrf.mxu2  ;;  %v614_v22 = vadd.f32 0.0036580483, %v613_v40  ;;  %v4736_v36 = vld [vmem:[#allocation8 + $0x54] sm:$0xf]  ;;  %v5367_v40 = vmul.f32 0.70710677, %v5353_v57 }
  0xcd   :  { %v628_v60 = vmul.f32 %v627_v56, %v5284_v33  ;;  %v432_v62 = vpop.f32.mrf.mxu3  ;;  %v384_v7 = vadd.f32 %v383_v59, %v5271_v21  ;;  %v704_v8 = vmul.f32 %v703_v2, %v5298_v52  ;;  %v693_v63 = vmul.f32 %v692_v13, %v5298_v52 }
  0xce   :  { %v615_v31 = vmul.f32 %v614_v22, %v5284_v33  ;;  %v1252_v56 = vadd.f32 0.00028619796, %v1251_v47  ;;  %v4581_v47 = vor.u32 %v4752_v0, %v4578_v4 }
  0xcf   :  { %v629_v9 = vadd.f32 0.4994258, %v628_v60  ;;  %v5309_v10 = vadd.f32 %v432_v62, %v384_v7  ;;  %v705_v11 = vadd.f32 0.014752088, %v704_v8  ;;  %v694_v38 = vadd.f32 0.0036580483, %v693_v63  ;;  %v365_v7 = vpop.f32.mrf.mxu0 }
  0xd0   :  { %v4514_v8 = vld [vmem:[#allocation8 + $0x58] sm:$0xf0]  ;;  %v4739_v63 = vld [vmem:[#allocation8 + $0x64] sm:$0xf0]  ;;  %2316 = vmatpush.bf16.msra.mxu3 %v4581_v47 }
  0xd1   :  { %v706_v14 = vmul.f32 %v705_v11, %v5298_v52  ;;  %v630_v16 = vmul.f32 %v629_v9, %v5284_v33  ;;  %v695_v46 = vmul.f32 %v694_v38, %v5298_v52  ;;  %v1253_v9 = vmul.f32 %v1252_v56, %v5337_v41  ;;  %v414_v30 = vpop.f32.mrf.mxu1 }
  0xd2   :  { %v4517_v22 = vor.u32 %v4736_v36, %v4514_v8  ;;  %v5396_v56 = vmul.f32 0.70710677, %v5309_v10 }
  0xd3   :  { %v707_v23 = vadd.f32 0.112945676, %v706_v14  ;;  %v5326_v29 = vadd.f32 1.0, %v630_v16  ;;  %v696_v55 = vadd.f32 0.05243302, %v695_v46 }
  0xd4   :  { %v5314_v15 = vpop.f32.mrf.mxu2  ;;  %2267 = vmatpush.bf16.msra.mxu2 %v4517_v22 }
  0xd5   :  { %v5322_v25 = vpop.f32.mrf.mxu3  ;;  %v708_v5 = vmul.f32 %v707_v23, %v5298_v52  ;;  %4850 = vrcp.f32 %v5326_v29  ;;  %v697_v1 = vmul.f32 %v696_v55, %v5298_v52  ;;  %v4520_v23 = vld [vmem:[#allocation8 + $0x60] sm:$0xf]  ;;  %vm637_vm0 = vweird.f32 %v5326_v29 }
  0xd7   :  { %v709_v32 = vadd.f32 0.4994258, %v708_v5  ;;  %v698_v28 = vadd.f32 0.18741608, %v697_v1 }
  0xd9   :  { %485 = vmatmul.bf16.gmra.mxu2 %v5253_v3  ;;  %v710_v43 = vmul.f32 %v709_v32, %v5298_v52  ;;  %v616_v3 = vadd.f32 0.05243302, %v615_v31  ;;  %v1254_v31 = vadd.f32 0.0036580483, %v1253_v9  ;;  %v699_v46 = vmul.f32 %v698_v28, %v5298_v52 }
  0xda   :  { %534 = vmatmul.bf16.gmra.mxu3 %v5255_v6  ;;  %v1329_v6 = vmul.f32 %v5334_v35, %v5334_v35 }
  0xdb   :  { %v5340_v45 = vadd.f32 1.0, %v710_v43  ;;  %v617_v50 = vmul.f32 %v616_v3, %v5284_v33  ;;  %v5349_v53 = vpop.eup %4850  ;;  %v4521_v43 = vor.u32 %v4739_v63, %v4520_v23  ;;  %v641_v3 = vand.u32 2147483647, %v5326_v29 }
  0xdc   :  { %v388_v39 = vpop.f32.mrf.mxu2  ;;  %v5351_v54 = vmin.f32 %v1329_v6, 16.0  ;;  %v633_v60 = vmul.f32 %v5349_v53, %v5326_v29  ;;  %vm638_vm1 = vweird.f32 %v5349_v53  ;;  %v1409_v23 = vmul.f32 %v5396_v56, %v5396_v56 }
  0xdd   :  { %4852 = vrcp.f32 %v5340_v45  ;;  %v437_v49 = vpop.f32.mrf.mxu3  ;;  %v618_v59 = vadd.f32 0.18741608, %v617_v50  ;;  %v389_v14 = vadd.f32 %v388_v39, %v5271_v21  ;;  %vm717_vm2 = vweird.f32 %v5340_v45  ;;  %2168 = vmatpush.bf16.msrb.mxu0 %v4521_v43  ;;  %vm5403_vm4 = vmor %vm637_vm0, %vm638_vm1 }
  0xde   :  { %v1331_v62 = vmul.f32 2.1237322e-06, %v5351_v54  ;;  %v634_v12 = vsub.f32 1.0, %v633_v60  ;;  %v643_v50 = vand.u32 2147483648, %v5326_v29  ;;  %v723_v51 = vand.u32 2147483648, %v5340_v45 }
  0xdf   :  { %v619_v11 = vmul.f32 %v618_v59, %v5284_v33  ;;  %v366_v33 = vadd.f32 %v365_v7, %v5271_v21  ;;  %v5378_v32 = vadd.f32 %v437_v49, %v389_v14  ;;  %v4737_v49 = vld [vmem:[#allocation8 + $0x54] sm:$0xf0]  ;;  %vm5411_vm5 = vcmp.eq.f32.partialorder %v641_v3, 8.507059e+37  ;;  %v4734_v3 = vld [vmem:[#allocation8 + $0x44] sm:$0xf] }
  0xe0   :  { %v1332_v16 = vadd.f32 0.00028619796, %v1331_v62  ;;  %v635_v38 = vmul.f32 %v5349_v53, %v634_v12  ;;  %v721_v62 = vand.u32 2147483647, %v5340_v45  ;;  %v4513_v9 = vor.u32 %v4737_v49, %v4512_v48  ;;  %v4504_v12 = vld [vmem:[#allocation8 + $0x40] sm:$0xf] }
  0xe1   :  { %v5409_v1 = vadd.f32 %v414_v30, %v366_v33  ;;  %v644_v14 = vor.u32 1.1754944e-38, %v643_v50  ;;  %v386_v33 = vadd.f32 %v5314_v15, %v5271_v21  ;;  %v5446_v48 = vmin.f32 %v1409_v23, 16.0  ;;  %v4496_v15 = vld [vmem:[#allocation8 + $0x30] sm:$0xf]  ;;  %v4733_v49 = vld [vmem:[#allocation8 + $0x34] sm:$0xf0] }
  0xe2   :  { %v1333_v44 = vmul.f32 %v1332_v16, %v5351_v54  ;;  %v636_v59 = vadd.f32 %v5349_v53, %v635_v38  ;;  %v724_v16 = vor.u32 1.1754944e-38, %v723_v51  ;;  %2169 = vmatpush.bf16.msrb.mxu0 %v4513_v9  ;;  %vm722_vm7 = vcmp.eq.f32.partialorder %v721_v62, 8.507059e+37  ;;  %v4488_v7 = vld [vmem:[#allocation8 + $0x20] sm:$0xf]  ;;  %v4731_v29 = vld [vmem:[#allocation8 + $0x24] sm:$0xf0] }
  0xe3   :  { %v5359_v61 = vpop.eup %4852  ;;  %v5434_v30 = vmul.f32 0.70710677, %v5409_v1  ;;  %v1411_v9 = vmul.f32 2.1237322e-06, %v5446_v48 }
  0xe4   :  { %v5355_v58 = vpop.f32.mrf.mxu2  ;;  %v713_v2 = vmul.f32 %v5359_v61, %v5340_v45  ;;  %vm718_vm3 = vweird.f32 %v5359_v61  ;;  %v1334_v22 = vadd.f32 0.0036580483, %v1333_v44  ;;  %v640_v63 = vsel %vm5403_vm4, %v5349_v53, %v636_v59 }
  0xe5   :  { %v5373_v5 = vpop.f32.mrf.mxu3  ;;  %vm5419_vm6 = vmor %vm717_vm2, %vm718_vm3  ;;  %v645_v44 = vsel %vm5411_vm5, %v644_v14, %v640_v63  ;;  %v4490_v14 = vld [vmem:[#allocation8 + $0x28] sm:$0xf0]  ;;  %v4489_v63 = vor.u32 %v4731_v29, %v4488_v7  ;;  %v5484_v7 = vmul.f32 0.70710677, %v5378_v32 }
  0xe6   :  { %v714_v13 = vsub.f32 1.0, %v713_v2  ;;  %v368_v2 = vpop.f32.mrf.mxu0  ;;  %v1335_v47 = vmul.f32 %v1334_v22, %v5351_v54 }
  0xe7   :  { %v369_v8 = vadd.f32 %v368_v2, %v5271_v21  ;;  %v4497_v2 = vor.u32 %v4733_v49, %v4496_v15  ;;  %v1412_v15 = vadd.f32 0.00028619796, %v1411_v9  ;;  %8581 = vst [vmem:[#allocation18_spill] sm:$0xff] %v5484_v7 }
  0xe8   :  { %v715_v39 = vmul.f32 %v5359_v61, %v714_v13  ;;  %v4735_v13 = vld [vmem:[#allocation8 + $0x44] sm:$0xf0] }
  0xe9   :  { %490 = vmatmul.bf16.gmra.mxu2 %v5259_v17  ;;  %v769_v17 = vmul.f32 %v5367_v40, %v5367_v40  ;;  %v4505_v4 = vor.u32 %v4735_v13, %v4504_v12  ;;  %v4730_v13 = vld [vmem:[#allocation8 + $0x24] sm:$0xf] }
  0xea   :  { %539 = vmatmul.bf16.gmra.mxu3 %v5261_v18  ;;  %v620_v18 = vadd.f32 1.1283791, %v619_v11  ;;  %v716_v60 = vadd.f32 %v5359_v61, %v715_v39  ;;  %v700_v11 = vadd.f32 1.1283791, %v699_v46  ;;  %v1255_v39 = vmul.f32 %v1254_v31, %v5337_v41  ;;  %v4498_v31 = vld [vmem:[#allocation8 + $0x38] sm:$0xf0] }
  0xeb   :  { %v5393_v55 = vmin.f32 %v769_v17, 16.0  ;;  %v417_v17 = vpop.f32.mrf.mxu1  ;;  %2170 = vmatpush.bf16.msrb.mxu0 %v4505_v4  ;;  %v4570_v4 = vld [vmem:[#allocation8 + $0xc8] sm:$0xf0] }
  0xec   :  { %v5386_v6 = vpop.f32.mrf.mxu2  ;;  %v720_v28 = vsel %vm5419_vm6, %v5359_v61, %v716_v60  ;;  %v5438_v0 = vadd.f32 %v417_v17, %v369_v8  ;;  %v621_v38 = vmul.f32 %v620_v18, %v5279_v27  ;;  %v701_v53 = vmul.f32 %v700_v11, %v5293_v42  ;;  %v4506_v61 = vld [vmem:[#allocation8 + $0x48] sm:$0xf0]  ;;  %v4732_v42 = vld [vmem:[#allocation8 + $0x34] sm:$0xf] }
  0xed   :  { %v771_v36 = vmul.f32 2.1237322e-06, %v5393_v55  ;;  %v442_v45 = vpop.f32.mrf.mxu3  ;;  %v725_v46 = vsel %vm722_vm7, %v724_v16, %v720_v28  ;;  %v849_v27 = vmul.f32 %v5434_v30, %v5434_v30  ;;  %v5453_v18 = vadd.f32 %v5322_v25, %v386_v33 }
  0xee   :  { %v5456_v51 = vmul.f32 0.70710677, %v5438_v0  ;;  %v4509_v59 = vor.u32 %v4734_v3, %v4506_v61  ;;  %v646_v52 = vmul.f32 %v645_v44, %v621_v38  ;;  %v1256_v60 = vadd.f32 0.05243302, %v1255_v39  ;;  %v4480_v61 = vld [vmem:[#allocation8 + $0x10] sm:$0xf] }
  0xef   :  { %v772_v43 = vadd.f32 0.00028619796, %v771_v36  ;;  %v726_v62 = vmul.f32 %v725_v46, %v701_v53  ;;  %v1336_v36 = vadd.f32 0.05243302, %v1335_v47  ;;  %v4501_v11 = vor.u32 %v4732_v42, %v4498_v31  ;;  %2171 = vmatpush.bf16.msrb.mxu0 %v4497_v2  ;;  %v370_v53 = vpop.f32.mrf.mxu0  ;;  %v4728_v46 = vld [vmem:[#allocation8 + $0x14] sm:$0xf] }
  0xf0   :  { %2268 = vmatpush.bf16.msra.mxu2 %v4509_v59  ;;  %v545_v25 = vmul.f32 0.5, %v5274_v26  ;;  %v5461_v12 = vmin.f32 %v849_v27, 16.0  ;;  %v5464_v16 = vmul.f32 0.70710677, %v5453_v18  ;;  %v929_v22 = vmul.f32 %v5456_v51, %v5456_v51  ;;  %v4750_v26 = vld [vmem:[#allocation8 + $0xc4] sm:$0xf] }
  0xf1   :  { %v773_v8 = vmul.f32 %v772_v43, %v5393_v55  ;;  %v394_v23 = vadd.f32 %v5386_v6, %v5271_v21  ;;  %v4438_v17 = vclamps-f32 %v646_v52, 1.0  ;;  %v4440_v33 = vclamps-f32 %v726_v62, 1.0  ;;  %v4729_v6 = vld [vmem:[#allocation8 + $0x14] sm:$0xf0]  ;;  %v4482_v47 = vld [vmem:[#allocation8 + $0x18] sm:$0xf0] }
  0xf2   :  { %8579 = vst [vmem:[#allocation16_spill] sm:$0xff] %v5464_v16  ;;  %v851_v39 = vmul.f32 2.1237322e-06, %v5461_v12  ;;  %v4493_v3 = vor.u32 %v4730_v13, %v4490_v14  ;;  %v1257_v44 = vmul.f32 %v1256_v60, %v5337_v41  ;;  %v1489_v49 = vmul.f32 %v5464_v16, %v5464_v16  ;;  %v4472_v2 = vld [vmem:[#allocation8] sm:$0xf] }
  0xf3   :  { %v774_v38 = vadd.f32 0.0036580483, %v773_v8  ;;  %v5473_v43 = vadd.f32 %v442_v45, %v394_v23  ;;  %2172 = vmatpush.bf16.msrb.mxu0 %v4489_v63  ;;  %v5478_v27 = vmin.f32 %v929_v22, 16.0  ;;  %v4573_v42 = vor.u32 %v4750_v26, %v4570_v4  ;;  %v419_v29 = vpop.f32.mrf.mxu1 }
  0xf4   :  { %v5448_v50 = vpop.f32.mrf.mxu2  ;;  %2269 = vmatpush.bf16.msra.mxu2 %v4501_v11  ;;  %v1889_v59 = vadd.f32 1.0, %v4438_v17  ;;  %v547_v45 = vmul.f32 0.5, %v5290_v37  ;;  %v1891_v52 = vadd.f32 1.0, %v4440_v33  ;;  %v371_v62 = vadd.f32 %v370_v53, %v5271_v21  ;;  %v4727_v11 = vld [vmem:[#allocation8 + $0x4] sm:$0xf0] }
  0xf5   :  { %v5470_v28 = vpop.f32.mrf.mxu3  ;;  %8580 = vst [vmem:[#allocation17_spill] sm:$0xff] %v5473_v43  ;;  %v931_v60 = vmul.f32 2.1237322e-06, %v5478_v27  ;;  %2317 = vmatpush.bf16.msra.mxu3 %v4573_v42  ;;  %v4481_v8 = vor.u32 %v4729_v6, %v4480_v61  ;;  %v4485_v9 = vor.u32 %v4728_v46, %v4482_v47  ;;  %v1258_v13 = vadd.f32 0.18741608, %v1257_v44 }
  0xf6   :  { %v1337_v14 = vmul.f32 %v1336_v36, %v5351_v54  ;;  %v852_v22 = vadd.f32 0.00028619796, %v851_v39  ;;  %v775_v37 = vmul.f32 %v774_v38, %v5393_v55  ;;  %v1413_v23 = vmul.f32 %v1412_v15, %v5446_v48  ;;  %v4726_v17 = vld [vmem:[#allocation8 + $0x4] sm:$0xf]  ;;  %v4474_v33 = vld [vmem:[#allocation8 + $0x8] sm:$0xf0] }
  0xf7   :  { %v5489_v63 = vmin.f32 %v1489_v49, 16.0  ;;  %2173 = vmatpush.bf16.msrb.mxu0 %v4481_v8  ;;  %v1921_v26 = vmul.f32 %v1889_v59, %v545_v25  ;;  %v1923_v4 = vmul.f32 %v1891_v52, %v547_v45  ;;  %v5491_v53 = vadd.f32 %v419_v29, %v371_v62 }
  0xf8   :  { %2270 = vmatpush.bf16.msra.mxu2 %v4493_v3  ;;  %v4473_v3 = vor.u32 %v4727_v11, %v4472_v2  ;;  %v932_v61 = vadd.f32 0.00028619796, %v931_v60  ;;  %v1569_v44 = vmul.f32 %v5484_v7, %v5484_v7  ;;  %v1338_v39 = vadd.f32 0.18741608, %v1337_v14  ;;  %v373_v14 = vpop.f32.mrf.mxu0 }
  0xf9   :  { %v4477_v38 = vor.u32 %v4726_v17, %v4474_v33  ;;  %v1414_v6 = vadd.f32 0.0036580483, %v1413_v23  ;;  %v853_v46 = vmul.f32 %v852_v22, %v5461_v12  ;;  %v1491_v47 = vmul.f32 2.1237322e-06, %v5489_v63 }
  0xfa   :  { %v1259_v25 = vmul.f32 %v1258_v13, %v5337_v41  ;;  %v776_v15 = vadd.f32 0.05243302, %v775_v37  ;;  %v5499_v49 = vmul.f32 0.70710677, %v5491_v53  ;;  %v1953_v42 = vpack.c.bf16 %v1923_v4, %v1921_v26 }
  0xfb   :  { %2174 = vmatpush.bf16.msrb.mxu0 %v4473_v3  ;;  %v5502_v59 = vmul.f32 0.5, %v5286_v34  ;;  %v933_v45 = vmul.f32 %v932_v61, %v5478_v27  ;;  %v5505_v52 = vmin.f32 %v1569_v44, 16.0  ;;  %v5508_v62 = vperm.slane %v5268_v20, 1 }
  0xfc   :  { %v456_v31 = vpop.f32.mrf.mxu2  ;;  %2271 = vmatpush.bf16.msra.mxu2 %v4485_v9  ;;  %v5511_v60 = vmul.f32 0.5, %v5320_v24  ;;  %v1339_v29 = vmul.f32 %v1338_v39, %v5351_v54  ;;  %v391_v8 = vadd.f32 %v5355_v58, %v5271_v21  ;;  %v782_v34 = vmul.f32 3.8918573e-05, %v5393_v55 }
  0xfd   :  { %v505_v36 = vpop.f32.mrf.mxu3  ;;  %8582 = vst [vmem:[#allocation19_spill] sm:$0xff] %v5502_v59  ;;  %v1415_v9 = vmul.f32 %v1414_v6, %v5446_v48  ;;  %v854_v11 = vadd.f32 0.0036580483, %v853_v46  ;;  %v1492_v13 = vadd.f32 0.00028619796, %v1491_v47  ;;  %v457_v20 = vadd.f32 %v456_v31, %v5508_v62  ;;  %v422_v6 = vpop.f32.mrf.mxu1 }
  0xfe   :  { %8583 = vst [vmem:[#allocation20_spill] sm:$0xff] %v5505_v52  ;;  %2175 = vmatmul.bf16.vlgmr.msrb.gmra.mxu0 %v1953_v42  ;;  %v1260_v22 = vadd.f32 1.1283791, %v1259_v25  ;;  %v777_v37 = vmul.f32 %v776_v15, %v5393_v55  ;;  %v1009_v24 = vmul.f32 %v5499_v49, %v5499_v49  ;;  %v934_v58 = vadd.f32 0.0036580483, %v933_v45 }
  0xff   :  { %8584 = vst [vmem:[#allocation21_spill] sm:$0xff] %v5511_v60  ;;  %v1571_v17 = vmul.f32 2.1237322e-06, %v5505_v52  ;;  %v5524_v33 = vadd.f32 %v505_v36, %v457_v20  ;;  %v783_v26 = vadd.f32 0.001143296, %v782_v34  ;;  %v5527_v3 = vmul.f32 0.5, %v5353_v57 }
 0x100   :  { %2272 = vmatpush.bf16.msra.mxu2 %v4477_v38  ;;  %v1340_v4 = vadd.f32 1.1283791, %v1339_v29  ;;  %v5530_v31 = vmul.f32 0.5, %v5309_v10  ;;  %v5533_v61 = vadd.f32 %v5373_v5, %v391_v8  ;;  %v1416_v44 = vadd.f32 0.05243302, %v1415_v9 }
 0x101   :  { %v855_v39 = vmul.f32 %v854_v11, %v5461_v12  ;;  %v1493_v38 = vmul.f32 %v1492_v13, %v5489_v63  ;;  %v784_v36 = vmul.f32 %v783_v26, %v5393_v55  ;;  %v5539_v47 = vmul.f32 0.5, %v5409_v1  ;;  %v4592_v25 = vld [vmem:[#allocation8 + $0xf0] sm:$0xf]  ;;  %v4757_v29 = vld [vmem:[#allocation8 + $0xf4] sm:$0xf0] }
 0x102   :  { %8585 = vst [vmem:[#allocation22_spill] sm:$0xff] %v5530_v31  ;;  %v5541_v57 = vmin.f32 %v1009_v24, 16.0  ;;  %v5544_v10 = vmul.f32 0.70710677, %v5524_v33  ;;  %v5549_v15 = vmul.f32 %v1260_v22, %v5318_v19  ;;  %v935_v45 = vmul.f32 %v934_v58, %v5478_v27 }
 0x103   :  { %2273 = vmatmul.bf16.vlgmr.msra.gmra.mxu2 %v1953_v42  ;;  %v778_v42 = vadd.f32 0.18741608, %v777_v37  ;;  %v5554_v1 = vmul.f32 0.70710677, %v5533_v61  ;;  %v4593_v9 = vor.u32 %v4757_v29, %v4592_v25  ;;  %v1417_v11 = vmul.f32 %v1416_v44, %v5446_v48  ;;  %v375_v44 = vpop.f32.mrf.mxu0 }
 0x104   :  { %v458_v2 = vpop.f32.mrf.mxu2  ;;  %8586 = vst [vmem:[#allocation23_spill] sm:$0xff] %v5549_v15  ;;  %v1011_v8 = vmul.f32 2.1237322e-06, %v5541_v57  ;;  %v649_v34 = vmul.f32 %v5544_v10, %v5544_v10  ;;  %v856_v13 = vadd.f32 0.05243302, %v855_v39  ;;  %v5560_v22 = vmul.f32 0.5, %v5453_v18 }
 0x105   :  { %v459_v23 = vadd.f32 %v458_v2, %v5508_v62  ;;  %v507_v46 = vpop.f32.mrf.mxu3  ;;  %v1572_v2 = vadd.f32 0.00028619796, %v1571_v17  ;;  %8587 = vst [vmem:[#allocation24_spill] sm:$0xff] %v5554_v1  ;;  %v1494_v20 = vadd.f32 0.0036580483, %v1493_v38  ;;  %v374_v37 = vadd.f32 %v373_v14, %v5271_v21  ;;  %2216 = vmatpush.bf16.msrb.mxu1 %v4593_v9 }
 0x106   :  { %v785_v19 = vadd.f32 0.014752088, %v784_v36  ;;  %8588 = vst [vmem:[#allocation25_spill] sm:$0xff] %v5560_v22  ;;  %v779_v58 = vmul.f32 %v778_v42, %v5393_v55  ;;  %v936_v17 = vadd.f32 0.05243302, %v935_v45  ;;  %v5569_v39 = vmin.f32 %v649_v34, 16.0 }
 0x107   :  { %v5546_v5 = vadd.f32 %v507_v46, %v459_v23  ;;  %v862_v23 = vmul.f32 3.8918573e-05, %v5461_v12  ;;  %v1573_v26 = vmul.f32 %v1572_v2, %v5505_v52  ;;  %v1012_v38 = vadd.f32 0.00028619796, %v1011_v8  ;;  %v4554_v15 = vld [vmem:[#allocation8 + $0xa8] sm:$0xf0] }
 0x108   :  { %v1649_v18 = vmul.f32 %v5554_v1, %v5554_v1  ;;  %v786_v14 = vmul.f32 %v785_v19, %v5393_v55  ;;  %v5575_v36 = vmul.f32 %v1340_v4, %v5334_v35  ;;  %v1418_v25 = vadd.f32 0.18741608, %v1417_v11  ;;  %v424_v4 = vpop.f32.mrf.mxu1 }
 0x109   :  { %v5564_v24 = vmul.f32 0.70710677, %v5546_v5  ;;  %v863_v46 = vadd.f32 0.001143296, %v862_v23  ;;  %v857_v29 = vmul.f32 %v856_v13, %v5461_v12  ;;  %v1495_v42 = vmul.f32 %v1494_v20, %v5489_v63 }
 0x10a   :  { %8589 = vst [vmem:[#allocation26_spill] sm:$0xff] %v5575_v36  ;;  %v5579_v45 = vadd.f32 %v422_v6, %v374_v37  ;;  %v376_v2 = vadd.f32 %v375_v44, %v5271_v21  ;;  %v780_v9 = vadd.f32 1.1283791, %v779_v58  ;;  %v5586_v19 = vmul.f32 0.5, %v5438_v0 }
 0x10b   :  { %v729_v8 = vmul.f32 %v5564_v24, %v5564_v24  ;;  %v864_v34 = vmul.f32 %v863_v46, %v5461_v12  ;;  %v937_v35 = vmul.f32 %v936_v17, %v5478_v27  ;;  %v662_v11 = vmul.f32 3.8918573e-05, %v5569_v39 }
 0x10c   :  { %v1574_v13 = vadd.f32 0.0036580483, %v1573_v26  ;;  %v1013_v6 = vmul.f32 %v1012_v38, %v5541_v57  ;;  %v5591_v20 = vmin.f32 %v1649_v18, 16.0  ;;  %v787_v37 = vadd.f32 0.112945676, %v786_v14 }
 0x10d   :  { %v1419_v23 = vmul.f32 %v1418_v25, %v5446_v48  ;;  %v858_v44 = vadd.f32 0.18741608, %v857_v29  ;;  %v1496_v1 = vadd.f32 0.05243302, %v1495_v42  ;;  %v865_v46 = vadd.f32 0.014752088, %v864_v34 }
 0x10e   :  { %v5595_v58 = vmul.f32 0.70710677, %v5579_v45  ;;  %v5597_v0 = vadd.f32 %v424_v4, %v376_v2  ;;  %v5599_v17 = vmin.f32 %v729_v8, 16.0  ;;  %v788_v22 = vmul.f32 %v787_v37, %v5393_v55  ;;  %v4748_v37 = vld [vmem:[#allocation8 + $0xb4] sm:$0xf] }
 0x10f   :  { %v938_v26 = vadd.f32 0.18741608, %v937_v35  ;;  %v5603_v38 = vmul.f32 0.5, %v5378_v32  ;;  %v663_v18 = vadd.f32 0.001143296, %v662_v11  ;;  %v866_v14 = vmul.f32 %v865_v46, %v5461_v12 }
 0x110   :  { %v1575_v25 = vmul.f32 %v1574_v13, %v5505_v52  ;;  %v1014_v29 = vadd.f32 0.0036580483, %v1013_v6  ;;  %v1651_v42 = vmul.f32 2.1237322e-06, %v5591_v20  ;;  %v789_v34 = vadd.f32 0.4994258, %v788_v22 }
 0x111   :  { %8590 = vst [vmem:[#allocation27_spill] sm:$0xff] %v5603_v38  ;;  %v5609_v2 = vmul.f32 %v780_v9, %v5367_v40  ;;  %v1420_v8 = vadd.f32 1.1283791, %v1419_v23  ;;  %v859_v4 = vmul.f32 %v858_v44, %v5461_v12  ;;  %v1497_v35 = vmul.f32 %v1496_v1, %v5489_v63  ;;  %v4562_v32 = vld [vmem:[#allocation8 + $0xb8] sm:$0xf0] }
 0x112   :  { %v1089_v11 = vmul.f32 %v5595_v58, %v5595_v58  ;;  %v5616_v46 = vmul.f32 0.70710677, %v5597_v0  ;;  %v4565_v13 = vor.u32 %v4748_v37, %v4562_v32  ;;  %v742_v6 = vmul.f32 3.8918573e-05, %v5599_v17 }
 0x113   :  { %v939_v22 = vmul.f32 %v938_v26, %v5478_v27  ;;  %v664_v40 = vmul.f32 %v663_v18, %v5569_v39  ;;  %v790_v9 = vmul.f32 %v789_v34, %v5393_v55  ;;  %v867_v23 = vadd.f32 0.112945676, %v866_v14 }
 0x114   :  { %v1576_v44 = vadd.f32 0.05243302, %v1575_v25  ;;  %v5623_v1 = vmul.f32 0.5, %v5491_v53  ;;  %v1015_v38 = vmul.f32 %v1014_v29, %v5541_v57  ;;  %v1652_v31 = vadd.f32 0.00028619796, %v1651_v42  ;;  %2318 = vmatpush.bf16.msra.mxu3 %v4565_v13 }
 0x115   :  { %v860_v60 = vadd.f32 1.1283791, %v859_v4  ;;  %v5627_v37 = vmul.f32 0.70710677, %v5473_v43  ;;  %v5629_v32 = vadd.f32 1.0, %v790_v9  ;;  %v868_v26 = vmul.f32 %v867_v23, %v5461_v12 }
 0x116   :  { %v1498_v18 = vadd.f32 0.18741608, %v1497_v35  ;;  %v5632_v59 = vmin.f32 %v1089_v11, 16.0  ;;  %v1169_v55 = vmul.f32 %v5616_v46, %v5616_v46  ;;  %v743_v53 = vadd.f32 0.001143296, %v742_v6 }
 0x117   :  { %8591 = vst [vmem:[#allocation28_spill] sm:$0xff] %v5627_v37  ;;  %v5637_v14 = vmul.f32 %v1420_v8, %v5396_v56  ;;  %v940_v25 = vadd.f32 1.1283791, %v939_v22  ;;  %v665_v29 = vadd.f32 0.014752088, %v664_v40  ;;  %4854 = vrcp.f32 %v5629_v32 }
 0x118   :  { %v1577_v42 = vmul.f32 %v1576_v44, %v5505_v52  ;;  %v1016_v34 = vadd.f32 0.05243302, %v1015_v38  ;;  %v1653_v4 = vmul.f32 %v1652_v31, %v5591_v20  ;;  %v1091_v35 = vmul.f32 2.1237322e-06, %v5632_v59  ;;  %v4584_v23 = vld [vmem:[#allocation8 + $0xe0] sm:$0xf] }
 0x119   :  { %8592 = vst [vmem:[#allocation29_spill] sm:$0xff] %v5637_v14  ;;  %v5644_v11 = vmul.f32 %v860_v60, %v5434_v30  ;;  %v1729_v13 = vmul.f32 %v5627_v37, %v5627_v37  ;;  %v869_v6 = vadd.f32 0.4994258, %v868_v26  ;;  %v942_v56 = vmul.f32 3.8918573e-05, %v5478_v27 }
 0x11a   :  { %v5650_v8 = vmul.f32 %v1498_v18, %v5489_v63  ;;  %v5653_v22 = vmul.f32 0.5, %v5579_v45  ;;  %v5655_v38 = vmin.f32 %v1169_v55, 16.0  ;;  %v744_v31 = vmul.f32 %v743_v53, %v5599_v17  ;;  %v4755_v44 = vld [vmem:[#allocation8 + $0xe4] sm:$0xf0] }
 0x11b   :  { %v5659_v40 = vmul.f32 %v940_v25, %v5456_v51  ;;  %v666_v30 = vmul.f32 %v665_v29, %v5569_v39  ;;  %v731_v60 = vmul.f32 2.1237322e-06, %v5599_v17  ;;  %v870_v9 = vmul.f32 %v869_v6, %v5461_v12 }
 0x11c   :  { %v1578_v26 = vadd.f32 0.18741608, %v1577_v42  ;;  %v1017_v18 = vmul.f32 %v1016_v34, %v5541_v57  ;;  %v1654_v45 = vadd.f32 0.0036580483, %v1653_v4  ;;  %v1092_v37 = vadd.f32 0.00028619796, %v1091_v35 }
 0x11d   :  { %v4855_v55 = vpop.eup %4854  ;;  %v5665_v43 = vmin.f32 %v1729_v13, 16.0  ;;  %v1171_v53 = vmul.f32 2.1237322e-06, %v5655_v38  ;;  %v5668_v51 = vadd.f32 1.0, %v870_v9  ;;  %v943_v25 = vadd.f32 0.001143296, %v942_v56 }
 0x11e   :  { %v651_v29 = vmul.f32 2.1237322e-06, %v5569_v39  ;;  %v745_v14 = vadd.f32 0.014752088, %v744_v31  ;;  %v793_v12 = vmul.f32 %v4855_v55, %v5629_v32  ;;  %v4585_v6 = vor.u32 %v4755_v44, %v4584_v23 }
 0x11f   :  { %v667_v36 = vadd.f32 0.112945676, %v666_v30  ;;  %v732_v42 = vadd.f32 0.00028619796, %v731_v60  ;;  %vm797_vm8 = vweird.f32 %v5629_v32  ;;  %v803_v34 = vand.u32 2147483648, %v5629_v32 }
 0x120   :  { %v794_v4 = vsub.f32 1.0, %v793_v12  ;;  %vm798_vm9 = vweird.f32 %v4855_v55  ;;  %v801_v35 = vand.u32 2147483647, %v5629_v32  ;;  %4856 = vrcp.f32 %v5668_v51  ;;  %2217 = vmatpush.bf16.msrb.mxu1 %v4585_v6  ;;  %v4746_v12 = vld [vmem:[#allocation8 + $0xa4] sm:$0xf] }
 0x121   :  { %v1018_v13 = vadd.f32 0.18741608, %v1017_v18  ;;  %v1093_v56 = vmul.f32 %v1092_v37, %v5632_v59  ;;  %v1172_v31 = vadd.f32 0.00028619796, %v1171_v53  ;;  %v944_v9 = vmul.f32 %v943_v25, %v5478_v27  ;;  %vm5689_vm10 = vmor %vm797_vm8, %vm798_vm9  ;;  %v4576_v53 = vld [vmem:[#allocation8 + $0xd0] sm:$0xf] }
 0x122   :  { %v5679_v30 = vmul.f32 %v1578_v26, %v5505_v52  ;;  %v652_v60 = vadd.f32 0.00028619796, %v651_v29  ;;  %v746_v23 = vmul.f32 %v745_v14, %v5599_v17  ;;  %v795_v44 = vmul.f32 %v4855_v55, %v794_v4  ;;  %v4753_v14 = vld [vmem:[#allocation8 + $0xd4] sm:$0xf0] }
 0x123   :  { %v396_v7 = vadd.f32 %v5448_v50, %v5271_v21  ;;  %v668_v6 = vmul.f32 %v667_v36, %v5569_v39  ;;  %v733_v18 = vmul.f32 %v732_v42, %v5599_v17  ;;  %v804_v26 = vor.u32 1.1754944e-38, %v803_v34 }
 0x124   :  { %8593 = vst [vmem:[#allocation30_spill] sm:$0xff] %v5679_v30  ;;  %v796_v25 = vadd.f32 %v4855_v55, %v795_v44  ;;  %vm5693_vm11 = vcmp.eq.f32.partialorder %v801_v35, 8.507059e+37  ;;  %v4557_v21 = vor.u32 %v4746_v12, %v4554_v15  ;;  %v4577_v50 = vor.u32 %v4753_v14, %v4576_v53 }
 0x125   :  { %v1655_v36 = vmul.f32 %v1654_v45, %v5591_v20  ;;  %v1094_v42 = vadd.f32 0.0036580483, %v1093_v56  ;;  %v1731_v4 = vmul.f32 2.1237322e-06, %v5665_v43  ;;  %v945_v32 = vadd.f32 0.014752088, %v944_v9 }
 0x126   :  { %v4857_v52 = vpop.eup %4856  ;;  %v1173_v16 = vmul.f32 %v1172_v31, %v5655_v38  ;;  %v747_v30 = vadd.f32 0.112945676, %v746_v23  ;;  %v800_v34 = vsel %vm5689_vm10, %v4855_v55, %v796_v25  ;;  %2319 = vmatpush.bf16.msra.mxu3 %v4557_v21  ;;  %2218 = vmatpush.bf16.msrb.mxu1 %v4577_v50  ;;  %v1022_v35 = vmul.f32 3.8918573e-05, %v5541_v57 }
 0x127   :  { %v653_v15 = vmul.f32 %v652_v60, %v5569_v39  ;;  %v734_v44 = vadd.f32 0.0036580483, %v733_v18  ;;  %v805_v45 = vsel %vm5693_vm11, %v804_v26, %v800_v34  ;;  %v873_v56 = vmul.f32 %v4857_v52, %v5668_v51 }
 0x128   :  { %v669_v9 = vadd.f32 0.4994258, %v668_v6  ;;  %vm877_vm12 = vweird.f32 %v5668_v51  ;;  %v881_v31 = vand.u32 2147483647, %v5668_v51  ;;  %v883_v23 = vand.u32 2147483648, %v5668_v51 }
 0x129   :  { %v806_v55 = vmul.f32 %v805_v45, %v5609_v2  ;;  %v874_v12 = vsub.f32 1.0, %v873_v56  ;;  %vm878_vm13 = vweird.f32 %v4857_v52  ;;  %v946_v37 = vmul.f32 %v945_v32, %v5478_v27 }
 0x12a   :  { %v1174_v60 = vadd.f32 0.0036580483, %v1173_v16  ;;  %v5713_v18 = vadd.f32 %v5470_v28, %v396_v7  ;;  %v748_v26 = vmul.f32 %v747_v30, %v5599_v17  ;;  %v1023_v53 = vadd.f32 0.001143296, %v1022_v35  ;;  %vm5721_vm14 = vmor %vm877_vm12, %vm878_vm13 }
 0x12b   :  { %v1095_v6 = vmul.f32 %v1094_v42, %v5632_v59  ;;  %v654_v14 = vadd.f32 0.0036580483, %v653_v15  ;;  %v875_v25 = vmul.f32 %v4857_v52, %v874_v12  ;;  %v947_v29 = vadd.f32 0.112945676, %v946_v37 }
 0x12c   :  { %v1656_v21 = vadd.f32 0.05243302, %v1655_v36  ;;  %v670_v50 = vmul.f32 %v669_v9, %v5569_v39  ;;  %v735_v2 = vmul.f32 %v734_v44, %v5599_v17  ;;  %v884_v28 = vor.u32 1.1754944e-38, %v883_v23 }
 0x12d   :  { %v4442_v7 = vclamps-f32 %v806_v55, 1.0  ;;  %v876_v30 = vadd.f32 %v4857_v52, %v875_v25  ;;  %vm882_vm15 = vcmp.eq.f32.partialorder %v881_v31, 8.507059e+37  ;;  %v948_v42 = vmul.f32 %v947_v29, %v5478_v27 }
 0x12e   :  { %v1019_v32 = vmul.f32 %v1018_v13, %v5541_v57  ;;  %v1175_v36 = vmul.f32 %v1174_v60, %v5655_v38  ;;  %v749_v34 = vadd.f32 0.4994258, %v748_v26  ;;  %v1024_v35 = vmul.f32 %v1023_v53, %v5541_v57 }
 0x12f   :  { %v1096_v15 = vadd.f32 0.05243302, %v1095_v6  ;;  %v1732_v44 = vadd.f32 0.00028619796, %v1731_v4  ;;  %v655_v51 = vmul.f32 %v654_v14, %v5569_v39  ;;  %v880_v45 = vsel %vm5721_vm14, %v4857_v52, %v876_v30 }
 0x130   :  { %v5732_v56 = vadd.f32 1.0, %v670_v50  ;;  %v736_v9 = vadd.f32 0.05243302, %v735_v2  ;;  %v885_v31 = vsel %vm882_vm15, %v884_v28, %v880_v45  ;;  %v949_v23 = vadd.f32 0.4994258, %v948_v42 }
 0x131   :  { %v5735_v55 = vmul.f32 0.70710677, %v5713_v18  ;;  %v886_v13 = vmul.f32 %v885_v31, %v5644_v11  ;;  %v1893_v12 = vadd.f32 1.0, %v4442_v7  ;;  %v1025_v37 = vadd.f32 0.014752088, %v1024_v35 }
 0x132   :  { %v1176_v60 = vadd.f32 0.05243302, %v1175_v36  ;;  %v750_v4 = vmul.f32 %v749_v34, %v5599_v17  ;;  %v950_v26 = vmul.f32 %v949_v23, %v5478_v27  ;;  %v1102_v53 = vmul.f32 3.8918573e-05, %v5632_v59 }
 0x133   :  { %v1097_v52 = vmul.f32 %v1096_v15, %v5632_v59  ;;  %v656_v6 = vadd.f32 0.05243302, %v655_v51  ;;  %v4444_v14 = vclamps-f32 %v886_v13, 1.0  ;;  %v1026_v25 = vmul.f32 %v1025_v37, %v5541_v57 }
 0x134   :  { %4858 = vrcp.f32 %v5732_v56  ;;  %v737_v29 = vmul.f32 %v736_v9, %v5599_v17  ;;  %v5745_v11 = vadd.f32 1.0, %v950_v26  ;;  %v1103_v50 = vadd.f32 0.001143296, %v1102_v53  ;;  %v4751_v26 = vld [vmem:[#allocation8 + $0xc4] sm:$0xf0] }
 0x135   :  { %v1895_v2 = vadd.f32 1.0, %v4444_v14  ;;  %v1925_v16 = vmul.f32 %v1893_v12, %v5527_v3  ;;  %v1027_v28 = vadd.f32 0.112945676, %v1026_v25  ;;  %v1182_v27 = vmul.f32 3.8918573e-05, %v5655_v38 }
 0x136   :  { %v1177_v7 = vmul.f32 %v1176_v60, %v5655_v38  ;;  %v1809_v30 = vmul.f32 %v5735_v55, %v5735_v55  ;;  %v5752_v42 = vadd.f32 1.0, %v750_v4  ;;  %4860 = vrcp.f32 %v5745_v11 }
 0x137   :  { %v1020_v36 = vadd.f32 1.1283791, %v1019_v32  ;;  %v1098_v34 = vadd.f32 0.18741608, %v1097_v52  ;;  %v657_v35 = vmul.f32 %v656_v6, %v5569_v39  ;;  %v1927_v15 = vmul.f32 %v1895_v2, %v5539_v47  ;;  %v4546_v2 = vld [vmem:[#allocation8 + $0x98] sm:$0xf0] }
 0x138   :  { %v738_v51 = vadd.f32 0.18741608, %v737_v29  ;;  %v1028_v3 = vmul.f32 %v1027_v28, %v5541_v57  ;;  %v1104_v45 = vmul.f32 %v1103_v50, %v5632_v59  ;;  %v1183_v9 = vadd.f32 0.001143296, %v1182_v27  ;;  %v4744_v50 = vld [vmem:[#allocation8 + $0x94] sm:$0xf] }
 0x139   :  { %v5760_v31 = vmul.f32 %v1656_v21, %v5591_v20  ;;  %v1733_v23 = vmul.f32 %v1732_v44, %v5665_v43  ;;  %v5764_v13 = vmul.f32 0.5, %v5597_v0  ;;  %v1955_v32 = vpack.c.bf16 %v1927_v15, %v1925_v16  ;;  %v4568_v44 = vld [vmem:[#allocation8 + $0xc0] sm:$0xf]  ;;  %v4560_v27 = vld [vmem:[#allocation8 + $0xb0] sm:$0xf] }
 0x13a   :  { %v5766_v12 = vpop.eup %4858  ;;  %v1178_v37 = vadd.f32 0.18741608, %v1177_v7  ;;  %v5768_v60 = vmin.f32 %v1809_v30, 16.0  ;;  %4862 = vrcp.f32 %v5752_v42  ;;  %v1029_v47 = vadd.f32 0.4994258, %v1028_v3 }
 0x13b   :  { %v5772_v4 = vmul.f32 %v1020_v36, %v5499_v49  ;;  %v1099_v21 = vmul.f32 %v1098_v34, %v5632_v59  ;;  %2180 = vmatmul.bf16.gmra.mxu0 %v1955_v32  ;;  %2278 = vmatmul.bf16.gmra.mxu2 %v1955_v32  ;;  %v1105_v0 = vadd.f32 0.014752088, %v1104_v45  ;;  %v1184_v53 = vmul.f32 %v1183_v9, %v5655_v38  ;;  %v4749_v7 = vld [vmem:[#allocation8 + $0xb4] sm:$0xf0]  ;;  %v461_v34 = vpop.f32.mrf.mxu2 }
 0x13c   :  { %v4861_v52 = vpop.eup %4860  ;;  %v658_v6 = vadd.f32 0.18741608, %v657_v35  ;;  %v739_v14 = vmul.f32 %v738_v51, %v5599_v17  ;;  %v1030_v25 = vmul.f32 %v1029_v47, %v5541_v57  ;;  %v4569_v29 = vor.u32 %v4751_v26, %v4568_v44 }
 0x13d   :  { %v673_v49 = vmul.f32 %v5766_v12, %v5732_v56  ;;  %v953_v16 = vmul.f32 %v4861_v52, %v5745_v11  ;;  %vm957_vm0 = vweird.f32 %v5745_v11  ;;  %v4549_v28 = vor.u32 %v4744_v50, %v4546_v2 }
 0x13e   :  { %v961_v30 = vand.u32 2147483647, %v5745_v11  ;;  %v963_v36 = vand.u32 2147483648, %v5745_v11  ;;  %v5784_v17 = vadd.f32 1.0, %v1030_v25  ;;  %2219 = vmatpush.bf16.msrb.mxu1 %v4569_v29  ;;  %v4561_v57 = vor.u32 %v4749_v7, %v4560_v27 }
 0x13f   :  { %v954_v35 = vsub.f32 1.0, %v953_v16  ;;  %vm958_vm1 = vweird.f32 %v4861_v52  ;;  %2320 = vmatpush.bf16.msra.mxu3 %v4549_v28  ;;  %v1106_v15 = vmul.f32 %v1105_v0, %v5632_v59  ;;  %v1185_v51 = vadd.f32 0.014752088, %v1184_v53  ;;  %v510_v28 = vpop.f32.mrf.mxu3 }
 0x140   :  { %v5787_v3 = vpop.eup %4862  ;;  %v1100_v45 = vadd.f32 1.1283791, %v1099_v21  ;;  %v1179_v9 = vmul.f32 %v1178_v37, %v5655_v38  ;;  %v659_v32 = vmul.f32 %v658_v6, %v5569_v39  ;;  %4864 = vrcp.f32 %v5784_v17  ;;  %vm5801_vm2 = vmor %vm957_vm0, %vm958_vm1 }
 0x141   :  { %v5792_v47 = vadd.f32 0.0036580483, %v1733_v23  ;;  %v5795_v44 = vmul.f32 2.1237322e-06, %v5768_v60  ;;  %v740_v26 = vadd.f32 1.1283791, %v739_v14  ;;  %v955_v25 = vmul.f32 %v4861_v52, %v954_v35 }
 0x142   :  { %v674_v29 = vsub.f32 1.0, %v673_v49  ;;  %v683_v0 = vand.u32 2147483648, %v5732_v56  ;;  %v964_v39 = vor.u32 1.1754944e-38, %v963_v36  ;;  %2220 = vmatpush.bf16.msrb.mxu1 %v4561_v57  ;;  %v1107_v37 = vadd.f32 0.112945676, %v1106_v15 }
 0x143   :  { %v753_v23 = vmul.f32 %v5787_v3, %v5752_v42  ;;  %v956_v53 = vadd.f32 %v4861_v52, %v955_v25  ;;  %vm962_vm3 = vcmp.eq.f32.partialorder %v961_v30, 8.507059e+37  ;;  %v1186_v6 = vmul.f32 %v1185_v51, %v5655_v38 }
 0x144   :  { %v5809_v14 = vmul.f32 %v1100_v45, %v5595_v58  ;;  %v5811_v50 = vadd.f32 1.1283791, %v1179_v9  ;;  %v5813_v11 = vadd.f32 1.1283791, %v659_v32  ;;  %v1108_v2 = vmul.f32 %v1107_v37, %v5632_v59 }
 0x145   :  { %v681_v49 = vand.u32 2147483647, %v5732_v56  ;;  %v5818_v16 = vmul.f32 %v740_v26, %v5564_v24  ;;  %v960_v27 = vsel %vm5801_vm2, %v4861_v52, %v956_v53  ;;  %v1187_v7 = vadd.f32 0.112945676, %v1186_v6 }
 0x146   :  { %v4865_v30 = vpop.eup %4864  ;;  %v5822_v36 = vor.u32 1.1754944e-38, %v683_v0  ;;  %v462_v58 = vadd.f32 %v461_v34, %v5508_v62  ;;  %v965_v57 = vsel %vm962_vm3, %v964_v39, %v960_v27  ;;  %v1109_v35 = vadd.f32 0.4994258, %v1108_v2  ;;  %v463_v34 = vpop.f32.mrf.mxu2  ;;  %v4552_v2 = vld [vmem:[#allocation8 + $0xa0] sm:$0xf] }
 0x147   :  { %v675_v15 = vmul.f32 %v5766_v12, %v674_v29  ;;  %vm677_vm4 = vweird.f32 %v5732_v56  ;;  %v754_v51 = vsub.f32 1.0, %v753_v23  ;;  %v1033_v24 = vmul.f32 %v4865_v30, %v5784_v17  ;;  %v4747_v27 = vld [vmem:[#allocation8 + $0xa4] sm:$0xf0] }
 0x148   :  { %v1188_v45 = vmul.f32 %v1187_v7, %v5655_v38  ;;  %v966_v9 = vmul.f32 %v965_v57, %v5659_v40  ;;  %vm1037_vm5 = vweird.f32 %v5784_v17  ;;  %v1043_v52 = vand.u32 2147483648, %v5784_v17 }
 0x149   :  { %v1110_v32 = vmul.f32 %v1109_v35, %v5632_v59  ;;  %v1034_v26 = vsub.f32 1.0, %v1033_v24  ;;  %vm1038_vm6 = vweird.f32 %v4865_v30  ;;  %v1041_v25 = vand.u32 2147483647, %v5784_v17 }
 0x14a   :  { %v1189_v29 = vadd.f32 0.4994258, %v1188_v45  ;;  %v761_v0 = vand.u32 2147483647, %v5752_v42  ;;  %v5835_v21 = vadd.f32 %v510_v28, %v462_v58  ;;  %v1262_v40 = vmul.f32 3.8918573e-05, %v5337_v41  ;;  %vm5851_vm8 = vmor %vm1037_vm5, %vm1038_vm6 }
 0x14b   :  { %v5837_v39 = vadd.f32 1.0, %v1110_v32  ;;  %vm5840_vm7 = vcmp.eq.f32.partialorder %v681_v49, 8.507059e+37  ;;  %v755_v59 = vmul.f32 %v5787_v3, %v754_v51  ;;  %v763_v23 = vand.u32 2147483648, %v5752_v42 }
 0x14c   :  { %v1035_v53 = vmul.f32 %v4865_v30, %v1034_v26  ;;  %v1190_v6 = vmul.f32 %v1189_v29, %v5655_v38  ;;  %v464_v28 = vadd.f32 %v463_v34, %v5508_v62  ;;  %v4446_v7 = vclamps-f32 %v966_v9, 1.0  ;;  %v512_v9 = vpop.f32.mrf.mxu3  ;;  %v4538_v29 = vld [vmem:[#allocation8 + $0x88] sm:$0xf0] }
 0x14d   :  { %v1044_v58 = vor.u32 1.1754944e-38, %v1043_v52  ;;  %4866 = vrcp.f32 %v5837_v39  ;;  %v676_v57 = vadd.f32 %v5766_v12, %v675_v15  ;;  %vm678_vm9 = vweird.f32 %v5766_v12 }
 0x14e   :  { %v1036_v38 = vadd.f32 %v4865_v30, %v1035_v53  ;;  %vm1042_vm10 = vcmp.eq.f32.partialorder %v1041_v25, 8.507059e+37  ;;  %v5859_v35 = vmul.f32 0.70710677, %v5835_v21  ;;  %v5861_v51 = vadd.f32 1.0, %v1190_v6  ;;  %vm5870_vm13 = vmor %vm677_vm4, %vm678_vm9  ;;  %v4742_v25 = vld [vmem:[#allocation8 + $0x84] sm:$0xf] }
 0x14f   :  { %v4553_v24 = vor.u32 %v4747_v27, %v4552_v2  ;;  %v1263_v17 = vadd.f32 0.001143296, %v1262_v40  ;;  %v756_v45 = vadd.f32 %v5787_v3, %v755_v59  ;;  %vm757_vm11 = vweird.f32 %v5752_v42  ;;  %v4544_v27 = vld [vmem:[#allocation8 + $0x90] sm:$0xf] }
 0x150   :  { %vm758_vm12 = vweird.f32 %v5787_v3  ;;  %v1040_v15 = vsel %vm5851_vm8, %v4865_v30, %v1036_v38  ;;  %v5874_v32 = vadd.f32 %v512_v9, %v464_v28  ;;  %v1897_v26 = vadd.f32 1.0, %v4446_v7  ;;  %v4745_v28 = vld [vmem:[#allocation8 + $0x94] sm:$0xf0] }
 0x151   :  { %v1045_v34 = vsel %vm1042_vm10, %v1044_v58, %v1040_v15  ;;  %4868 = vrcp.f32 %v5861_v51  ;;  %2221 = vmatpush.bf16.msrb.mxu1 %v4553_v24  ;;  %v680_v40 = vsel %vm5870_vm13, %v5766_v12, %v676_v57  ;;  %vm5880_vm14 = vcmp.eq.f32.partialorder %v761_v0, 8.507059e+37  ;;  %vm5889_vm15 = vmor %vm757_vm11, %vm758_vm12 }
 0x152   :  { %v764_v56 = vor.u32 1.1754944e-38, %v763_v23  ;;  %v1046_v59 = vmul.f32 %v1045_v34, %v5772_v4  ;;  %v809_v2 = vmul.f32 %v5859_v35, %v5859_v35  ;;  %v1121_v12 = vand.u32 2147483647, %v5837_v39 }
 0x153   :  { %v4867_v53 = vpop.eup %4866  ;;  %v4541_v0 = vor.u32 %v4742_v25, %v4538_v29  ;;  %v1264_v23 = vmul.f32 %v1263_v17, %v5337_v41  ;;  %v760_v4 = vsel %vm5889_vm15, %v5787_v3, %v756_v45  ;;  %v1123_v49 = vand.u32 2147483648, %v5837_v39 }
 0x154   :  { %v4448_v7 = vclamps-f32 %v1046_v59, 1.0  ;;  %v1113_v42 = vmul.f32 %v4867_v53, %v5837_v39  ;;  %v685_v58 = vsel %vm5840_vm7, %v5822_v36, %v680_v40  ;;  %v5906_v57 = vmul.f32 0.70710677, %v5874_v32 }
 0x155   :  { %v1929_v38 = vmul.f32 %v1897_v26, %v5586_v19  ;;  %vm1117_vm0 = vweird.f32 %v5837_v39  ;;  %2321 = vmatpush.bf16.msra.mxu3 %v4541_v0  ;;  %vm1118_vm1 = vweird.f32 %v4867_v53  ;;  %v4545_v3 = vor.u32 %v4745_v28, %v4544_v27 }
 0x156   :  { %v1899_v24 = vadd.f32 1.0, %v4448_v7  ;;  %v1114_v17 = vsub.f32 1.0, %v1113_v42  ;;  %v765_v9 = vsel %vm5880_vm14, %v764_v56, %v760_v4  ;;  %vm5912_vm2 = vcmp.eq.f32.partialorder %v1121_v12, 8.507059e+37  ;;  %vm5921_vm3 = vmor %vm1117_vm0, %vm1118_vm1 }
 0x157   :  { %v4869_v45 = vpop.eup %4868  ;;  %v1265_v36 = vadd.f32 0.014752088, %v1264_v23  ;;  %v1342_v37 = vmul.f32 3.8918573e-05, %v5351_v54  ;;  %v1124_v34 = vor.u32 1.1754944e-38, %v1123_v49  ;;  %2222 = vmatpush.bf16.msrb.mxu1 %v4545_v3  ;;  %vm1197_vm4 = vweird.f32 %v5861_v51 }
 0x158   :  { %v1931_v19 = vmul.f32 %v1899_v24, %v5623_v1  ;;  %v1115_v52 = vmul.f32 %v4867_v53, %v1114_v17  ;;  %v1193_v26 = vmul.f32 %v4869_v45, %v5861_v51  ;;  %vm1198_vm5 = vweird.f32 %v4869_v45  ;;  %v466_v1 = vpop.f32.mrf.mxu2  ;;  %v515_v17 = vpop.f32.mrf.mxu3 }
 0x159   :  { %v1201_v29 = vand.u32 2147483647, %v5861_v51  ;;  %v1203_v40 = vand.u32 2147483648, %v5861_v51  ;;  %v1266_v6 = vmul.f32 %v1265_v36, %v5337_v41  ;;  %v661_v39 = vmul.f32 %v5813_v11, %v5544_v10  ;;  %vm5945_vm6 = vmor %vm1197_vm4, %vm1198_vm5 }
 0x15a   :  { %v1957_v30 = vpack.c.bf16 %v1931_v19, %v1929_v38  ;;  %v1116_v56 = vadd.f32 %v4867_v53, %v1115_v52  ;;  %v1194_v59 = vsub.f32 1.0, %v1193_v26  ;;  %v766_v12 = vmul.f32 %v765_v9, %v5818_v16 }
 0x15b   :  { %v5932_v0 = vmin.f32 %v809_v2, 16.0  ;;  %v1343_v27 = vadd.f32 0.001143296, %v1342_v37  ;;  %v1181_v28 = vmul.f32 %v5811_v50, %v5616_v46  ;;  %v1267_v7 = vadd.f32 0.112945676, %v1266_v6 }
 0x15c   :  { %2185 = vmatmul.bf16.gmra.mxu0 %v1957_v30  ;;  %2283 = vmatmul.bf16.gmra.mxu2 %v1957_v30  ;;  %v1120_v23 = vsel %vm5921_vm3, %v4867_v53, %v1116_v56  ;;  %v1195_v4 = vmul.f32 %v4869_v45, %v1194_v59  ;;  %v686_v42 = vmul.f32 %v685_v58, %v661_v39  ;;  %v1204_v46 = vor.u32 1.1754944e-38, %v1203_v40 }
 0x15d   :  { %v889_v49 = vmul.f32 %v5906_v57, %v5906_v57  ;;  %v1125_v10 = vsel %vm5912_vm2, %v1124_v34, %v1120_v23  ;;  %vm1202_vm7 = vcmp.eq.f32.partialorder %v1201_v29, 8.507059e+37  ;;  %v1268_v53 = vmul.f32 %v1267_v7, %v5337_v41 }
 0x15e   :  { %v1126_v50 = vmul.f32 %v1125_v10, %v5809_v14  ;;  %v1196_v16 = vadd.f32 %v4869_v45, %v1195_v4  ;;  %v4441_v2 = vclamps-f32 %v766_v12, 1.0  ;;  %v811_v58 = vmul.f32 2.1237322e-06, %v5932_v0 }
 0x15f   :  { %v1344_v38 = vmul.f32 %v1343_v27, %v5351_v54  ;;  %v1422_v24 = vmul.f32 3.8918573e-05, %v5446_v48  ;;  %v546_v51 = vmul.f32 0.5, %v5524_v33  ;;  %v1269_v15 = vadd.f32 0.4994258, %v1268_v53 }
 0x160   :  { %v4450_v3 = vclamps-f32 %v1126_v50, 1.0  ;;  %v1200_v9 = vsel %vm5945_vm6, %v4869_v45, %v1196_v16  ;;  %v1812_v14 = vadd.f32 0.00028619796, %v5795_v44  ;;  %v4439_v36 = vclamps-f32 %v686_v42, 1.0  ;;  %v468_v59 = vpop.f32.mrf.mxu2 }
 0x161   :  { %v1205_v37 = vsel %vm1202_vm7, %v1204_v46, %v1200_v9  ;;  %v1345_v19 = vadd.f32 0.014752088, %v1344_v38  ;;  %v5958_v52 = vmin.f32 %v889_v49, 16.0  ;;  %v1270_v25 = vmul.f32 %v1269_v15, %v5337_v41 }
 0x162   :  { %v1206_v34 = vmul.f32 %v1205_v37, %v1181_v28  ;;  %v1901_v26 = vadd.f32 1.0, %v4450_v3  ;;  %v1892_v29 = vadd.f32 1.0, %v4441_v2  ;;  %v812_v40 = vadd.f32 0.00028619796, %v811_v58  ;;  %v517_v58 = vpop.f32.mrf.mxu3  ;;  %v4743_v3 = vld [vmem:[#allocation8 + $0x84] sm:$0xf0] }
 0x163   :  { %v1346_v33 = vmul.f32 %v1345_v19, %v5351_v54  ;;  %v1423_v30 = vadd.f32 0.001143296, %v1422_v24  ;;  %v548_v56 = vmul.f32 0.5, %v5546_v5  ;;  %v467_v45 = vadd.f32 %v466_v1, %v5508_v62  ;;  %v4536_v24 = vld [vmem:[#allocation8 + $0x80] sm:$0xf] }
 0x164   :  { %v4452_v44 = vclamps-f32 %v1206_v34, 1.0  ;;  %v5964_v6 = vadd.f32 1.0, %v1270_v25  ;;  %v1890_v39 = vadd.f32 1.0, %v4439_v36  ;;  %v1502_v28 = vmul.f32 3.8918573e-05, %v5489_v63 }
 0x165   :  { %v1347_v12 = vadd.f32 0.112945676, %v1346_v33  ;;  %v1424_v27 = vmul.f32 %v1423_v30, %v5446_v48  ;;  %v891_v41 = vmul.f32 2.1237322e-06, %v5958_v52  ;;  %v1933_v4 = vmul.f32 %v1901_v26, %v5653_v22 }
 0x166   :  { %v1903_v23 = vadd.f32 1.0, %v4452_v44  ;;  %4870 = vrcp.f32 %v5964_v6  ;;  %v1924_v5 = vmul.f32 %v1892_v29, %v548_v56  ;;  %v813_v1 = vmul.f32 %v812_v40, %v5932_v0 }
 0x167   :  { %v469_v7 = vadd.f32 %v468_v59, %v5508_v62  ;;  %v1348_v42 = vmul.f32 %v1347_v12, %v5351_v54  ;;  %v5974_v49 = vadd.f32 %v515_v17, %v467_v45  ;;  %v1425_v11 = vadd.f32 0.014752088, %v1424_v27  ;;  %v8618_v45 = vld [vmem:[#allocation30_spill] sm:$0xff] }
 0x168   :  { %v1935_v10 = vmul.f32 %v1903_v23, %v5764_v13  ;;  %v1503_v46 = vadd.f32 0.001143296, %v1502_v28  ;;  %v1735_v50 = vmul.f32 %v5792_v47, %v5665_v43  ;;  %v1813_v22 = vmul.f32 %v1812_v14, %v5768_v60 }
 0x169   :  { %v1922_v16 = vmul.f32 %v1890_v39, %v546_v51  ;;  %v1349_v53 = vadd.f32 0.4994258, %v1348_v42  ;;  %v892_v2 = vadd.f32 0.00028619796, %v891_v41  ;;  %v1426_v9 = vmul.f32 %v1425_v11, %v5446_v48  ;;  %v8619_v11 = vld [vmem:[#allocation16_spill] sm:$0xff] }
 0x16a   :  { %v1959_v38 = vpack.c.bf16 %v1935_v10, %v1933_v4  ;;  %v1504_v17 = vmul.f32 %v1503_v46, %v5489_v63  ;;  %v814_v15 = vadd.f32 0.0036580483, %v813_v1  ;;  %v5982_v13 = vadd.f32 %v517_v58, %v469_v7 }
 0x16b   :  { %v1350_v36 = vmul.f32 %v1349_v53, %v5351_v54  ;;  %v4537_v37 = vor.u32 %v4743_v3, %v4536_v24  ;;  %v5986_v14 = vmul.f32 0.70710677, %v5974_v49  ;;  %v1954_v51 = vpack.c.bf16 %v1924_v5, %v1922_v16 }
 0x16c   :  { %v4871_v47 = vpop.eup %4870  ;;  %2190 = vmatmul.bf16.gmra.mxu0 %v1959_v38  ;;  %2288 = vmatmul.bf16.gmra.mxu2 %v1959_v38  ;;  %v1427_v19 = vadd.f32 0.112945676, %v1426_v9  ;;  %v1505_v34 = vadd.f32 0.014752088, %v1504_v17  ;;  %v1500_v26 = vadd.f32 1.1283791, %v5650_v8  ;;  %v893_v33 = vmul.f32 %v892_v2, %v5958_v52 }
 0x16d   :  { %v5990_v25 = vmul.f32 0.5, %v5533_v61  ;;  %v1273_v29 = vmul.f32 %v4871_v47, %v5964_v6  ;;  %v5993_v40 = vadd.f32 1.0, %v1350_v36  ;;  %2223 = vmatpush.bf16.msrb.mxu1 %v4537_v37  ;;  %v1814_v54 = vadd.f32 0.0036580483, %v1813_v22  ;;  %2322 = vmatmul.bf16.vlgmr.msra.gmra.mxu3 %v1954_v51  ;;  %v471_v37 = vpop.f32.mrf.mxu2 }
 0x16e   :  { %v1428_v30 = vmul.f32 %v1427_v19, %v5446_v48  ;;  %v1506_v56 = vmul.f32 %v1505_v34, %v5489_v63  ;;  %v1580_v59 = vadd.f32 1.1283791, %v8618_v45  ;;  %v6000_v8 = vmul.f32 0.70710677, %v5982_v13 }
 0x16f   :  { %v1274_v61 = vsub.f32 1.0, %v1273_v29  ;;  %4872 = vrcp.f32 %v5993_v40  ;;  %v1658_v44 = vadd.f32 0.18741608, %v5760_v31  ;;  %v1736_v39 = vadd.f32 0.05243302, %v1735_v50  ;;  %v8620_v50 = vld [vmem:[#allocation18_spill] sm:$0xff] }
 0x170   :  { %v815_v12 = vmul.f32 %v814_v15, %v5932_v0  ;;  %v969_v27 = vmul.f32 %v5986_v14, %v5986_v14  ;;  %2224 = vmatmul.bf16.vlgmr.msrb.gmra.mxu1 %v1954_v51  ;;  %vm1278_vm8 = vweird.f32 %v4871_v47  ;;  %v1283_v41 = vand.u32 2147483648, %v5964_v6 }
 0x171   :  { %v1275_v28 = vmul.f32 %v4871_v47, %v1274_v61  ;;  %v1429_v23 = vadd.f32 0.4994258, %v1428_v30  ;;  %v1815_v4 = vmul.f32 %v1814_v54, %v5768_v60  ;;  %v894_v5 = vadd.f32 0.0036580483, %v893_v33  ;;  %v8621_v33 = vld [vmem:[#allocation20_spill] sm:$0xff] }
 0x172   :  { %v1281_v1 = vand.u32 2147483647, %v5964_v6  ;;  %v1507_v7 = vadd.f32 0.112945676, %v1506_v56  ;;  %v1049_v31 = vmul.f32 %v6000_v8, %v6000_v8  ;;  %vm1277_vm9 = vweird.f32 %v5964_v6  ;;  %v8622_v56 = vld [vmem:[#allocation23_spill] sm:$0xff] }
 0x173   :  { %v1276_v42 = vadd.f32 %v4871_v47, %v1275_v28  ;;  %v1430_v10 = vmul.f32 %v1429_v23, %v5446_v48  ;;  %v6015_v46 = vmul.f32 %v1500_v26, %v8619_v11  ;;  %v6018_v22 = vmul.f32 %v1580_v59, %v8620_v50  ;;  %vm1279_vm10 = vmor %vm1277_vm9, %vm1278_vm8 }
 0x174   :  { %v1659_v16 = vmul.f32 %v1658_v44, %v5591_v20  ;;  %v6021_v53 = vmin.f32 %v969_v27, 16.0  ;;  %v816_v58 = vadd.f32 0.05243302, %v815_v12  ;;  %v1284_v24 = vor.u32 1.1754944e-38, %v1283_v41 }
 0x175   :  { %v4873_v2 = vpop.eup %4872  ;;  %v1280_v38 = vsel %vm1279_vm10, %v4871_v47, %v1276_v42  ;;  %v6024_v3 = vadd.f32 1.0, %v1430_v10  ;;  %v1737_v48 = vmul.f32 %v1736_v39, %v5665_v43  ;;  %vm1282_vm11 = vcmp.eq.f32.partialorder %v1281_v1, 8.507059e+37 }
 0x176   :  { %v1353_v6 = vmul.f32 %v4873_v2, %v5993_v40  ;;  %v1508_v9 = vmul.f32 %v1507_v7, %v5489_v63  ;;  %v1816_v17 = vadd.f32 0.05243302, %v1815_v4  ;;  %v895_v15 = vmul.f32 %v894_v5, %v5958_v52 }
 0x177   :  { %v6030_v36 = vmin.f32 %v1049_v31, 16.0  ;;  %v1285_v51 = vsel %vm1282_vm11, %v1284_v24, %v1280_v38  ;;  %v6032_v19 = vadd.f32 1.1283791, %v1659_v16  ;;  %v971_v47 = vmul.f32 2.1237322e-06, %v6021_v53  ;;  %v520_v31 = vpop.f32.mrf.mxu3  ;;  %v8623_v24 = vld [vmem:[#allocation26_spill] sm:$0xff] }
 0x178   :  { %v1354_v34 = vsub.f32 1.0, %v1353_v6  ;;  %4874 = vrcp.f32 %v6024_v3  ;;  %v817_v26 = vmul.f32 %v816_v58, %v5932_v0  ;;  %v1361_v29 = vand.u32 2147483647, %v5993_v40 }
 0x179   :  { %v1363_v54 = vand.u32 2147483648, %v5993_v40  ;;  %v1582_v30 = vmul.f32 3.8918573e-05, %v8621_v33  ;;  %v1286_v45 = vmul.f32 %v1285_v51, %v8622_v56  ;;  %vm1358_vm12 = vweird.f32 %v4873_v2 }
 0x17a   :  { %v1355_v59 = vmul.f32 %v4873_v2, %v1354_v34  ;;  %v1509_v61 = vadd.f32 0.4994258, %v1508_v9  ;;  %v6041_v44 = vadd.f32 0.18741608, %v1737_v48  ;;  %v1817_v39 = vmul.f32 %v1816_v17, %v5768_v60  ;;  %v473_v17 = vpop.f32.mrf.mxu2 }
 0x17b   :  { %v896_v12 = vadd.f32 0.05243302, %v895_v15  ;;  %v1051_v27 = vmul.f32 2.1237322e-06, %v6030_v36  ;;  %vm1357_vm13 = vweird.f32 %v5993_v40  ;;  %v822_v23 = vmul.f32 3.8918573e-05, %v5932_v0 }
 0x17c   :  { %v1356_v28 = vadd.f32 %v4873_v2, %v1355_v59  ;;  %v1510_v41 = vmul.f32 %v1509_v61, %v5489_v63  ;;  %v818_v4 = vadd.f32 0.18741608, %v817_v26  ;;  %v972_v5 = vadd.f32 0.00028619796, %v971_v47  ;;  %vm1359_vm14 = vmor %vm1357_vm13, %vm1358_vm12 }
 0x17d   :  { %vm1362_vm15 = vcmp.eq.f32.partialorder %v1361_v29, 8.507059e+37  ;;  %v1364_v1 = vor.u32 1.1754944e-38, %v1363_v54  ;;  %v4454_v42 = vclamps-f32 %v1286_v45, 1.0  ;;  %v1583_v50 = vadd.f32 0.001143296, %v1582_v30 }
 0x17e   :  { %v4875_v7 = vpop.eup %4874  ;;  %v1360_v10 = vsel %vm1359_vm14, %v4873_v2, %v1356_v28  ;;  %v6048_v11 = vadd.f32 1.0, %v1510_v41  ;;  %v6050_v16 = vadd.f32 0.18741608, %v1817_v39  ;;  %v1052_v58 = vadd.f32 0.00028619796, %v1051_v27  ;;  %v8624_v41 = vld [vmem:[#allocation19_spill] sm:$0xff] }
 0x17f   :  { %v1365_v40 = vsel %vm1362_vm15, %v1364_v1, %v1360_v10  ;;  %v1433_v63 = vmul.f32 %v4875_v7, %v6024_v3  ;;  %v472_v38 = vadd.f32 %v471_v37, %v5508_v62  ;;  %v823_v6 = vadd.f32 0.001143296, %v822_v23 }
 0x180   :  { %v1366_v48 = vmul.f32 %v1365_v40, %v8623_v24  ;;  %4876 = vrcp.f32 %v6048_v11  ;;  %v6057_v9 = vmul.f32 %v818_v4, %v5932_v0  ;;  %v897_v2 = vmul.f32 %v896_v12, %v5958_v52  ;;  %v8625_v4 = vld [vmem:[#allocation21_spill] sm:$0xff] }
 0x181   :  { %v1434_v15 = vsub.f32 1.0, %v1433_v63  ;;  %v1443_v51 = vand.u32 2147483648, %v6024_v3  ;;  %v973_v47 = vmul.f32 %v972_v5, %v6021_v53  ;;  %v1905_v26 = vadd.f32 1.0, %v4454_v42 }
 0x182   :  { %v4456_v34 = vclamps-f32 %v1366_v48, 1.0  ;;  %v1584_v37 = vmul.f32 %v1583_v50, %v8621_v33  ;;  %v1053_v29 = vmul.f32 %v1052_v58, %v6030_v36  ;;  %vm1438_vm0 = vweird.f32 %v4875_v7 }
 0x183   :  { %v1435_v54 = vmul.f32 %v4875_v7, %v1434_v15  ;;  %v1441_v30 = vand.u32 2147483647, %v6024_v3  ;;  %v6065_v56 = vadd.f32 %v520_v31, %v472_v38  ;;  %v474_v45 = vadd.f32 %v473_v17, %v5508_v62 }
 0x184   :  { %v1907_v59 = vadd.f32 1.0, %v4456_v34  ;;  %v824_v61 = vmul.f32 %v823_v6, %v5932_v0  ;;  %vm1437_vm1 = vweird.f32 %v6024_v3  ;;  %v1444_v12 = vor.u32 1.1754944e-38, %v1443_v51  ;;  %v522_v3 = vpop.f32.mrf.mxu3 }
 0x185   :  { %v1436_v39 = vadd.f32 %v4875_v7, %v1435_v54  ;;  %v1662_v27 = vmul.f32 3.8918573e-05, %v5591_v20  ;;  %v1937_v23 = vmul.f32 %v1905_v26, %v8624_v41  ;;  %vm1439_vm2 = vmor %vm1437_vm1, %vm1438_vm0  ;;  %v1585_v31 = vadd.f32 0.014752088, %v1584_v37 }
 0x186   :  { %v4877_v28 = vpop.eup %4876  ;;  %v1939_v5 = vmul.f32 %v1907_v59, %v8625_v4  ;;  %v825_v1 = vadd.f32 0.014752088, %v824_v61  ;;  %v898_v42 = vadd.f32 0.18741608, %v897_v2  ;;  %vm1442_vm3 = vcmp.eq.f32.partialorder %v1441_v30, 8.507059e+37 }
 0x187   :  { %v1440_v10 = vsel %vm1439_vm2, %v4875_v7, %v1436_v39  ;;  %v1513_v50 = vmul.f32 %v4877_v28, %v6048_v11  ;;  %v974_v58 = vadd.f32 0.0036580483, %v973_v47  ;;  %v6075_v40 = vmul.f32 0.70710677, %v6065_v56  ;;  %v8626_v47 = vld [vmem:[#allocation29_spill] sm:$0xff] }
 0x188   :  { %v1961_v63 = vpack.c.bf16 %v1939_v5, %v1937_v23  ;;  %v1445_v38 = vsel %vm1442_vm3, %v1444_v12, %v1440_v10  ;;  %v1054_v24 = vadd.f32 0.0036580483, %v1053_v29  ;;  %v6077_v48 = vadd.f32 %v522_v3, %v474_v45 }
 0x189   :  { %v1514_v6 = vsub.f32 1.0, %v1513_v50  ;;  %v1663_v17 = vadd.f32 0.001143296, %v1662_v27  ;;  %v1523_v2 = vand.u32 2147483648, %v6048_v11  ;;  %v826_v7 = vmul.f32 %v825_v1, %v5932_v0 }
 0x18a   :  { %2195 = vmatmul.bf16.gmra.mxu0 %v1961_v63  ;;  %2293 = vmatmul.bf16.gmra.mxu2 %v1961_v63  ;;  %v902_v15 = vmul.f32 3.8918573e-05, %v5958_v52  ;;  %v1586_v51 = vmul.f32 %v1585_v31, %v8621_v33  ;;  %v1446_v34 = vmul.f32 %v1445_v38, %v8626_v47  ;;  %vm1518_vm4 = vweird.f32 %v4877_v28 }
 0x18b   :  { %v1515_v26 = vmul.f32 %v4877_v28, %v1514_v6  ;;  %v1521_v37 = vand.u32 2147483647, %v6048_v11  ;;  %v1129_v29 = vmul.f32 %v6075_v40, %v6075_v40  ;;  %v827_v54 = vadd.f32 0.112945676, %v826_v7 }
 0x18c   :  { %v903_v30 = vadd.f32 0.001143296, %v902_v15  ;;  %v1587_v45 = vadd.f32 0.112945676, %v1586_v51  ;;  %v6088_v59 = vmul.f32 0.70710677, %v6077_v48  ;;  %vm1517_vm5 = vweird.f32 %v6048_v11 }
 0x18d   :  { %v1516_v61 = vadd.f32 %v4877_v28, %v1515_v26  ;;  %v1664_v39 = vmul.f32 %v1663_v17, %v5591_v20  ;;  %vm1519_vm6 = vmor %vm1517_vm5, %vm1518_vm4  ;;  %v1524_v12 = vor.u32 1.1754944e-38, %v1523_v2  ;;  %v828_v27 = vmul.f32 %v827_v54, %v5932_v0 }
 0x18e   :  { %v904_v41 = vmul.f32 %v903_v30, %v5958_v52  ;;  %v1588_v23 = vmul.f32 %v1587_v45, %v8621_v33  ;;  %v4458_v4 = vclamps-f32 %v1446_v34, 1.0  ;;  %vm1522_vm7 = vcmp.eq.f32.partialorder %v1521_v37, 8.507059e+37 }
 0x18f   :  { %v1520_v5 = vsel %vm1519_vm6, %v4877_v28, %v1516_v61  ;;  %v1665_v1 = vadd.f32 0.014752088, %v1664_v39  ;;  %v975_v31 = vmul.f32 %v974_v58, %v6021_v53  ;;  %v829_v50 = vadd.f32 0.4994258, %v828_v27  ;;  %v476_v58 = vpop.f32.mrf.mxu2  ;;  %v8627_v39 = vld [vmem:[#allocation22_spill] sm:$0xff] }
 0x190   :  { %v1525_v10 = vsel %vm1522_vm7, %v1524_v12, %v1520_v5  ;;  %v905_v3 = vadd.f32 0.014752088, %v904_v41  ;;  %v1055_v11 = vmul.f32 %v1054_v24, %v6030_v36  ;;  %v1589_v38 = vadd.f32 0.4994258, %v1588_v23  ;;  %v8628_v12 = vld [vmem:[#allocation25_spill] sm:$0xff]  ;;  %v8629_v23 = vld [vmem:[#allocation24_spill] sm:$0xff] }
 0x191   :  { %v1526_v63 = vmul.f32 %v1525_v10, %v6015_v46  ;;  %v1666_v6 = vmul.f32 %v1665_v1, %v5591_v20  ;;  %v6099_v17 = vmin.f32 %v1129_v29, 16.0  ;;  %v1209_v2 = vmul.f32 %v6088_v59, %v6088_v59 }
 0x192   :  { %v830_v28 = vmul.f32 %v829_v50, %v5932_v0  ;;  %v906_v7 = vmul.f32 %v905_v3, %v5958_v52  ;;  %v1909_v51 = vadd.f32 1.0, %v4458_v4  ;;  %v1590_v47 = vmul.f32 %v1589_v38, %v8621_v33  ;;  %v525_v50 = vpop.f32.mrf.mxu3 }
 0x193   :  { %v4460_v15 = vclamps-f32 %v1526_v63, 1.0  ;;  %v1667_v24 = vadd.f32 0.112945676, %v1666_v6  ;;  %v899_v46 = vmul.f32 %v898_v42, %v5958_v52  ;;  %v976_v34 = vadd.f32 0.05243302, %v975_v31 }
 0x194   :  { %v6107_v26 = vadd.f32 1.0, %v830_v28  ;;  %v907_v37 = vadd.f32 0.112945676, %v906_v7  ;;  %v1056_v29 = vadd.f32 0.05243302, %v1055_v11  ;;  %v6109_v30 = vadd.f32 1.0, %v1590_v47 }
 0x195   :  { %v1911_v54 = vadd.f32 1.0, %v4460_v15  ;;  %v1742_v0 = vmul.f32 3.8918573e-05, %v5665_v43  ;;  %v1131_v45 = vmul.f32 2.1237322e-06, %v6099_v17  ;;  %v6113_v61 = vmin.f32 %v1209_v2, 16.0 }
 0x196   :  { %4878 = vrcp.f32 %v6107_v26  ;;  %v1668_v33 = vmul.f32 %v1667_v24, %v5591_v20  ;;  %v1941_v42 = vmul.f32 %v1909_v51, %v8627_v39  ;;  %v908_v41 = vmul.f32 %v907_v37, %v5958_v52 }
 0x197   :  { %v1943_v27 = vmul.f32 %v1911_v54, %v8628_v12  ;;  %4880 = vrcp.f32 %v6109_v30  ;;  %v6123_v4 = vmul.f32 %v6032_v19, %v8629_v23  ;;  %v6127_v5 = vmul.f32 %v6041_v44, %v5665_v43 }
 0x198   :  { %v820_v1 = vadd.f32 1.1283791, %v6057_v9  ;;  %v900_v31 = vadd.f32 1.1283791, %v899_v46  ;;  %v977_v10 = vmul.f32 %v976_v34, %v6021_v53  ;;  %v909_v11 = vadd.f32 0.4994258, %v908_v41 }
 0x199   :  { %v1963_v3 = vpack.c.bf16 %v1943_v27, %v1941_v42  ;;  %v1743_v63 = vadd.f32 0.001143296, %v1742_v0  ;;  %v6133_v38 = vmul.f32 %v6050_v16, %v5768_v60  ;;  %v1057_v19 = vmul.f32 %v1056_v29, %v6030_v36 }
 0x19a   :  { %v1132_v6 = vadd.f32 0.00028619796, %v1131_v45  ;;  %v1669_v2 = vadd.f32 0.4994258, %v1668_v33  ;;  %v6137_v44 = vmul.f32 0.5, %v5835_v21  ;;  %v477_v28 = vadd.f32 %v476_v58, %v5508_v62  ;;  %v478_v58 = vpop.f32.mrf.mxu2 }
 0x19b   :  { %v1211_v9 = vmul.f32 2.1237322e-06, %v6113_v61  ;;  %2200 = vmatmul.bf16.gmra.mxu0 %v1963_v3  ;;  %2298 = vmatmul.bf16.gmra.mxu2 %v1963_v3  ;;  %v910_v7 = vmul.f32 %v909_v11, %v5958_v52  ;;  %v6143_v51 = vmul.f32 %v820_v1, %v5859_v35  ;;  %v6146_v16 = vmul.f32 0.5, %v5874_v32 }
 0x19c   :  { %v4879_v15 = vpop.eup %4878  ;;  %v6149_v47 = vmul.f32 %v900_v31, %v5906_v57  ;;  %v1670_v21 = vmul.f32 %v1669_v2, %v5591_v20  ;;  %v6152_v46 = vadd.f32 0.18741608, %v977_v10  ;;  %v1744_v52 = vmul.f32 %v1743_v63, %v5665_v43  ;;  %v527_v31 = vpop.f32.mrf.mxu3 }
 0x19d   :  { %v4881_v24 = vpop.eup %4880  ;;  %v833_v34 = vmul.f32 %v4879_v15, %v6107_v26  ;;  %v6155_v37 = vadd.f32 1.0, %v910_v7  ;;  %v6158_v35 = vadd.f32 0.18741608, %v1057_v19  ;;  %v6161_v32 = vmul.f32 %v1132_v6, %v6099_v17 }
 0x19e   :  { %v1593_v57 = vmul.f32 %v4881_v24, %v6109_v30  ;;  %v6164_v29 = vadd.f32 1.0, %v1670_v21  ;;  %v6166_v20 = vadd.f32 0.00028619796, %v1211_v9  ;;  %v6168_v54 = vadd.f32 %v525_v50, %v477_v28 }
 0x19f   :  { %v834_v0 = vsub.f32 1.0, %v833_v34  ;;  %4882 = vrcp.f32 %v6155_v37  ;;  %v479_v45 = vadd.f32 %v478_v58, %v5508_v62  ;;  %v843_v33 = vand.u32 2147483648, %v6107_v26 }
 0x1a0   :  { %v1594_v39 = vsub.f32 1.0, %v1593_v57  ;;  %v1822_v42 = vmul.f32 3.8918573e-05, %v5768_v60  ;;  %vm838_vm8 = vweird.f32 %v4879_v15  ;;  %4884 = vrcp.f32 %v6164_v29 }
 0x1a1   :  { %v835_v12 = vmul.f32 %v4879_v15, %v834_v0  ;;  %v1745_v27 = vadd.f32 0.014752088, %v1744_v52  ;;  %vm837_vm9 = vweird.f32 %v6107_v26  ;;  %v841_v41 = vand.u32 2147483647, %v6107_v26 }
 0x1a2   :  { %v1595_v23 = vmul.f32 %v4881_v24, %v1594_v39  ;;  %v1603_v1 = vand.u32 2147483648, %v6109_v30  ;;  %vm1598_vm10 = vweird.f32 %v4881_v24  ;;  %v1601_v50 = vand.u32 2147483647, %v6109_v30  ;;  %vm839_vm11 = vmor %vm837_vm9, %vm838_vm8 }
 0x1a3   :  { %v836_v10 = vadd.f32 %v4879_v15, %v835_v12  ;;  %v982_v3 = vmul.f32 3.8918573e-05, %v6021_v53  ;;  %v6181_v11 = vmul.f32 0.70710677, %v6168_v54  ;;  %v6183_v63 = vadd.f32 %v527_v31, %v479_v45 }
 0x1a4   :  { %v1596_v19 = vadd.f32 %v4881_v24, %v1595_v23  ;;  %v1823_v6 = vadd.f32 0.001143296, %v1822_v42  ;;  %v844_v9 = vor.u32 1.1754944e-38, %v843_v33  ;;  %vm1597_vm12 = vweird.f32 %v6109_v30 }
 0x1a5   :  { %v4883_v2 = vpop.eup %4882  ;;  %v840_v26 = vsel %vm839_vm11, %v4879_v15, %v836_v10  ;;  %v1746_v28 = vmul.f32 %v1745_v27, %v5665_v43  ;;  %vm842_vm13 = vcmp.eq.f32.partialorder %v841_v41, 8.507059e+37  ;;  %vm1599_vm14 = vmor %vm1597_vm12, %vm1598_vm10  ;;  %v1604_v21 = vor.u32 1.1754944e-38, %v1603_v1 }
 0x1a6   :  { %v913_v7 = vmul.f32 %v4883_v2, %v6155_v37  ;;  %v983_v58 = vadd.f32 0.001143296, %v982_v3  ;;  %v4885_v34 = vpop.eup %4884  ;;  %v845_v52 = vsel %vm842_vm13, %v844_v9, %v840_v26  ;;  %v921_v57 = vand.u32 2147483647, %v6155_v37 }
 0x1a7   :  { %v1600_v0 = vsel %vm1599_vm14, %v4881_v24, %v1596_v19  ;;  %vm1602_vm15 = vcmp.eq.f32.partialorder %v1601_v50, 8.507059e+37  ;;  %v1673_v33 = vmul.f32 %v4885_v34, %v6164_v29  ;;  %v1824_v30 = vmul.f32 %v1823_v6, %v5768_v60 }
 0x1a8   :  { %v914_v45 = vsub.f32 1.0, %v913_v7  ;;  %v1605_v15 = vsel %vm1602_vm15, %v1604_v21, %v1600_v0  ;;  %vm917_vm0 = vweird.f32 %v6155_v37  ;;  %vm918_vm1 = vweird.f32 %v4883_v2 }
 0x1a9   :  { %v923_v39 = vand.u32 2147483648, %v6155_v37  ;;  %v1747_v42 = vadd.f32 0.112945676, %v1746_v28  ;;  %v846_v12 = vmul.f32 %v845_v52, %v6143_v51  ;;  %v1674_v41 = vsub.f32 1.0, %v1673_v33  ;;  %vm919_vm4 = vmor %vm917_vm0, %vm918_vm1 }
 0x1aa   :  { %v915_v27 = vmul.f32 %v4883_v2, %v914_v45  ;;  %v984_v23 = vmul.f32 %v983_v58, %v6021_v53  ;;  %vm6196_vm2 = vcmp.eq.f32.partialorder %v921_v57, 8.507059e+37  ;;  %v1606_v1 = vmul.f32 %v1605_v15, %v6018_v22 }
 0x1ab   :  { %v1681_v31 = vand.u32 2147483647, %v6164_v29  ;;  %v1683_v10 = vand.u32 2147483648, %v6164_v29  ;;  %v1675_v3 = vmul.f32 %v4885_v34, %v1674_v41  ;;  %vm1678_vm3 = vweird.f32 %v4885_v34 }
 0x1ac   :  { %v916_v50 = vadd.f32 %v4883_v2, %v915_v27  ;;  %v985_v19 = vadd.f32 0.014752088, %v984_v23  ;;  %v924_v51 = vor.u32 1.1754944e-38, %v923_v39  ;;  %vm1677_vm5 = vweird.f32 %v6164_v29  ;;  %v481_v39 = vpop.f32.mrf.mxu2 }
 0x1ad   :  { %v1062_v6 = vmul.f32 3.8918573e-05, %v6030_v36  ;;  %v1748_v26 = vmul.f32 %v1747_v42, %v5665_v43  ;;  %v4443_v22 = vclamps-f32 %v846_v12, 1.0  ;;  %v1676_v28 = vadd.f32 %v4885_v34, %v1675_v3  ;;  %vm1679_vm6 = vmor %vm1677_vm5, %vm1678_vm3 }
 0x1ae   :  { %v920_v9 = vsel %vm919_vm4, %v4883_v2, %v916_v50  ;;  %v986_v7 = vmul.f32 %v985_v19, %v6021_v53  ;;  %v4462_v58 = vclamps-f32 %v1606_v1, 1.0  ;;  %v1684_v52 = vor.u32 1.1754944e-38, %v1683_v10 }
 0x1af   :  { %v925_v21 = vsel %vm6196_vm2, %v924_v51, %v920_v9  ;;  %v1063_v37 = vadd.f32 0.001143296, %v1062_v6  ;;  %v1680_v0 = vsel %vm1679_vm6, %v4885_v34, %v1676_v28  ;;  %vm1682_vm7 = vcmp.eq.f32.partialorder %v1681_v31, 8.507059e+37  ;;  %v8632_v28 = vld [vmem:[#allocation27_spill] sm:$0xff] }
 0x1b0   :  { %v926_v57 = vmul.f32 %v925_v21, %v6149_v47  ;;  %v987_v29 = vadd.f32 0.112945676, %v986_v7  ;;  %v1289_v45 = vmul.f32 %v6181_v11, %v6181_v11  ;;  %v1685_v15 = vsel %vm1682_vm7, %v1684_v52, %v1680_v0 }
 0x1b1   :  { %v1064_v2 = vmul.f32 %v1063_v37, %v6030_v36  ;;  %v1749_v33 = vadd.f32 0.4994258, %v1748_v26  ;;  %v1894_v12 = vadd.f32 1.0, %v4443_v22  ;;  %v1686_v27 = vmul.f32 %v1685_v15, %v6123_v4 }
 0x1b2   :  { %v4445_v42 = vclamps-f32 %v926_v57, 1.0  ;;  %v988_v41 = vmul.f32 %v987_v29, %v6021_v53  ;;  %v6219_v23 = vmul.f32 0.70710677, %v6183_v63  ;;  %v1913_v47 = vadd.f32 1.0, %v4462_v58  ;;  %v530_v57 = vpop.f32.mrf.mxu3 }
 0x1b3   :  { %v1065_v34 = vadd.f32 0.014752088, %v1064_v2  ;;  %v1750_v24 = vmul.f32 %v1749_v33, %v5665_v43  ;;  %v4464_v31 = vclamps-f32 %v1686_v27, 1.0  ;;  %v1825_v50 = vadd.f32 0.014752088, %v1824_v30  ;;  %v8633_v27 = vld [vmem:[#allocation17_spill] sm:$0xff] }
 0x1b4   :  { %v1896_v1 = vadd.f32 1.0, %v4445_v42  ;;  %v989_v10 = vadd.f32 0.4994258, %v988_v41  ;;  %v6222_v3 = vmin.f32 %v1289_v45, 16.0  ;;  %v482_v19 = vadd.f32 %v481_v39, %v5508_v62 }
 0x1b5   :  { %v1066_v51 = vmul.f32 %v1065_v34, %v6030_v36  ;;  %v6226_v4 = vadd.f32 1.0, %v1750_v24  ;;  %v1926_v6 = vmul.f32 %v1894_v12, %v6137_v44  ;;  %v1915_v22 = vadd.f32 1.0, %v4464_v31  ;;  %v8634_v34 = vld [vmem:[#allocation28_spill] sm:$0xff] }
 0x1b6   :  { %v1928_v26 = vmul.f32 %v1896_v1, %v6146_v16  ;;  %v990_v9 = vmul.f32 %v989_v10, %v6021_v53  ;;  %v1369_v43 = vmul.f32 %v6219_v23, %v6219_v23  ;;  %v1945_v30 = vmul.f32 %v1913_v47, %v8632_v28 }
 0x1b7   :  { %v1067_v7 = vadd.f32 0.112945676, %v1066_v51  ;;  %4886 = vrcp.f32 %v6226_v4  ;;  %v1947_v58 = vmul.f32 %v1915_v22, %v5990_v25  ;;  %v1826_v44 = vmul.f32 %v1825_v50, %v5768_v60 }
 0x1b8   :  { %v1956_v21 = vpack.c.bf16 %v1928_v26, %v1926_v6  ;;  %v6236_v52 = vadd.f32 1.0, %v990_v9  ;;  %v1134_v16 = vadd.f32 0.0036580483, %v6161_v32  ;;  %v1213_v37 = vmul.f32 %v6166_v20, %v6113_v61 }
 0x1b9   :  { %v1068_v0 = vmul.f32 %v1067_v7, %v6030_v36  ;;  %v1291_v29 = vmul.f32 2.1237322e-06, %v6222_v3  ;;  %v6244_v45 = vadd.f32 %v530_v57, %v482_v19  ;;  %v1965_v15 = vpack.c.bf16 %v1947_v58, %v1945_v30 }
 0x1ba   :  { %2229 = vmatmul.bf16.gmra.mxu1 %v1956_v21  ;;  %2327 = vmatmul.bf16.gmra.mxu3 %v1956_v21  ;;  %4888 = vrcp.f32 %v6236_v52  ;;  %v1740_v25 = vadd.f32 1.1283791, %v6127_v5  ;;  %v979_v32 = vmul.f32 %v6152_v46, %v6021_v53  ;;  %v6250_v2 = vmin.f32 %v1369_v43, 16.0 }
 0x1bb   :  { %v1820_v20 = vadd.f32 1.1283791, %v6133_v38  ;;  %v1059_v33 = vmul.f32 %v6158_v35, %v6030_v36  ;;  %2205 = vmatmul.bf16.gmra.mxu0 %v1965_v15  ;;  %2303 = vmatmul.bf16.gmra.mxu2 %v1965_v15  ;;  %v1069_v39 = vadd.f32 0.4994258, %v1068_v0  ;;  %v1827_v42 = vadd.f32 0.112945676, %v1826_v44 }
 0x1bc   :  { %v6258_v41 = vmul.f32 0.5, %v8633_v27  ;;  %v1135_v5 = vmul.f32 %v1134_v16, %v6099_v17  ;;  %v1214_v47 = vadd.f32 0.0036580483, %v1213_v37  ;;  %v1292_v53 = vadd.f32 0.00028619796, %v1291_v29  ;;  %v483_v16 = vpop.f32.mrf.mxu2 }
 0x1bd   :  { %v6255_v12 = vpop.eup %4886  ;;  %v6262_v46 = vmul.f32 0.70710677, %v6244_v45  ;;  %v1070_v38 = vmul.f32 %v1069_v39, %v6030_v36  ;;  %v6268_v24 = vmul.f32 %v1740_v25, %v8634_v34  ;;  %v980_v1 = vadd.f32 1.1283791, %v979_v32 }
 0x1be   :  { %v1753_v35 = vmul.f32 %v6255_v12, %v6226_v4  ;;  %v1371_v31 = vmul.f32 2.1237322e-06, %v6250_v2  ;;  %v1828_v10 = vmul.f32 %v1827_v42, %v5768_v60  ;;  %v6273_v19 = vmul.f32 %v1820_v20, %v5735_v55 }
 0x1bf   :  { %v1060_v51 = vadd.f32 1.1283791, %v1059_v33  ;;  %v6275_v6 = vadd.f32 1.0, %v1070_v38  ;;  %v6278_v36 = vmul.f32 0.5, %v5974_v49  ;;  %v1136_v22 = vadd.f32 0.05243302, %v1135_v5 }
 0x1c0   :  { %v4889_v50 = vpop.eup %4888  ;;  %v1754_v26 = vsub.f32 1.0, %v1753_v35  ;;  %v1829_v43 = vadd.f32 0.4994258, %v1828_v10  ;;  %v1215_v28 = vmul.f32 %v1214_v47, %v6113_v61  ;;  %v1293_v30 = vmul.f32 %v1292_v53, %v6222_v3  ;;  %v532_v35 = vpop.f32.mrf.mxu3 }
 0x1c1   :  { %v993_v9 = vmul.f32 %v4889_v50, %v6236_v52  ;;  %v1449_v7 = vmul.f32 %v6262_v46, %v6262_v46  ;;  %4890 = vrcp.f32 %v6275_v6  ;;  %v981_v55 = vmul.f32 %v980_v1, %v5986_v14 }
 0x1c2   :  { %v6288_v21 = vmul.f32 0.5, %v5982_v13  ;;  %v1372_v49 = vadd.f32 0.00028619796, %v1371_v31  ;;  %v6291_v44 = vmul.f32 %v1060_v51, %v6000_v8  ;;  %v1003_v37 = vand.u32 2147483648, %v6236_v52 }
 0x1c3   :  { %v994_v58 = vsub.f32 1.0, %v993_v9  ;;  %v1755_v57 = vmul.f32 %v6255_v12, %v1754_v26  ;;  %v1830_v0 = vmul.f32 %v1829_v43, %v5768_v60  ;;  %v6297_v29 = vmul.f32 %v1136_v22, %v6099_v17 }
 0x1c4   :  { %vm998_vm8 = vweird.f32 %v4889_v50  ;;  %v1001_v13 = vand.u32 2147483647, %v6236_v52  ;;  %v1216_v14 = vadd.f32 0.05243302, %v1215_v28  ;;  %v1294_v25 = vadd.f32 0.0036580483, %v1293_v30 }
 0x1c5   :  { %v995_v15 = vmul.f32 %v4889_v50, %v994_v58  ;;  %v6300_v32 = vmin.f32 %v1449_v7, 16.0  ;;  %v6302_v8 = vadd.f32 1.0, %v1830_v0  ;;  %v1373_v20 = vmul.f32 %v1372_v49, %v6250_v2 }
 0x1c6   :  { %v484_v33 = vadd.f32 %v483_v16, %v5508_v62  ;;  %vm997_vm9 = vweird.f32 %v6236_v52  ;;  %v1004_v42 = vor.u32 1.1754944e-38, %v1003_v37  ;;  %v1756_v27 = vadd.f32 %v6255_v12, %v1755_v57 }
 0x1c7   :  { %v996_v39 = vadd.f32 %v4889_v50, %v995_v15  ;;  %v4891_v60 = vpop.eup %4890  ;;  %vm999_vm10 = vmor %vm997_vm9, %vm998_vm8  ;;  %vm1758_vm11 = vweird.f32 %v6255_v12  ;;  %4892 = vrcp.f32 %v6302_v8  ;;  %vm1002_vm12 = vcmp.eq.f32.partialorder %v1001_v13, 8.507059e+37  ;;  %v486_v13 = vpop.f32.mrf.mxu2 }
 0x1c8   :  { %v1073_v47 = vmul.f32 %v4891_v60, %v6275_v6  ;;  %v1763_v53 = vand.u32 2147483648, %v6226_v4  ;;  %v1451_v38 = vmul.f32 2.1237322e-06, %v6300_v32  ;;  %vm1757_vm13 = vweird.f32 %v6226_v4 }
 0x1c9   :  { %v1000_v5 = vsel %vm999_vm10, %v4889_v50, %v996_v39  ;;  %v1761_v52 = vand.u32 2147483647, %v6226_v4  ;;  %v6316_v1 = vmul.f32 %v1216_v14, %v6113_v61  ;;  %v6318_v31 = vadd.f32 0.0036580483, %v1373_v20  ;;  %vm6324_vm14 = vmor %vm1757_vm13, %vm1758_vm11 }
 0x1ca   :  { %v1005_v34 = vsel %vm1002_vm12, %v1004_v42, %v1000_v5  ;;  %v6320_v10 = vadd.f32 %v532_v35, %v484_v33  ;;  %v1074_v50 = vsub.f32 1.0, %v1073_v47  ;;  %v1081_v26 = vand.u32 2147483647, %v6275_v6 }
 0x1cb   :  { %v1083_v22 = vand.u32 2147483648, %v6275_v6  ;;  %v1760_v4 = vsel %vm6324_vm14, %v6255_v12, %v1756_v27  ;;  %v1142_v9 = vmul.f32 3.8918573e-05, %v6099_v17  ;;  %v1006_v43 = vmul.f32 %v1005_v34, %v981_v55 }
 0x1cc   :  { %v1075_v28 = vmul.f32 %v4891_v60, %v1074_v50  ;;  %vm1078_vm15 = vweird.f32 %v4891_v60  ;;  %v1764_v30 = vor.u32 1.1754944e-38, %v1763_v53  ;;  %v1295_v49 = vmul.f32 %v1294_v25, %v6222_v3 }
 0x1cd   :  { %v4893_v7 = vpop.eup %4892  ;;  %v1452_v58 = vadd.f32 0.00028619796, %v1451_v38  ;;  %vm1762_vm0 = vcmp.eq.f32.partialorder %v1761_v52, 8.507059e+37  ;;  %v1143_v16 = vadd.f32 0.001143296, %v1142_v9  ;;  %vm1077_vm1 = vweird.f32 %v6275_v6 }
 0x1ce   :  { %v1076_v37 = vadd.f32 %v4891_v60, %v1075_v28  ;;  %v1765_v57 = vsel %vm1762_vm0, %v1764_v30, %v1760_v4  ;;  %v1833_v0 = vmul.f32 %v4893_v7, %v6302_v8  ;;  %v6338_v12 = vmul.f32 0.70710677, %v6320_v10  ;;  %vm1079_vm2 = vmor %vm1077_vm1, %vm1078_vm15 }
 0x1cf   :  { %vm1082_vm3 = vcmp.eq.f32.partialorder %v1081_v26, 8.507059e+37  ;;  %v1084_v55 = vor.u32 1.1754944e-38, %v1083_v22  ;;  %v1144_v15 = vmul.f32 %v1143_v16, %v6099_v17  ;;  %v4447_v14 = vclamps-f32 %v1006_v43, 1.0  ;;  %v535_v22 = vpop.f32.mrf.mxu3 }
 0x1d0   :  { %v1080_v25 = vsel %vm1079_vm2, %v4891_v60, %v1076_v37  ;;  %v1834_v20 = vsub.f32 1.0, %v1833_v0  ;;  %v1841_v33 = vand.u32 2147483647, %v6302_v8  ;;  %v1766_v6 = vmul.f32 %v1765_v57, %v6268_v24 }
 0x1d1   :  { %v1085_v39 = vsel %vm1082_vm3, %v1084_v55, %v1080_v25  ;;  %v1843_v42 = vand.u32 2147483648, %v6302_v8  ;;  %v1145_v27 = vadd.f32 0.014752088, %v1144_v15  ;;  %vm1838_vm4 = vweird.f32 %v4893_v7 }
 0x1d2   :  { %v1086_v5 = vmul.f32 %v1085_v39, %v6291_v44  ;;  %v1835_v47 = vmul.f32 %v4893_v7, %v1834_v20  ;;  %v1222_v53 = vmul.f32 3.8918573e-05, %v6113_v61  ;;  %v1529_v38 = vmul.f32 %v6338_v12, %v6338_v12 }
 0x1d3   :  { %v487_v60 = vadd.f32 %v486_v13, %v5508_v62  ;;  %vm1837_vm5 = vweird.f32 %v6302_v8  ;;  %v1146_v35 = vmul.f32 %v1145_v27, %v6099_v17  ;;  %v1898_v24 = vadd.f32 1.0, %v4447_v14 }
 0x1d4   :  { %v4449_v34 = vclamps-f32 %v1086_v5, 1.0  ;;  %v1836_v52 = vadd.f32 %v4893_v7, %v1835_v47  ;;  %v1223_v50 = vadd.f32 0.001143296, %v1222_v53  ;;  %v1453_v51 = vmul.f32 %v1452_v58, %v6300_v32  ;;  %vm1839_vm6 = vmor %vm1837_vm5, %vm1838_vm4  ;;  %v488_v47 = vpop.f32.mrf.mxu2 }
 0x1d5   :  { %vm1842_vm7 = vcmp.eq.f32.partialorder %v1841_v33, 8.507059e+37  ;;  %v1844_v44 = vor.u32 1.1754944e-38, %v1843_v42  ;;  %v1147_v26 = vadd.f32 0.112945676, %v1146_v35  ;;  %v4466_v9 = vclamps-f32 %v1766_v6, 1.0 }
 0x1d6   :  { %v1900_v4 = vadd.f32 1.0, %v4449_v34  ;;  %v1840_v43 = vsel %vm1839_vm6, %v4893_v7, %v1836_v52  ;;  %v1224_v28 = vmul.f32 %v1223_v50, %v6113_v61  ;;  %v6353_v30 = vmin.f32 %v1529_v38, 16.0 }
 0x1d7   :  { %v6355_v8 = vadd.f32 %v535_v22, %v487_v60  ;;  %v1845_v16 = vsel %vm1842_vm7, %v1844_v44, %v1840_v43  ;;  %v1148_v37 = vmul.f32 %v1147_v26, %v6099_v17  ;;  %v1930_v57 = vmul.f32 %v1898_v24, %v6278_v36 }
 0x1d8   :  { %v1932_v58 = vmul.f32 %v1900_v4, %v6288_v21  ;;  %v1846_v0 = vmul.f32 %v1845_v16, %v6273_v19  ;;  %v1225_v55 = vadd.f32 0.014752088, %v1224_v28  ;;  %v1138_v15 = vadd.f32 0.18741608, %v6297_v29 }
 0x1d9   :  { %v1296_v13 = vadd.f32 0.05243302, %v1295_v49  ;;  %v1375_v7 = vmul.f32 %v6318_v31, %v6250_v2  ;;  %v1149_v14 = vadd.f32 0.4994258, %v1148_v37  ;;  %v1917_v33 = vadd.f32 1.0, %v4466_v9 }
 0x1da   :  { %v1958_v25 = vpack.c.bf16 %v1932_v58, %v1930_v57  ;;  %v4468_v20 = vclamps-f32 %v1846_v0, 1.0  ;;  %v1226_v39 = vmul.f32 %v1225_v55, %v6113_v61  ;;  %v1454_v6 = vadd.f32 0.0036580483, %v1453_v51  ;;  %v537_v57 = vpop.f32.mrf.mxu3 }
 0x1db   :  { %v1531_v36 = vmul.f32 2.1237322e-06, %v6353_v30  ;;  %v6367_v21 = vmul.f32 0.70710677, %v6355_v8  ;;  %v1150_v19 = vmul.f32 %v1149_v14, %v6099_v17  ;;  %v575_v29 = vmul.f32 0.5, %v5713_v18 }
 0x1dc   :  { %v1218_v49 = vadd.f32 0.18741608, %v6316_v1  ;;  %2234 = vmatmul.bf16.gmra.mxu1 %v1958_v25  ;;  %2332 = vmatmul.bf16.gmra.mxu3 %v1958_v25  ;;  %v1919_v31 = vadd.f32 1.0, %v4468_v20  ;;  %v1227_v42 = vadd.f32 0.112945676, %v1226_v39  ;;  %v1297_v27 = vmul.f32 %v1296_v13, %v6222_v3 }
 0x1dd   :  { %v1376_v5 = vadd.f32 0.05243302, %v1375_v7  ;;  %v6373_v53 = vadd.f32 1.0, %v1150_v19  ;;  %v1302_v38 = vmul.f32 3.8918573e-05, %v6222_v3  ;;  %v1139_v60 = vmul.f32 %v1138_v15, %v6099_v17 }
 0x1de   :  { %v1949_v35 = vmul.f32 %v1917_v33, %v6258_v41  ;;  %v1951_v34 = vmul.f32 %v1919_v31, %v575_v29  ;;  %v1228_v18 = vmul.f32 %v1227_v42, %v6113_v61  ;;  %v1455_v1 = vmul.f32 %v1454_v6, %v6300_v32 }
 0x1df   :  { %v1532_v24 = vadd.f32 0.00028619796, %v1531_v36  ;;  %v1609_v52 = vmul.f32 %v6367_v21, %v6367_v21  ;;  %4894 = vrcp.f32 %v6373_v53  ;;  %v489_v50 = vadd.f32 %v488_v47, %v5508_v62 }
 0x1e0   :  { %v1967_v51 = vpack.c.bf16 %v1951_v34, %v1949_v35  ;;  %v1229_v44 = vadd.f32 0.4994258, %v1228_v18  ;;  %v1303_v26 = vadd.f32 0.001143296, %v1302_v38  ;;  %v1219_v17 = vmul.f32 %v1218_v49, %v6113_v61  ;;  %v491_v18 = vpop.f32.mrf.mxu2 }
 0x1e1   :  { %v1298_v22 = vadd.f32 0.18741608, %v1297_v27  ;;  %v1377_v41 = vmul.f32 %v1376_v5, %v6250_v2  ;;  %v1140_v43 = vadd.f32 1.1283791, %v1139_v60  ;;  %v1456_v28 = vadd.f32 0.05243302, %v1455_v1 }
 0x1e2   :  { %2210 = vmatmul.bf16.gmra.mxu0 %v1967_v51  ;;  %2308 = vmatmul.bf16.gmra.mxu2 %v1967_v51  ;;  %v1230_v4 = vmul.f32 %v1229_v44, %v6113_v61  ;;  %v1304_v9 = vmul.f32 %v1303_v26, %v6222_v3  ;;  %v1533_v16 = vmul.f32 %v1532_v24, %v6353_v30  ;;  %v6389_v37 = vmin.f32 %v1609_v52, 16.0 }
 0x1e3   :  { %v6392_v58 = vmul.f32 0.5, %v6065_v56  ;;  %v6394_v0 = vadd.f32 %v537_v57, %v489_v50  ;;  %v1220_v7 = vadd.f32 1.1283791, %v1219_v17  ;;  %v1299_v61 = vmul.f32 %v1298_v22, %v6222_v3 }
 0x1e4   :  { %v6396_v55 = vadd.f32 1.0, %v1230_v4  ;;  %v1305_v15 = vadd.f32 0.014752088, %v1304_v9  ;;  %v1378_v14 = vadd.f32 0.18741608, %v1377_v41  ;;  %v6401_v20 = vmul.f32 0.5, %v6077_v48 }
 0x1e5   :  { %v4895_v13 = vpop.eup %4894  ;;  %v1382_v25 = vmul.f32 3.8918573e-05, %v6250_v2  ;;  %v6404_v33 = vmul.f32 0.5, %v6168_v54  ;;  %v1141_v39 = vmul.f32 %v1140_v43, %v6075_v40  ;;  %v1457_v6 = vmul.f32 %v1456_v28, %v6300_v32 }
 0x1e6   :  { %v1153_v56 = vmul.f32 %v4895_v13, %v6373_v53  ;;  %4896 = vrcp.f32 %v6396_v55  ;;  %v1534_v36 = vadd.f32 0.0036580483, %v1533_v16  ;;  %v1611_v19 = vmul.f32 2.1237322e-06, %v6389_v37 }
 0x1e7   :  { %v6412_v29 = vmul.f32 0.70710677, %v6394_v0  ;;  %v1306_v48 = vmul.f32 %v1305_v15, %v6222_v3  ;;  %v1383_v31 = vadd.f32 0.001143296, %v1382_v25  ;;  %v6416_v54 = vmul.f32 %v1220_v7, %v6088_v59 }
 0x1e8   :  { %v1154_v49 = vsub.f32 1.0, %v1153_v56  ;;  %v6418_v42 = vadd.f32 1.1283791, %v1299_v61  ;;  %v1379_v27 = vmul.f32 %v1378_v14, %v6250_v2  ;;  %v1163_v40 = vand.u32 2147483648, %v6373_v53 }
 0x1e9   :  { %vm1158_vm8 = vweird.f32 %v4895_v13  ;;  %v1161_v47 = vand.u32 2147483647, %v6373_v53  ;;  %v1307_v38 = vadd.f32 0.112945676, %v1306_v48  ;;  %v1458_v60 = vadd.f32 0.18741608, %v1457_v6 }
 0x1ea   :  { %v1155_v5 = vmul.f32 %v4895_v13, %v1154_v49  ;;  %v1535_v35 = vmul.f32 %v1534_v36, %v6353_v30  ;;  %v1612_v34 = vadd.f32 0.00028619796, %v1611_v19  ;;  %v1384_v1 = vmul.f32 %v1383_v31, %v6250_v2  ;;  %v540_v19 = vpop.f32.mrf.mxu3 }
 0x1eb   :  { %v1689_v24 = vmul.f32 %v6412_v29, %v6412_v29  ;;  %vm1157_vm9 = vweird.f32 %v6373_v53  ;;  %v1308_v50 = vmul.f32 %v1307_v38, %v6222_v3  ;;  %v1164_v51 = vor.u32 1.1754944e-38, %v1163_v40 }
 0x1ec   :  { %v4897_v59 = vpop.eup %4896  ;;  %v1156_v52 = vadd.f32 %v4895_v13, %v1155_v5  ;;  %vm1159_vm10 = vmor %vm1157_vm9, %vm1158_vm8  ;;  %v1385_v26 = vadd.f32 0.014752088, %v1384_v1  ;;  %v1462_v17 = vmul.f32 3.8918573e-05, %v6300_v32  ;;  %v492_v22 = vadd.f32 %v491_v18, %v5508_v62  ;;  %v4773_v1 = vld [vmem:[#allocation10 + $0x78] sm:$0xff] }
 0x1ed   :  { %v1233_v44 = vmul.f32 %v4897_v59, %v6396_v55  ;;  %vm1162_vm11 = vcmp.eq.f32.partialorder %v1161_v47, 8.507059e+37  ;;  %v1309_v4 = vadd.f32 0.4994258, %v1308_v50  ;;  %v1241_v57 = vand.u32 2147483647, %v6396_v55  ;;  %3968 = vmatpush.bf16.msra.mxu1 %v4773_v1 }
 0x1ee   :  { %v1160_v41 = vsel %vm1159_vm10, %v4895_v13, %v1156_v52  ;;  %v1386_v28 = vmul.f32 %v1385_v26, %v6250_v2  ;;  %v1463_v16 = vadd.f32 0.001143296, %v1462_v17  ;;  %v1243_v15 = vand.u32 2147483648, %v6396_v55 }
 0x1ef   :  { %v1165_v9 = vsel %vm1162_vm11, %v1164_v51, %v1160_v41  ;;  %v1234_v43 = vsub.f32 1.0, %v1233_v44  ;;  %v1310_v7 = vmul.f32 %v1309_v4, %v6222_v3  ;;  %vm1238_vm12 = vweird.f32 %v4897_v59  ;;  %v493_v44 = vpop.f32.mrf.mxu2 }
 0x1f0   :  { %v1166_v53 = vmul.f32 %v1165_v9, %v1141_v39  ;;  %v1387_v14 = vadd.f32 0.112945676, %v1386_v28  ;;  %v1464_v25 = vmul.f32 %v1463_v16, %v6300_v32  ;;  %v1536_v13 = vadd.f32 0.05243302, %v1535_v35 }
 0x1f1   :  { %v1235_v61 = vmul.f32 %v4897_v59, %v1234_v43  ;;  %v1613_v56 = vmul.f32 %v1612_v34, %v6389_v37  ;;  %v6438_v6 = vmin.f32 %v1689_v24, 16.0  ;;  %v6440_v36 = vadd.f32 1.0, %v1310_v7 }
 0x1f2   :  { %vm1237_vm13 = vweird.f32 %v6396_v55  ;;  %v1388_v49 = vmul.f32 %v1387_v14, %v6250_v2  ;;  %v1465_v48 = vadd.f32 0.014752088, %v1464_v25  ;;  %v6444_v3 = vadd.f32 %v540_v19, %v492_v22  ;;  %v4765_v55 = vld [vmem:[#allocation10 + $0x38] sm:$0xff] }
 0x1f3   :  { %v1236_v39 = vadd.f32 %v4897_v59, %v1235_v61  ;;  %v4451_v31 = vclamps-f32 %v1166_v53, 1.0  ;;  %vm1239_vm14 = vmor %vm1237_vm13, %vm1238_vm12  ;;  %v1244_v40 = vor.u32 1.1754944e-38, %v1243_v15  ;;  %4898 = vrcp.f32 %v6440_v36  ;;  %3919 = vmatpush.bf16.msra.mxu0 %v4765_v55 }
 0x1f4   :  { %v1380_v5 = vadd.f32 1.1283791, %v1379_v27  ;;  %vm1242_vm15 = vcmp.eq.f32.partialorder %v1241_v57, 8.507059e+37  ;;  %v1389_v38 = vadd.f32 0.4994258, %v1388_v49  ;;  %v1459_v35 = vmul.f32 %v1458_v60, %v6300_v32 }
 0x1f5   :  { %v1240_v47 = vsel %vm1239_vm14, %v4897_v59, %v1236_v39  ;;  %v1537_v34 = vmul.f32 %v1536_v13, %v6353_v30  ;;  %v1466_v24 = vmul.f32 %v1465_v48, %v6300_v32  ;;  %v1614_v52 = vadd.f32 0.0036580483, %v1613_v56 }
 0x1f6   :  { %v1245_v18 = vsel %vm1242_vm15, %v1244_v40, %v1240_v47  ;;  %v1691_v50 = vmul.f32 2.1237322e-06, %v6438_v6  ;;  %v1390_v27 = vmul.f32 %v1389_v38, %v6250_v2  ;;  %v6454_v59 = vmul.f32 0.5, %v6183_v63 }
 0x1f7   :  { %v1246_v51 = vmul.f32 %v1245_v18, %v6416_v54  ;;  %v6457_v60 = vmul.f32 0.70710677, %v6444_v3  ;;  %v1902_v26 = vadd.f32 1.0, %v4451_v31  ;;  %v1467_v17 = vadd.f32 0.112945676, %v1466_v24 }
 0x1f8   :  { %v1301_v22 = vmul.f32 %v6418_v42, %v6181_v11  ;;  %v6461_v4 = vadd.f32 1.0, %v1390_v27  ;;  %v1542_v54 = vmul.f32 3.8918573e-05, %v6353_v30  ;;  %v6465_v2 = vmul.f32 %v1380_v5, %v6219_v23 }
 0x1f9   :  { %v4453_v41 = vclamps-f32 %v1246_v51, 1.0  ;;  %v4899_v9 = vpop.eup %4898  ;;  %v1538_v63 = vadd.f32 0.18741608, %v1537_v34  ;;  %v494_v43 = vadd.f32 %v493_v44, %v5508_v62  ;;  %v1468_v28 = vmul.f32 %v1467_v17, %v6300_v32  ;;  %v542_v62 = vpop.f32.mrf.mxu3 }
 0x1fa   :  { %v6469_v16 = vadd.f32 1.1283791, %v1459_v35  ;;  %v1313_v57 = vmul.f32 %v4899_v9, %v6440_v36  ;;  %4900 = vrcp.f32 %v6461_v4  ;;  %v1615_v11 = vmul.f32 %v1614_v52, %v6389_v37 }
 0x1fb   :  { %v1904_v53 = vadd.f32 1.0, %v4453_v41  ;;  %v1692_v42 = vadd.f32 0.00028619796, %v1691_v50  ;;  %v1769_v15 = vmul.f32 %v6457_v60, %v6457_v60  ;;  %v1934_v23 = vmul.f32 %v1902_v26, %v6392_v58 }
 0x1fc   :  { %v1314_v61 = vsub.f32 1.0, %v1313_v57  ;;  %v1469_v14 = vadd.f32 0.4994258, %v1468_v28  ;;  %v1543_v25 = vadd.f32 0.001143296, %v1542_v54  ;;  %v1539_v13 = vmul.f32 %v1538_v63, %v6353_v30 }
 0x1fd   :  { %v1936_v7 = vmul.f32 %v1904_v53, %v6401_v20  ;;  %v6479_v56 = vadd.f32 %v542_v62, %v494_v43  ;;  %v1323_v19 = vand.u32 2147483648, %v6440_v36  ;;  %v1622_v39 = vmul.f32 3.8918573e-05, %v6389_v37 }
 0x1fe   :  { %v1315_v48 = vmul.f32 %v4899_v9, %v1314_v61  ;;  %vm1318_vm0 = vweird.f32 %v4899_v9  ;;  %v1321_v31 = vand.u32 2147483647, %v6440_v36  ;;  %v1693_v58 = vmul.f32 %v1692_v42, %v6438_v6 }
 0x1ff   :  { %v1960_v49 = vpack.c.bf16 %v1936_v7, %v1934_v23  ;;  %v1470_v20 = vmul.f32 %v1469_v14, %v6300_v32  ;;  %v1544_v40 = vmul.f32 %v1543_v25, %v6353_v30  ;;  %v1623_v5 = vadd.f32 0.001143296, %v1622_v39 }
 0x200   :  { %v4901_v47 = vpop.eup %4900  ;;  %v1616_v38 = vadd.f32 0.05243302, %v1615_v11  ;;  %v6487_v35 = vmin.f32 %v1769_v15, 16.0  ;;  %v1316_v34 = vadd.f32 %v4899_v9, %v1315_v48  ;;  %vm1317_vm1 = vweird.f32 %v6440_v36 }
 0x201   :  { %2239 = vmatmul.bf16.gmra.mxu1 %v1960_v49  ;;  %2337 = vmatmul.bf16.gmra.mxu3 %v1960_v49  ;;  %v6491_v18 = vmul.f32 0.70710677, %v6479_v56  ;;  %vm1319_vm2 = vmor %vm1317_vm1, %vm1318_vm0  ;;  %v1324_v55 = vor.u32 1.1754944e-38, %v1323_v19  ;;  %v1393_v1 = vmul.f32 %v4901_v47, %v6461_v4  ;;  %v6494_v32 = vadd.f32 1.0, %v1470_v20 }
 0x202   :  { %v1320_v24 = vsel %vm1319_vm2, %v4899_v9, %v1316_v34  ;;  %vm1322_vm3 = vcmp.eq.f32.partialorder %v1321_v31, 8.507059e+37  ;;  %v1545_v52 = vadd.f32 0.014752088, %v1544_v40  ;;  %v1624_v50 = vmul.f32 %v1623_v5, %v6389_v37  ;;  %v4772_v34 = vld [vmem:[#allocation10 + $0x70] sm:$0xff] }
 0x203   :  { %v1694_v51 = vadd.f32 0.0036580483, %v1693_v58  ;;  %v1325_v44 = vsel %vm1322_vm3, %v1324_v55, %v1320_v24  ;;  %v1394_v27 = vsub.f32 1.0, %v1393_v1  ;;  %4902 = vrcp.f32 %v6494_v32  ;;  %3969 = vmatpush.bf16.msra.mxu1 %v4772_v34 }
 0x204   :  { %v1326_v36 = vmul.f32 %v1325_v44, %v1301_v22  ;;  %v1401_v26 = vand.u32 2147483647, %v6461_v4  ;;  %v1403_v17 = vand.u32 2147483648, %v6461_v4  ;;  %v1546_v41 = vmul.f32 %v1545_v52, %v6353_v30 }
 0x205   :  { %v1395_v54 = vmul.f32 %v4901_v47, %v1394_v27  ;;  %vm1398_vm4 = vweird.f32 %v4901_v47  ;;  %v1625_v63 = vadd.f32 0.014752088, %v1624_v50  ;;  %v1702_v9 = vmul.f32 3.8918573e-05, %v6438_v6 }
 0x206   :  { %v6502_v43 = vadd.f32 1.1283791, %v1539_v13  ;;  %v1771_v28 = vmul.f32 2.1237322e-06, %v6487_v35  ;;  %v1849_v53 = vmul.f32 %v6491_v18, %v6491_v18  ;;  %v1547_v57 = vadd.f32 0.112945676, %v1546_v41 }
 0x207   :  { %v1396_v22 = vadd.f32 %v4901_v47, %v1395_v54  ;;  %vm1397_vm5 = vweird.f32 %v6461_v4  ;;  %v1626_v11 = vmul.f32 %v1625_v63, %v6389_v37  ;;  %v1703_v42 = vadd.f32 0.001143296, %v1702_v9 }
 0x208   :  { %v1695_v15 = vmul.f32 %v1694_v51, %v6438_v6  ;;  %v4455_v23 = vclamps-f32 %v1326_v36, 1.0  ;;  %vm1399_vm6 = vmor %vm1397_vm5, %vm1398_vm4  ;;  %v1404_v7 = vor.u32 1.1754944e-38, %v1403_v17  ;;  %v1548_v62 = vmul.f32 %v1547_v57, %v6353_v30 }
 0x209   :  { %v6511_v61 = vpop.eup %4902  ;;  %v1400_v14 = vsel %vm1399_vm6, %v4901_v47, %v1396_v22  ;;  %vm1402_vm7 = vcmp.eq.f32.partialorder %v1401_v26, 8.507059e+37  ;;  %v1627_v25 = vadd.f32 0.112945676, %v1626_v11  ;;  %v1704_v13 = vmul.f32 %v1703_v42, %v6438_v6  ;;  %v4764_v47 = vld [vmem:[#allocation10 + $0x30] sm:$0xff] }
 0x20a   :  { %v1772_v19 = vadd.f32 0.00028619796, %v1771_v28  ;;  %v6514_v39 = vmin.f32 %v1849_v53, 16.0  ;;  %v1405_v4 = vsel %vm1402_vm7, %v1404_v7, %v1400_v14  ;;  %v1473_v49 = vmul.f32 %v6511_v61, %v6494_v32  ;;  %3920 = vmatpush.bf16.msra.mxu0 %v4764_v47 }
 0x20b   :  { %v1406_v48 = vmul.f32 %v1405_v4, %v6465_v2  ;;  %v1549_v31 = vadd.f32 0.4994258, %v1548_v62  ;;  %v1628_v58 = vmul.f32 %v1627_v25, %v6389_v37  ;;  %v1705_v20 = vadd.f32 0.014752088, %v1704_v13 }
 0x20c   :  { %v1906_v40 = vadd.f32 1.0, %v4455_v23  ;;  %v1474_v5 = vsub.f32 1.0, %v1473_v49  ;;  %v1782_v55 = vmul.f32 3.8918573e-05, %v6487_v35  ;;  %v1617_v1 = vmul.f32 %v1616_v38, %v6389_v37 }
 0x20d   :  { %v1696_v24 = vadd.f32 0.05243302, %v1695_v15  ;;  %v4457_v52 = vclamps-f32 %v1406_v48, 1.0  ;;  %v1550_v50 = vmul.f32 %v1549_v31, %v6353_v30  ;;  %v1629_v2 = vadd.f32 0.4994258, %v1628_v58 }
 0x20e   :  { %v1475_v51 = vmul.f32 %v6511_v61, %v1474_v5  ;;  %v1706_v44 = vmul.f32 %v1705_v20, %v6438_v6  ;;  %v1783_v27 = vadd.f32 0.001143296, %v1782_v55  ;;  %v1773_v36 = vmul.f32 %v1772_v19, %v6487_v35  ;;  %v6561_v20 = vpop.f32.mrf.mxu0 }
 0x20f   :  { %v1851_v26 = vmul.f32 2.1237322e-06, %v6514_v39  ;;  %v1908_v17 = vadd.f32 1.0, %v4457_v52  ;;  %v6527_v41 = vadd.f32 1.0, %v1550_v50  ;;  %v1938_v38 = vmul.f32 %v1906_v40, %v6404_v33 }
 0x210   :  { %v1630_v54 = vmul.f32 %v1629_v2, %v6389_v37  ;;  %v1707_v30 = vadd.f32 0.112945676, %v1706_v44  ;;  %v1784_v63 = vmul.f32 %v1783_v27, %v6487_v35  ;;  %v1476_v28 = vadd.f32 %v6511_v61, %v1475_v51  ;;  %v4763_v27 = vld [vmem:[#allocation10 + $0x28] sm:$0xff] }
 0x211   :  { %v1940_v9 = vmul.f32 %v1908_v17, %v6454_v59  ;;  %vm1478_vm8 = vweird.f32 %v6511_v61  ;;  %4904 = vrcp.f32 %v6527_v41  ;;  %v1618_v53 = vadd.f32 0.18741608, %v1617_v1  ;;  %3921 = vmatpush.bf16.msra.mxu0 %v4763_v27 }
 0x212   :  { %v1483_v57 = vand.u32 2147483648, %v6494_v32  ;;  %v6537_v22 = vadd.f32 1.0, %v1630_v54  ;;  %v1708_v33 = vmul.f32 %v1707_v30, %v6438_v6  ;;  %vm1477_vm9 = vweird.f32 %v6494_v32 }
 0x213   :  { %v1962_v11 = vpack.c.bf16 %v1940_v9, %v1938_v38  ;;  %v1481_v42 = vand.u32 2147483647, %v6494_v32  ;;  %v1785_v15 = vadd.f32 0.014752088, %v1784_v63  ;;  %v1697_v59 = vmul.f32 %v1696_v24, %v6438_v6  ;;  %vm6543_vm10 = vmor %vm1477_vm9, %vm1478_vm8 }
 0x214   :  { %4906 = vrcp.f32 %v6537_v22  ;;  %v6549_v7 = vmul.f32 0.5, %v6244_v45  ;;  %v1774_v62 = vadd.f32 0.0036580483, %v1773_v36  ;;  %v1852_v14 = vadd.f32 0.00028619796, %v1851_v26  ;;  %v4771_v36 = vld [vmem:[#allocation10 + $0x68] sm:$0xff] }
 0x215   :  { %2244 = vmatmul.bf16.gmra.mxu1 %v1962_v11  ;;  %2342 = vmatmul.bf16.gmra.mxu3 %v1962_v11  ;;  %v1480_v32 = vsel %vm6543_vm10, %v6511_v61, %v1476_v28  ;;  %v1484_v25 = vor.u32 1.1754944e-38, %v1483_v57  ;;  %v1709_v13 = vadd.f32 0.4994258, %v1708_v33  ;;  %v1786_v19 = vmul.f32 %v1785_v15, %v6487_v35 }
 0x216   :  { %v1862_v4 = vmul.f32 3.8918573e-05, %v6514_v39  ;;  %v1461_v48 = vmul.f32 %v6469_v16, %v6262_v46  ;;  %v1541_v45 = vmul.f32 %v6502_v43, %v6338_v12  ;;  %v1619_v31 = vmul.f32 %v1618_v53, %v6389_v37  ;;  %3970 = vmatpush.bf16.msra.mxu1 %v4771_v36 }
 0x217   :  { %v4905_v49 = vpop.eup %4904  ;;  %vm1482_vm11 = vcmp.eq.f32.partialorder %v1481_v42, 8.507059e+37  ;;  %v1698_v58 = vadd.f32 0.18741608, %v1697_v59  ;;  %v1710_v5 = vmul.f32 %v1709_v13, %v6438_v6  ;;  %v1775_v47 = vmul.f32 %v1774_v62, %v6487_v35  ;;  %v6585_v42 = vpop.f32.mrf.mxu2 }
 0x218   :  { %v1485_v61 = vsel %vm1482_vm11, %v1484_v25, %v1480_v32  ;;  %v1553_v40 = vmul.f32 %v4905_v49, %v6527_v41  ;;  %v1853_v34 = vmul.f32 %v1852_v14, %v6514_v39  ;;  %v1787_v55 = vadd.f32 0.112945676, %v1786_v19  ;;  %v6590_v62 = vpop.f32.mrf.mxu0 }
 0x219   :  { %v1863_v46 = vadd.f32 0.001143296, %v1862_v4  ;;  %v1561_v37 = vand.u32 2147483647, %v6527_v41  ;;  %v1563_v43 = vand.u32 2147483648, %v6527_v41  ;;  %v6571_v1 = vadd.f32 1.0, %v1710_v5 }
 0x21a   :  { %v6567_v16 = vpop.eup %4906  ;;  %v1554_v12 = vsub.f32 1.0, %v1553_v40  ;;  %v1486_v24 = vmul.f32 %v1485_v61, %v1461_v48  ;;  %v1788_v50 = vmul.f32 %v1787_v55, %v6487_v35  ;;  %v1620_v2 = vadd.f32 1.1283791, %v1619_v31  ;;  %v6613_v5 = vld [vmem:[%s8562_s4] sm:$0x3] }
 0x21b   :  { %v1633_v52 = vmul.f32 %v6567_v16, %v6537_v22  ;;  %v1864_v51 = vmul.f32 %v1863_v46, %v6514_v39  ;;  %vm1558_vm12 = vweird.f32 %v4905_v49  ;;  %4908 = vrcp.f32 %v6571_v1 }
 0x21c   :  { %v1555_v44 = vmul.f32 %v4905_v49, %v1554_v12  ;;  %v1699_v26 = vmul.f32 %v1698_v58, %v6438_v6  ;;  %v1776_v17 = vadd.f32 0.05243302, %v1775_v47  ;;  %v1854_v38 = vadd.f32 0.0036580483, %v1853_v34 }
 0x21d   :  { %v1634_v54 = vsub.f32 1.0, %v1633_v52  ;;  %vm1557_vm13 = vweird.f32 %v6527_v41  ;;  %v1789_v63 = vadd.f32 0.4994258, %v1788_v50  ;;  %v1865_v9 = vadd.f32 0.014752088, %v1864_v51 }
 0x21e   :  { %v1556_v30 = vadd.f32 %v4905_v49, %v1555_v44  ;;  %v4459_v28 = vclamps-f32 %v1486_v24, 1.0  ;;  %vm1559_vm14 = vmor %vm1557_vm13, %vm1558_vm12  ;;  %vm1562_vm15 = vcmp.eq.f32.partialorder %v1561_v37, 8.507059e+37  ;;  %v1564_v53 = vor.u32 1.1754944e-38, %v1563_v43 }
 0x21f   :  { %v1635_v57 = vmul.f32 %v6567_v16, %v1634_v54  ;;  %vm1638_vm0 = vweird.f32 %v6567_v16  ;;  %v1790_v6 = vmul.f32 %v1789_v63, %v6487_v35  ;;  %v1866_v11 = vmul.f32 %v1865_v9, %v6514_v39 }
 0x220   :  { %v1560_v33 = vsel %vm1559_vm14, %v4905_v49, %v1556_v30  ;;  %vm1637_vm1 = vweird.f32 %v6537_v22  ;;  %v1643_v59 = vand.u32 2147483648, %v6537_v22  ;;  %v1641_v32 = vand.u32 2147483647, %v6537_v22  ;;  %v6629_v9 = vpop.f32.mrf.mxu0 }
 0x221   :  { %v1565_v41 = vsel %vm1562_vm15, %v1564_v53, %v1560_v33  ;;  %v1636_v15 = vadd.f32 %v6567_v16, %v1635_v57  ;;  %v4909_v23 = vpop.eup %4908  ;;  %v6593_v25 = vadd.f32 1.0, %v1790_v6  ;;  %v1867_v13 = vadd.f32 0.112945676, %v1866_v11  ;;  %vm6600_vm2 = vmor %vm1637_vm1, %vm1638_vm0  ;;  %v4762_v53 = vld [vmem:[#allocation10 + $0x20] sm:$0xff]  ;;  %v2225_v11 = vpop.f32.mrf.mxu1 }
 0x222   :  { %v1566_v14 = vmul.f32 %v1565_v41, %v1541_v45  ;;  %v568_v19 = vmul.f32 0.5, %v6320_v10  ;;  %v1621_v4 = vmul.f32 %v1620_v2, %v6367_v21  ;;  %v1855_v49 = vmul.f32 %v1854_v38, %v6514_v39  ;;  %v6625_v38 = vpop.f32.mrf.mxu2  ;;  %v4770_v57 = vld [vmem:[#allocation10 + $0x60] sm:$0xff]  ;;  %3922 = vmatpush.bf16.msra.mxu0 %v4762_v53 }
 0x223   :  { %v1713_v31 = vmul.f32 %v4909_v23, %v6571_v1  ;;  %v1910_v58 = vadd.f32 1.0, %v4459_v28  ;;  %v1640_v22 = vsel %vm6600_vm2, %v6567_v16, %v1636_v15  ;;  %4910 = vrcp.f32 %v6593_v25  ;;  %3971 = vmatpush.bf16.msra.mxu1 %v4770_v57 }
 0x224   :  { %v4461_v45 = vclamps-f32 %v1566_v14, 1.0  ;;  %v1700_v10 = vadd.f32 1.1283791, %v1699_v26  ;;  %v1777_v21 = vmul.f32 %v1776_v17, %v6487_v35  ;;  %v1644_v61 = vor.u32 1.1754944e-38, %v1643_v59 }
 0x225   :  { %v1714_v40 = vsub.f32 1.0, %v1713_v31  ;;  %vm1642_vm3 = vcmp.eq.f32.partialorder %v1641_v32, 8.507059e+37  ;;  %v1723_v34 = vand.u32 2147483648, %v6571_v1  ;;  %v1868_v55 = vmul.f32 %v1867_v13, %v6514_v39 }
 0x226   :  { %v1912_v47 = vadd.f32 1.0, %v4461_v45  ;;  %v1645_v46 = vsel %vm1642_vm3, %v1644_v61, %v1640_v22  ;;  %vm1718_vm4 = vweird.f32 %v4909_v23  ;;  %v1721_v12 = vand.u32 2147483647, %v6571_v1 }
 0x227   :  { %v1715_v16 = vmul.f32 %v4909_v23, %v1714_v40  ;;  %v1856_v37 = vadd.f32 0.05243302, %v1855_v49  ;;  %v1942_v43 = vmul.f32 %v1910_v58, %v6549_v7  ;;  %v1869_v52 = vadd.f32 0.4994258, %v1868_v55 }
 0x228   :  { %v1944_v24 = vmul.f32 %v1912_v47, %v568_v19  ;;  %v6620_v50 = vperm.slane %v6613_v5, 0  ;;  %vm1717_vm5 = vweird.f32 %v6571_v1  ;;  %v1646_v27 = vmul.f32 %v1645_v46, %v1621_v4 }
 0x229   :  { %v1716_v51 = vadd.f32 %v4909_v23, %v1715_v16  ;;  %v4911_v2 = vpop.eup %4910  ;;  %vm1719_vm6 = vmor %vm1717_vm5, %vm1718_vm4  ;;  %v1724_v36 = vor.u32 1.1754944e-38, %v1723_v34  ;;  %v1870_v26 = vmul.f32 %v1869_v52, %v6514_v39  ;;  %v1701_v17 = vmul.f32 %v1700_v10, %v6412_v29  ;;  %v6655_v34 = vpop.f32.mrf.mxu0 }
 0x22a   :  { %v1964_v44 = vpack.c.bf16 %v1944_v24, %v1942_v43  ;;  %vm1722_vm7 = vcmp.eq.f32.partialorder %v1721_v12, 8.507059e+37  ;;  %v1793_v54 = vmul.f32 %v4911_v2, %v6593_v25  ;;  %v1778_v30 = vadd.f32 0.18741608, %v1777_v21  ;;  %v6653_v40 = vpop.f32.mrf.mxu2 }
 0x22b   :  { %v1720_v7 = vsel %vm1719_vm6, %v4909_v23, %v1716_v51  ;;  %v1857_v63 = vmul.f32 %v1856_v37, %v6514_v39  ;;  %v1871_v28 = vadd.f32 1.0, %v1870_v26  ;;  %v2177_v29 = vadd.f32 %v6561_v20, %v6620_v50 }
 0x22c   :  { %2249 = vmatmul.bf16.gmra.mxu1 %v1964_v44  ;;  %2347 = vmatmul.bf16.gmra.mxu3 %v1964_v44  ;;  %v1725_v1 = vsel %vm1722_vm7, %v1724_v36, %v1720_v7  ;;  %v1794_v6 = vsub.f32 1.0, %v1793_v54  ;;  %v4463_v41 = vclamps-f32 %v1646_v27, 1.0  ;;  %v1779_v14 = vmul.f32 %v1778_v30, %v6487_v35 }
 0x22d   :  { %v1726_v33 = vmul.f32 %v1725_v1, %v1701_v17  ;;  %4912 = vrcp.f32 %v1871_v28  ;;  %v6633_v23 = vadd.f32 %v2225_v11, %v2177_v29  ;;  %v1858_v32 = vadd.f32 0.18741608, %v1857_v63 }
 0x22e   :  { %v1795_v59 = vmul.f32 %v4911_v2, %v1794_v6  ;;  %vm1798_vm8 = vweird.f32 %v4911_v2  ;;  %v1803_v4 = vand.u32 2147483648, %v6593_v25  ;;  %v572_v49 = vmul.f32 0.5, %v6394_v0 }
 0x22f   :  { %v4465_v15 = vclamps-f32 %v1726_v33, 1.0  ;;  %v6638_v20 = vmul.f32 0.70710677, %v6633_v23  ;;  %v1914_v48 = vadd.f32 1.0, %v4463_v41  ;;  %vm1797_vm9 = vweird.f32 %v6593_v25  ;;  %v4761_v41 = vld [vmem:[#allocation10 + $0x18] sm:$0xff] }
 0x230   :  { %v1796_v19 = vadd.f32 %v4911_v2, %v1795_v59  ;;  %v1801_v31 = vand.u32 2147483647, %v6593_v25  ;;  %vm6643_vm10 = vmor %vm1797_vm9, %vm1798_vm8  ;;  %v570_v22 = vmul.f32 0.5, %v6355_v8  ;;  %v1780_v10 = vadd.f32 1.1283791, %v1779_v14  ;;  %3923 = vmatpush.bf16.msra.mxu0 %v4761_v41 }
 0x231   :  { %v1916_v13 = vadd.f32 1.0, %v4465_v15  ;;  %v2427_v35 = vmul.f32 %v6638_v20, %v6638_v20  ;;  %v1859_v61 = vmul.f32 %v1858_v32, %v6514_v39  ;;  %v1804_v25 = vor.u32 1.1754944e-38, %v1803_v4  ;;  %v2323_v15 = vpop.f32.mrf.mxu3 }
 0x232   :  { %v1800_v0 = vsel %vm6643_vm10, %v4911_v2, %v1796_v19  ;;  %v1946_v55 = vmul.f32 %v1914_v48, %v570_v22  ;;  %vm1802_vm11 = vcmp.eq.f32.partialorder %v1801_v31, 8.507059e+37  ;;  %v1781_v8 = vmul.f32 %v1780_v10, %v6457_v60  ;;  %v6666_v63 = vpop.f32.mrf.mxu2 }
 0x233   :  { %v4913_v58 = vpop.eup %4912  ;;  %v1948_v21 = vmul.f32 %v1916_v13, %v572_v49  ;;  %v6657_v46 = vmin.f32 %v2427_v35, 16.0  ;;  %v1805_v16 = vsel %vm1802_vm11, %v1804_v25, %v1800_v0  ;;  %v1883_v43 = vand.u32 2147483648, %v1871_v28 }
 0x234   :  { %v1873_v47 = vmul.f32 %v4913_v58, %v1871_v28  ;;  %v1860_v52 = vadd.f32 1.1283791, %v1859_v61  ;;  %vm1878_vm12 = vweird.f32 %v4913_v58  ;;  %v1881_v51 = vand.u32 2147483647, %v1871_v28 }
 0x235   :  { %v1966_v37 = vpack.c.bf16 %v1948_v21, %v1946_v55  ;;  %v2440_v24 = vmul.f32 3.8918573e-05, %v6657_v46  ;;  %v1806_v2 = vmul.f32 %v1805_v16, %v1781_v8  ;;  %vm1877_vm13 = vweird.f32 %v1871_v28  ;;  %v6668_v28 = vpop.f32.mrf.mxu0 }
 0x236   :  { %v1874_v12 = vsub.f32 1.0, %v1873_v47  ;;  %vm1879_vm14 = vmor %vm1877_vm13, %vm1878_vm12  ;;  %v1884_v36 = vor.u32 1.1754944e-38, %v1883_v43  ;;  %v1861_v60 = vmul.f32 %v1860_v52, %v6491_v18  ;;  %vm1882_vm15 = vcmp.eq.f32.partialorder %v1881_v51, 8.507059e+37  ;;  %v2227_v52 = vpop.f32.mrf.mxu1 }
 0x237   :  { %v2441_v44 = vadd.f32 0.001143296, %v2440_v24  ;;  %v4467_v7 = vclamps-f32 %v1806_v2, 1.0  ;;  %v6664_v30 = vperm.slane %v6613_v5, 1  ;;  %v576_v33 = vmul.f32 0.5, %v6479_v56  ;;  %v4769_v24 = vld [vmem:[#allocation10 + $0x58] sm:$0xff] }
 0x238   :  { %v1875_v39 = vmul.f32 %v4913_v58, %v1874_v12  ;;  %v574_v5 = vmul.f32 0.5, %v6444_v3  ;;  %v2429_v31 = vmul.f32 2.1237322e-06, %v6657_v46  ;;  %v2179_v12 = vadd.f32 %v6590_v62, %v6620_v50  ;;  %3972 = vmatpush.bf16.msra.mxu1 %v4769_v24 }
 0x239   :  { %v2442_v26 = vmul.f32 %v2441_v44, %v6657_v46  ;;  %v1918_v29 = vadd.f32 1.0, %v4467_v7  ;;  %v2275_v18 = vadd.f32 %v6585_v42, %v6664_v30  ;;  %v2277_v62 = vadd.f32 %v6625_v38, %v6664_v30 }
 0x23a   :  { %v1876_v27 = vadd.f32 %v4913_v58, %v1875_v39  ;;  %v6680_v4 = vpop.f32.mrf.mxu2  ;;  %v2430_v22 = vadd.f32 0.00028619796, %v2429_v31  ;;  %v6705_v51 = vadd.f32 %v2227_v52, %v2179_v12  ;;  %v6772_v12 = vadd.f32 %v6668_v28, %v6620_v50 }
 0x23b   :  { %v2443_v53 = vadd.f32 0.014752088, %v2442_v26  ;;  %v6675_v14 = vadd.f32 %v2323_v15, %v2275_v18  ;;  %v1950_v32 = vmul.f32 %v1918_v29, %v574_v5 }
 0x23c   :  { %2254 = vmatmul.bf16.gmra.mxu1 %v1966_v37  ;;  %2352 = vmatmul.bf16.gmra.mxu3 %v1966_v37  ;;  %v1880_v17 = vsel %vm1879_vm14, %v4913_v58, %v1876_v27  ;;  %v2431_v47 = vmul.f32 %v2430_v22, %v6657_v46 }
 0x23d   :  { %v1885_v54 = vsel %vm1882_vm15, %v1884_v36, %v1880_v17  ;;  %v2444_v11 = vmul.f32 %v2443_v53, %v6657_v46  ;;  %v6678_v19 = vmul.f32 0.70710677, %v6675_v14  ;;  %v6684_v49 = vpop.f32.mrf.mxu0  ;;  %v6710_v36 = vmul.f32 0.70710677, %v6705_v51 }
 0x23e   :  { %v1886_v1 = vmul.f32 %v1885_v54, %v1861_v60  ;;  %v2432_v43 = vadd.f32 0.0036580483, %v2431_v47  ;;  %v2230_v38 = vpop.f32.mrf.mxu1  ;;  %v6781_v24 = vadd.f32 %v6684_v49, %v6620_v50 }
 0x23f   :  { %v2445_v13 = vadd.f32 0.112945676, %v2444_v11  ;;  %v2467_v42 = vmul.f32 %v6678_v19, %v6678_v19  ;;  %v2507_v54 = vmul.f32 %v6710_v36, %v6710_v36 }
 0x240   :  { %v4469_v57 = vclamps-f32 %v1886_v1, 1.0  ;;  %v2433_v27 = vmul.f32 %v2432_v43, %v6657_v46  ;;  %v2325_v1 = vpop.f32.mrf.mxu3 }
 0x241   :  { %v2446_v3 = vmul.f32 %v2445_v13, %v6657_v46  ;;  %v6687_v48 = vmin.f32 %v2467_v42, 16.0 }
 0x242   :  { %v1920_v6 = vadd.f32 1.0, %v4469_v57  ;;  %v6692_v21 = vpop.f32.mrf.mxu2  ;;  %v6724_v57 = vadd.f32 %v2325_v1, %v2277_v62  ;;  %v2434_v29 = vadd.f32 0.05243302, %v2433_v27 }
 0x243   :  { %v2480_v45 = vmul.f32 3.8918573e-05, %v6687_v48  ;;  %v2447_v35 = vadd.f32 0.4994258, %v2446_v3  ;;  %v2469_v16 = vmul.f32 2.1237322e-06, %v6687_v48  ;;  %v2280_v3 = vadd.f32 %v6653_v40, %v6664_v30 }
 0x244   :  { %v1952_v59 = vmul.f32 %v1920_v6, %v576_v33  ;;  %v6726_v33 = vmin.f32 %v2507_v54, 16.0  ;;  %v2182_v6 = vadd.f32 %v6629_v9, %v6620_v50  ;;  %v6735_v5 = vmul.f32 0.70710677, %v6724_v57 }
 0x245   :  { %v2481_v58 = vadd.f32 0.001143296, %v2480_v45  ;;  %v2448_v0 = vmul.f32 %v2447_v35, %v6657_v46  ;;  %v6695_v25 = vpop.f32.mrf.mxu0  ;;  %v2470_v2 = vadd.f32 0.00028619796, %v2469_v16  ;;  %v6789_v28 = vadd.f32 %v6692_v21, %v6664_v30 }
 0x246   :  { %v1968_v56 = vpack.c.bf16 %v1952_v59, %v1950_v32  ;;  %v2520_v41 = vmul.f32 3.8918573e-05, %v6726_v33  ;;  %v6737_v15 = vadd.f32 %v2230_v38, %v2182_v6  ;;  %v2435_v59 = vmul.f32 %v2434_v29, %v6657_v46 }
 0x247   :  { %v2482_v10 = vmul.f32 %v2481_v58, %v6687_v48  ;;  %v6702_v8 = vadd.f32 1.0, %v2448_v0  ;;  %v2471_v7 = vmul.f32 %v2470_v2, %v6687_v48  ;;  %v2509_v13 = vmul.f32 2.1237322e-06, %v6726_v33 }
 0x248   :  { %v2547_v9 = vmul.f32 %v6735_v5, %v6735_v5  ;;  %v6746_v42 = vmul.f32 0.70710677, %v6737_v15  ;;  %v2328_v22 = vpop.f32.mrf.mxu3  ;;  %v6762_v0 = vadd.f32 %v6666_v63, %v6664_v30  ;;  %v2436_v47 = vadd.f32 0.18741608, %v2435_v59 }
 0x249   :  { %v2483_v61 = vadd.f32 0.014752088, %v2482_v10  ;;  %4914 = vrcp.f32 %v6702_v8  ;;  %v2472_v11 = vadd.f32 0.0036580483, %v2471_v7  ;;  %v6758_v10 = vadd.f32 %v6655_v34, %v6620_v50 }
 0x24a   :  { %v6714_v26 = vpop.f32.mrf.mxu2  ;;  %v6752_v35 = vmin.f32 %v2547_v9, 16.0  ;;  %v2587_v58 = vmul.f32 %v6746_v42, %v6746_v42  ;;  %v6777_v63 = vadd.f32 %v6680_v4, %v6664_v30  ;;  %v6794_v4 = vadd.f32 %v6695_v25, %v6620_v50 }
 0x24b   :  { %v2484_v55 = vmul.f32 %v2483_v61, %v6687_v48  ;;  %v2473_v31 = vmul.f32 %v2472_v11, %v6687_v48  ;;  %v2437_v7 = vmul.f32 %v2436_v47, %v6657_v46  ;;  %vm2455_vm0 = vweird.f32 %v6702_v8 }
 0x24c   :  { %2259 = vmatmul.bf16.gmra.mxu1 %v1968_v56  ;;  %2357 = vmatmul.bf16.gmra.mxu3 %v1968_v56  ;;  %v2521_v56 = vadd.f32 0.001143296, %v2520_v41  ;;  %v2560_v34 = vmul.f32 3.8918573e-05, %v6752_v35  ;;  %v6783_v52 = vmin.f32 %v2587_v58, 16.0 }
 0x24d   :  { %v2485_v37 = vadd.f32 0.112945676, %v2484_v55  ;;  %v6717_v17 = vpop.f32.mrf.mxu0  ;;  %v2474_v2 = vadd.f32 0.05243302, %v2473_v31  ;;  %v2549_v29 = vmul.f32 2.1237322e-06, %v6752_v35 }
 0x24e   :  { %v2522_v45 = vmul.f32 %v2521_v56, %v6726_v33  ;;  %v2561_v27 = vadd.f32 0.001143296, %v2560_v34  ;;  %v2459_v6 = vand.u32 2147483647, %v6702_v8  ;;  %v2461_v56 = vand.u32 2147483648, %v6702_v8 }
 0x24f   :  { %v2486_v39 = vmul.f32 %v2485_v37, %v6687_v48  ;;  %v6728_v18 = vpop.eup %4914  ;;  %v2510_v37 = vadd.f32 0.00028619796, %v2509_v13  ;;  %v2475_v11 = vmul.f32 %v2474_v2, %v6687_v48  ;;  %v2589_v47 = vmul.f32 2.1237322e-06, %v6783_v52 }
 0x250   :  { %v2451_v32 = vmul.f32 %v6728_v18, %v6702_v8  ;;  %v2523_v43 = vadd.f32 0.014752088, %v2522_v45  ;;  %v2562_v1 = vmul.f32 %v2561_v27, %v6752_v35  ;;  %vm2456_vm1 = vweird.f32 %v6728_v18 }
 0x251   :  { %v2487_v44 = vadd.f32 0.4994258, %v2486_v39  ;;  %v6785_v39 = vadd.f32 %v2328_v22, %v2280_v3  ;;  %v2511_v21 = vmul.f32 %v2510_v37, %v6726_v33  ;;  %v2550_v22 = vadd.f32 0.00028619796, %v2549_v29  ;;  %vm6825_vm2 = vmor %vm2455_vm0, %vm2456_vm1 }
 0x252   :  { %v6764_v61 = vpop.f32.mrf.mxu2  ;;  %v2452_v55 = vsub.f32 1.0, %v2451_v32  ;;  %v2563_v46 = vadd.f32 0.014752088, %v2562_v1  ;;  %v2476_v2 = vadd.f32 0.18741608, %v2475_v11  ;;  %vm2460_vm3 = vcmp.eq.f32.partialorder %v2459_v6, 8.507059e+37  ;;  %v2232_v11 = vpop.f32.mrf.mxu1 }
 0x253   :  { %v2488_v60 = vmul.f32 %v2487_v44, %v6687_v48  ;;  %v2524_v44 = vmul.f32 %v2523_v43, %v6726_v33  ;;  %v6806_v38 = vmul.f32 0.70710677, %v6785_v39  ;;  %v2512_v9 = vadd.f32 0.0036580483, %v2511_v21 }
 0x254   :  { %v2453_v62 = vmul.f32 %v6728_v18, %v2452_v55  ;;  %v2564_v31 = vmul.f32 %v2563_v46, %v6752_v35  ;;  %v2438_v43 = vadd.f32 1.1283791, %v2437_v7  ;;  %v2462_v7 = vor.u32 1.1754944e-38, %v2461_v56 }
 0x255   :  { %v6722_v53 = vadd.f32 1.0, %v2488_v60  ;;  %v6766_v40 = vpop.f32.mrf.mxu0  ;;  %v2600_v60 = vmul.f32 3.8918573e-05, %v6783_v52  ;;  %v2525_v54 = vadd.f32 0.112945676, %v2524_v44  ;;  %v2627_v37 = vmul.f32 %v6806_v38, %v6806_v38 }
 0x256   :  { %v2454_v59 = vadd.f32 %v6728_v18, %v2453_v62  ;;  %v2565_v27 = vadd.f32 0.112945676, %v2564_v31  ;;  %v6832_v62 = vadd.f32 %v6714_v26, %v6664_v30  ;;  %v2513_v1 = vmul.f32 %v2512_v9, %v6726_v33  ;;  %v4760_v9 = vld [vmem:[#allocation10 + $0x10] sm:$0xff] }
 0x257   :  { %4916 = vrcp.f32 %v6722_v53  ;;  %v2601_v25 = vadd.f32 0.001143296, %v2600_v60  ;;  %v2526_v41 = vmul.f32 %v2525_v54, %v6726_v33  ;;  %v2551_v29 = vmul.f32 %v2550_v22, %v6752_v35  ;;  %3924 = vmatpush.bf16.msra.mxu0 %v4760_v9 }
 0x258   :  { %v2566_v54 = vmul.f32 %v2565_v27, %v6752_v35  ;;  %v2590_v26 = vadd.f32 0.00028619796, %v2589_v47  ;;  %v2477_v46 = vmul.f32 %v2476_v2, %v6687_v48  ;;  %vm2495_vm5 = vweird.f32 %v6722_v53 }
 0x259   :  { %v2602_v13 = vmul.f32 %v2601_v25, %v6783_v52  ;;  %v2527_v3 = vadd.f32 0.4994258, %v2526_v41  ;;  %v6844_v25 = vmin.f32 %v2627_v37, 16.0  ;;  %v2501_v56 = vand.u32 2147483648, %v6722_v53 }
 0x25a   :  { %v6816_v45 = vpop.f32.mrf.mxu2  ;;  %v2552_v48 = vadd.f32 0.0036580483, %v2551_v29  ;;  %v2591_v31 = vmul.f32 %v2590_v26, %v6783_v52  ;;  %v6861_v47 = vadd.f32 %v6717_v17, %v6620_v50  ;;  %v2363_v26 = vmul.f32 0.5, %v6633_v23 }
 0x25b   :  { %v2603_v55 = vadd.f32 0.014752088, %v2602_v13  ;;  %v2528_v44 = vmul.f32 %v2527_v3, %v6726_v33  ;;  %v2499_v13 = vand.u32 2147483647, %v6722_v53  ;;  %v2514_v3 = vadd.f32 0.05243302, %v2513_v1 }
 0x25c   :  { %v2640_v22 = vmul.f32 3.8918573e-05, %v6844_v25  ;;  %v2553_v1 = vmul.f32 %v2552_v48, %v6752_v35  ;;  %v2592_v29 = vadd.f32 0.0036580483, %v2591_v31 }
 0x25d   :  { %v6768_v16 = vpop.eup %4916  ;;  %v6818_v58 = vpop.f32.mrf.mxu0  ;;  %v2604_v8 = vmul.f32 %v2603_v55, %v6783_v52  ;;  %v6839_v21 = vadd.f32 1.0, %v2528_v44  ;;  %vm2500_vm7 = vcmp.eq.f32.partialorder %v2499_v13, 8.507059e+37 }
 0x25e   :  { %v2491_v49 = vmul.f32 %v6768_v16, %v6722_v53  ;;  %vm2496_vm4 = vweird.f32 %v6768_v16  ;;  %v2641_v27 = vadd.f32 0.001143296, %v2640_v22  ;;  %v2364_v22 = vmul.f32 0.5, %v6675_v14 }
 0x25f   :  { %4918 = vrcp.f32 %v6839_v21  ;;  %vm6865_vm6 = vmor %vm2495_vm5, %vm2496_vm4  ;;  %vm2535_vm9 = vweird.f32 %v6839_v21 }
 0x260   :  { %v2492_v32 = vsub.f32 1.0, %v2491_v49  ;;  %v2458_v49 = vsel %vm6825_vm2, %v6728_v18, %v2454_v59  ;;  %v2439_v18 = vmul.f32 %v2438_v43, %v6638_v20  ;;  %v2567_v59 = vadd.f32 0.4994258, %v2566_v54 }
 0x261   :  { %v2463_v41 = vsel %vm2460_vm3, %v2462_v7, %v2458_v49  ;;  %v6855_v20 = vadd.f32 %v2232_v11, %v6758_v10  ;;  %v2629_v10 = vmul.f32 2.1237322e-06, %v6844_v25  ;;  %v2478_v43 = vadd.f32 1.1283791, %v2477_v46 }
 0x262   :  { %v2493_v60 = vmul.f32 %v6768_v16, %v2492_v32  ;;  %v2605_v32 = vadd.f32 0.112945676, %v2604_v8  ;;  %v2464_v55 = vmul.f32 %v2463_v41, %v2439_v18  ;;  %v2568_v53 = vmul.f32 %v2567_v59, %v6752_v35  ;;  %v2296_v2 = vpop.f32.mrf.mxu2 }
 0x263   :  { %v6877_v49 = vadd.f32 %v6764_v61, %v6664_v30  ;;  %v2502_v8 = vor.u32 1.1754944e-38, %v2501_v56  ;;  %v6884_v7 = vmul.f32 0.70710677, %v6855_v20  ;;  %v2630_v18 = vadd.f32 0.00028619796, %v2629_v10 }
 0x264   :  { %v2494_v6 = vadd.f32 %v6768_v16, %v2493_v60  ;;  %v2606_v44 = vmul.f32 %v2605_v32, %v6783_v52  ;;  %v6881_v60 = vadd.f32 %v6766_v40, %v6620_v50  ;;  %v6891_v11 = vadd.f32 1.0, %v2568_v53  ;;  %v2330_v53 = vpop.f32.mrf.mxu3 }
 0x265   :  { %v2201_v17 = vpop.f32.mrf.mxu0  ;;  %v6886_v54 = vpop.eup %4918  ;;  %v4598_v40 = vclamps-f32 %v2464_v55, 1.0  ;;  %v2479_v41 = vmul.f32 %v2478_v43, %v6678_v19  ;;  %v6897_v59 = vadd.f32 %v6816_v45, %v6664_v30  ;;  %v6901_v32 = vadd.f32 %v6818_v58, %v6620_v50 }
 0x266   :  { %v2498_v34 = vsel %vm6865_vm6, %v6768_v16, %v2494_v6  ;;  %v2515_v16 = vmul.f32 %v2514_v3, %v6726_v33  ;;  %v2607_v46 = vadd.f32 0.4994258, %v2606_v44  ;;  %v2642_v6 = vmul.f32 %v2641_v27, %v6844_v25 }
 0x267   :  { %v2503_v61 = vsel %vm2500_vm7, %v2502_v8, %v2498_v34  ;;  %v2531_v23 = vmul.f32 %v6886_v54, %v6839_v21  ;;  %v2667_v13 = vmul.f32 %v6884_v7, %v6884_v7  ;;  %v2554_v19 = vadd.f32 0.05243302, %v2553_v1 }
 0x268   :  { %v2504_v56 = vmul.f32 %v2503_v61, %v2479_v41  ;;  %v2516_v9 = vadd.f32 0.18741608, %v2515_v16  ;;  %v2593_v3 = vmul.f32 %v2592_v29, %v6783_v52  ;;  %4920 = vrcp.f32 %v6891_v11 }
 0x269   :  { %v2631_v45 = vmul.f32 %v2630_v18, %v6844_v25  ;;  %v2643_v48 = vadd.f32 0.014752088, %v2642_v6  ;;  %v6910_v31 = vmin.f32 %v2667_v13, 16.0  ;;  %v3707_v58 = vadd.f32 1.0, %v4598_v40 }
 0x26a   :  { %v6914_v55 = vadd.f32 %v2296_v2, %v6664_v30  ;;  %v2608_v37 = vmul.f32 %v2607_v46, %v6783_v52  ;;  %v6918_v10 = vmul.f32 0.5, %v6705_v51  ;;  %v2532_v43 = vsub.f32 1.0, %v2531_v23  ;;  %v2299_v14 = vpop.f32.mrf.mxu2 }
 0x26b   :  { %v6921_v34 = vadd.f32 %v2201_v17, %v6620_v50  ;;  %v6924_v44 = vmul.f32 0.5, %v6724_v57  ;;  %v4599_v27 = vclamps-f32 %v2504_v56, 1.0  ;;  %v2517_v8 = vmul.f32 %v2516_v9, %v6726_v33 }
 0x26c   :  { %v2644_v2 = vmul.f32 %v2643_v48, %v6844_v25  ;;  %v2680_v1 = vmul.f32 3.8918573e-05, %v6910_v31  ;;  %v2555_v29 = vmul.f32 %v2554_v19, %v6752_v35  ;;  %v2594_v51 = vadd.f32 0.05243302, %v2593_v3 }
 0x26d   :  { %v2203_v16 = vpop.f32.mrf.mxu0  ;;  %v2632_v61 = vadd.f32 0.0036580483, %v2631_v45  ;;  %v6931_v18 = vadd.f32 %v2330_v53, %v6762_v0  ;;  %v6933_v17 = vmul.f32 %v3707_v58, %v2363_v26  ;;  %v6935_v57 = vadd.f32 1.0, %v2608_v37  ;;  %v4768_v0 = vld [vmem:[#allocation10 + $0x50] sm:$0xff]  ;;  %v2235_v58 = vpop.f32.mrf.mxu1 }
 0x26e   :  { %v2645_v40 = vadd.f32 0.112945676, %v2644_v2  ;;  %v2681_v41 = vadd.f32 0.001143296, %v2680_v1  ;;  %v6937_v33 = vpop.eup %4920  ;;  %v2533_v46 = vmul.f32 %v6886_v54, %v2532_v43  ;;  %v6941_v6 = vmul.f32 0.5, %v6737_v15  ;;  %3973 = vmatpush.bf16.msra.mxu1 %v4768_v0 }
 0x26f   :  { %v6944_v23 = vadd.f32 %v2299_v14, %v6664_v30  ;;  %v6947_v13 = vadd.f32 %v2203_v16, %v6620_v50  ;;  %v2518_v26 = vadd.f32 1.1283791, %v2517_v8  ;;  %v6950_v56 = vmul.f32 0.5, %v6785_v39 }
 0x270   :  { %v2646_v9 = vmul.f32 %v2645_v40, %v6844_v25  ;;  %v2682_v19 = vmul.f32 %v2681_v41, %v6910_v31  ;;  %v3708_v3 = vadd.f32 1.0, %v4599_v27  ;;  %v2556_v45 = vadd.f32 0.18741608, %v2555_v29  ;;  %v4759_v40 = vld [vmem:[#allocation10 + $0x8] sm:$0xff] }
 0x271   :  { %8647 = vst [vmem:[#allocation30_spill] sm:$0xff] %v6947_v13  ;;  %v2595_v15 = vmul.f32 %v2594_v51, %v6783_v52  ;;  %v6956_v48 = vmul.f32 0.70710677, %v6931_v18  ;;  %v2571_v37 = vmul.f32 %v6937_v33, %v6891_v11  ;;  %4922 = vrcp.f32 %v6935_v57  ;;  %3925 = vmatpush.bf16.msra.mxu0 %v4759_v40 }
 0x272   :  { %v2633_v39 = vmul.f32 %v2632_v61, %v6844_v25  ;;  %v2647_v53 = vadd.f32 0.4994258, %v2646_v9  ;;  %v2534_v43 = vadd.f32 %v6886_v54, %v2533_v46  ;;  %vm2536_vm8 = vweird.f32 %v6886_v54 }
 0x273   :  { %v2683_v27 = vadd.f32 0.014752088, %v2682_v19  ;;  %v2707_v8 = vmul.f32 %v6956_v48, %v6956_v48  ;;  %v2539_v14 = vand.u32 2147483647, %v6839_v21  ;;  %v2541_v16 = vand.u32 2147483648, %v6839_v21  ;;  %vm6978_vm10 = vmor %vm2535_vm9, %vm2536_vm8 }
 0x274   :  { %v2648_v2 = vmul.f32 %v2647_v53, %v6844_v25  ;;  %v6970_v1 = vadd.f32 %v2235_v58, %v6772_v12  ;;  %v2557_v29 = vmul.f32 %v2556_v45, %v6752_v35  ;;  %v2596_v51 = vadd.f32 0.18741608, %v2595_v15 }
 0x275   :  { %v2684_v61 = vmul.f32 %v2683_v27, %v6910_v31  ;;  %v6975_v41 = vmul.f32 %v3708_v3, %v2364_v22  ;;  %v2519_v46 = vmul.f32 %v2518_v26, %v6710_v36  ;;  %v2572_v9 = vsub.f32 1.0, %v2571_v37 }
 0x276   :  { %v6982_v19 = vmin.f32 %v2707_v8, 16.0  ;;  %v2538_v12 = vsel %vm6978_vm10, %v6886_v54, %v2534_v43  ;;  %v2634_v35 = vadd.f32 0.05243302, %v2633_v39  ;;  %v2669_v21 = vmul.f32 2.1237322e-06, %v6910_v31 }
 0x277   :  { %v2685_v45 = vadd.f32 0.112945676, %v2684_v61  ;;  %v6988_v22 = vpop.eup %4922  ;;  %vm2540_vm11 = vcmp.eq.f32.partialorder %v2539_v14, 8.507059e+37  ;;  %v2542_v36 = vor.u32 1.1754944e-38, %v2541_v16  ;;  %v6990_v26 = vadd.f32 1.0, %v2648_v2 }
 0x278   :  { %v6993_v3 = vmul.f32 0.70710677, %v6970_v1  ;;  %v2558_v15 = vadd.f32 1.1283791, %v2557_v29  ;;  %v2579_v58 = vand.u32 2147483647, %v6891_v11  ;;  %v2597_v37 = vmul.f32 %v2596_v51, %v6783_v52  ;;  %v2206_v29 = vpop.f32.mrf.mxu0 }
 0x279   :  { %v6998_v54 = vmul.f32 0.5, %v6855_v20  ;;  %v2543_v39 = vsel %vm2540_vm11, %v2542_v36, %v2538_v12  ;;  %v2573_v53 = vmul.f32 %v6937_v33, %v2572_v9  ;;  %v2686_v43 = vmul.f32 %v2685_v45, %v6910_v31  ;;  %v2301_v20 = vpop.f32.mrf.mxu2  ;;  %v4767_v36 = vld [vmem:[#allocation10 + $0x48] sm:$0xff] }
 0x27a   :  { %v2720_v27 = vmul.f32 3.8918573e-05, %v6982_v19  ;;  %v2581_v8 = vand.u32 2147483648, %v6891_v11  ;;  %v2611_v14 = vmul.f32 %v6988_v22, %v6935_v57  ;;  %v2635_v16 = vmul.f32 %v2634_v35, %v6844_v25  ;;  %3974 = vmatpush.bf16.msra.mxu1 %v4767_v36 }
 0x27b   :  { %v2670_v2 = vadd.f32 0.00028619796, %v2669_v21  ;;  %4924 = vrcp.f32 %v6990_v26  ;;  %v2687_v52 = vadd.f32 0.4994258, %v2686_v43  ;;  %v2747_v61 = vmul.f32 %v6993_v3, %v6993_v3 }
 0x27c   :  { %v2721_v51 = vadd.f32 0.001143296, %v2720_v27  ;;  %v2544_v40 = vmul.f32 %v2543_v39, %v2519_v46  ;;  %vm2576_vm12 = vweird.f32 %v6937_v33  ;;  %v2598_v0 = vadd.f32 1.1283791, %v2597_v37 }
 0x27d   :  { %v2709_v9 = vmul.f32 2.1237322e-06, %v6982_v19  ;;  %v2574_v12 = vadd.f32 %v6937_v33, %v2573_v53  ;;  %v2688_v35 = vmul.f32 %v2687_v52, %v6910_v31  ;;  %v7015_v45 = vmin.f32 %v2747_v61, 16.0 }
 0x27e   :  { %v2722_v21 = vmul.f32 %v2721_v51, %v6982_v19  ;;  %v2612_v43 = vsub.f32 1.0, %v2611_v14  ;;  %v2671_v27 = vmul.f32 %v2670_v2, %v6910_v31  ;;  %v7019_v13 = vadd.f32 %v2301_v20, %v6664_v30 }
 0x27f   :  { %v7022_v46 = vadd.f32 %v2206_v29, %v6620_v50  ;;  %v2559_v37 = vmul.f32 %v2558_v15, %v6735_v5  ;;  %vm2575_vm13 = vweird.f32 %v6891_v11  ;;  %v2636_v39 = vadd.f32 0.18741608, %v2635_v16  ;;  %v2333_v5 = vpop.f32.mrf.mxu3 }
 0x280   :  { %v2723_v53 = vadd.f32 0.014752088, %v2722_v21  ;;  %vm7028_vm14 = vmor %vm2575_vm13, %vm2576_vm12  ;;  %vm7032_vm15 = vcmp.eq.f32.partialorder %v2579_v58, 8.507059e+37  ;;  %v2582_v2 = vor.u32 1.1754944e-38, %v2581_v8  ;;  %v2710_v20 = vadd.f32 0.00028619796, %v2709_v9 }
 0x281   :  { %8650 = vst [vmem:[#allocation16_spill] sm:$0xff] %v7022_v46  ;;  %v2760_v29 = vmul.f32 3.8918573e-05, %v7015_v45  ;;  %v7037_v15 = vpop.eup %4924  ;;  %v4600_v11 = vclamps-f32 %v2544_v40, 1.0  ;;  %v2578_v16 = vsel %vm7028_vm14, %v6937_v33, %v2574_v12  ;;  %v7043_v51 = vmul.f32 %v2598_v0, %v6746_v42 }
 0x282   :  { %v7045_v61 = vadd.f32 1.0, %v2688_v35  ;;  %v2613_v58 = vmul.f32 %v6988_v22, %v2612_v43  ;;  %v2621_v8 = vand.u32 2147483648, %v6935_v57  ;;  %v2672_v9 = vadd.f32 0.0036580483, %v2671_v27  ;;  %v2237_v35 = vpop.f32.mrf.mxu1 }
 0x283   :  { %v2724_v21 = vmul.f32 %v2723_v53, %v6982_v19  ;;  %vm2616_vm0 = vweird.f32 %v6988_v22  ;;  %v2637_v40 = vmul.f32 %v2636_v39, %v6844_v25  ;;  %v2761_v36 = vadd.f32 0.001143296, %v2760_v29 }
 0x284   :  { %v7053_v52 = vadd.f32 %v2333_v5, %v6777_v63  ;;  %v2583_v42 = vsel %vm7032_vm15, %v2582_v2, %v2578_v16  ;;  %v2651_v33 = vmul.f32 %v7037_v15, %v6990_v26  ;;  %v2711_v0 = vmul.f32 %v2710_v20, %v6982_v19 }
 0x285   :  { %v2725_v12 = vadd.f32 0.112945676, %v2724_v21  ;;  %v3709_v43 = vadd.f32 1.0, %v4600_v11  ;;  %4926 = vrcp.f32 %v7045_v61  ;;  %v2762_v27 = vmul.f32 %v2761_v36, %v7015_v45 }
 0x286   :  { %v7063_v25 = vmul.f32 0.70710677, %v7053_v52  ;;  %v2614_v63 = vadd.f32 %v6988_v22, %v2613_v58  ;;  %v2673_v39 = vmul.f32 %v2672_v9, %v6910_v31  ;;  %v2749_v14 = vmul.f32 2.1237322e-06, %v7015_v45 }
 0x287   :  { %v2726_v53 = vmul.f32 %v2725_v12, %v6982_v19  ;;  %v2584_v2 = vmul.f32 %v2583_v42, %v2559_v37  ;;  %v2763_v20 = vadd.f32 0.014752088, %v2762_v27  ;;  %v7072_v5 = vadd.f32 %v2237_v35, %v6781_v24 }
 0x288   :  { %v2787_v29 = vmul.f32 %v7063_v25, %v7063_v25  ;;  %vm2615_vm1 = vweird.f32 %v6935_v57  ;;  %v2619_v11 = vand.u32 2147483647, %v6935_v57  ;;  %v2652_v16 = vsub.f32 1.0, %v2651_v33 }
 0x289   :  { %v2712_v58 = vadd.f32 0.0036580483, %v2711_v0  ;;  %v7077_v9 = vmul.f32 %v3709_v43, %v6918_v10  ;;  %vm7081_vm2 = vmor %vm2615_vm1, %vm2616_vm0  ;;  %v2638_v21 = vadd.f32 1.1283791, %v2637_v40  ;;  %v2764_v36 = vmul.f32 %v2763_v20, %v7015_v45 }
 0x28a   :  { %v7086_v24 = vmin.f32 %v2787_v29, 16.0  ;;  %v2618_v57 = vsel %vm7081_vm2, %v6988_v22, %v2614_v63  ;;  %v2674_v42 = vadd.f32 0.05243302, %v2673_v39  ;;  %v2727_v33 = vadd.f32 0.4994258, %v2726_v53 }
 0x28b   :  { %v2750_v0 = vadd.f32 0.00028619796, %v2749_v14  ;;  %v7091_v10 = vpop.eup %4926  ;;  %v4601_v12 = vclamps-f32 %v2584_v2, 1.0  ;;  %v2622_v35 = vor.u32 1.1754944e-38, %v2621_v8  ;;  %v2765_v43 = vadd.f32 0.112945676, %v2764_v36 }
 0x28c   :  { %v7094_v27 = vmul.f32 0.70710677, %v7072_v5  ;;  %vm2620_vm3 = vcmp.eq.f32.partialorder %v2619_v11, 8.507059e+37  ;;  %v2653_v40 = vmul.f32 %v7037_v15, %v2652_v16  ;;  %v2713_v20 = vmul.f32 %v2712_v58, %v6982_v19 }
 0x28d   :  { %v2800_v29 = vmul.f32 3.8918573e-05, %v7086_v24  ;;  %v3771_v22 = vpack.c.bf16 %v7077_v9, %v6933_v17  ;;  %v2623_v63 = vsel %vm2620_vm3, %v2622_v35, %v2618_v57  ;;  %v2639_v39 = vmul.f32 %v2638_v21, %v6806_v38 }
 0x28e   :  { %v7103_v53 = vmul.f32 0.5, %v6931_v18  ;;  %v2691_v8 = vmul.f32 %v7091_v10, %v7045_v61  ;;  %v2728_v14 = vmul.f32 %v2727_v33, %v6982_v19  ;;  %v2751_v2 = vmul.f32 %v2750_v0, %v7015_v45 }
 0x28f   :  { %v2801_v11 = vadd.f32 0.001143296, %v2800_v29  ;;  %v3710_v16 = vadd.f32 1.0, %v4601_v12  ;;  %v2675_v58 = vmul.f32 %v2674_v42, %v6910_v31  ;;  %v2766_v37 = vmul.f32 %v2765_v43, %v7015_v45  ;;  %v4758_v29 = vld [vmem:[#allocation10] sm:$0xff] }
 0x290   :  { %v2827_v17 = vmul.f32 %v7094_v27, %v7094_v27  ;;  %v2654_v38 = vadd.f32 %v7037_v15, %v2653_v40  ;;  %vm2656_vm4 = vweird.f32 %v7037_v15  ;;  %v2714_v18 = vadd.f32 0.05243302, %v2713_v20  ;;  %3926 = vmatpush.bf16.msra.mxu0 %v4758_v29 }
 0x291   :  { %v2789_v9 = vmul.f32 2.1237322e-06, %v7086_v24  ;;  %v2624_v21 = vmul.f32 %v2623_v63, %v7043_v51  ;;  %vm2655_vm5 = vweird.f32 %v6990_v26  ;;  %v2661_v36 = vand.u32 2147483648, %v6990_v26 }
 0x292   :  { %v2802_v57 = vmul.f32 %v2801_v11, %v7086_v24  ;;  %v2659_v42 = vand.u32 2147483647, %v6990_v26  ;;  %v2692_v33 = vsub.f32 1.0, %v2691_v8  ;;  %v7121_v0 = vadd.f32 1.0, %v2728_v14  ;;  %vm7126_vm6 = vmor %vm2655_vm5, %vm2656_vm4 }
 0x293   :  { %v2752_v12 = vadd.f32 0.0036580483, %v2751_v2  ;;  %v7124_v35 = vmul.f32 %v3710_v16, %v6924_v44  ;;  %v2767_v51 = vadd.f32 0.4994258, %v2766_v37  ;;  %v7130_v20 = vmin.f32 %v2827_v17, 16.0  ;;  %v2335_v2 = vpop.f32.mrf.mxu3  ;;  %3927 = vmatmul.bf16.vlgmr.msra.gmra.mxu0 %v3771_v22 }
 0x294   :  { %v2803_v40 = vadd.f32 0.014752088, %v2802_v57  ;;  %v2658_v26 = vsel %vm7126_vm6, %v7037_v15, %v2654_v38  ;;  %v2676_v63 = vadd.f32 0.18741608, %v2675_v58  ;;  %v2715_v8 = vmul.f32 %v2714_v18, %v6982_v19  ;;  %v2304_v58 = vpop.f32.mrf.mxu2 }
 0x295   :  { %v2790_v14 = vadd.f32 0.00028619796, %v2789_v9  ;;  %v4602_v44 = vclamps-f32 %v2624_v21, 1.0  ;;  %v2662_v11 = vor.u32 1.1754944e-38, %v2661_v36  ;;  %v2840_v46 = vmul.f32 3.8918573e-05, %v7130_v20 }
 0x296   :  { %v2804_v16 = vmul.f32 %v2803_v40, %v7086_v24  ;;  %vm2660_vm7 = vcmp.eq.f32.partialorder %v2659_v42, 8.507059e+37  ;;  %4928 = vrcp.f32 %v7121_v0  ;;  %v7140_v37 = vmul.f32 0.5, %v6970_v1 }
 0x297   :  { %v2753_v15 = vmul.f32 %v2752_v12, %v7015_v45  ;;  %v2663_v17 = vsel %vm2660_vm7, %v2662_v11, %v2658_v26  ;;  %v2693_v38 = vmul.f32 %v7091_v10, %v2692_v33  ;;  %v2768_v18 = vmul.f32 %v2767_v51, %v7015_v45 }
 0x298   :  { %v7146_v9 = vadd.f32 %v2335_v2, %v6789_v28  ;;  %v2677_v21 = vmul.f32 %v2676_v63, %v6910_v31  ;;  %v2716_v36 = vadd.f32 0.18741608, %v2715_v8  ;;  %v2791_v57 = vmul.f32 %v2790_v14, %v7086_v24 }
 0x299   :  { %v2805_v42 = vadd.f32 0.112945676, %v2804_v16  ;;  %v3772_v1 = vpack.c.bf16 %v7124_v35, %v6975_v41  ;;  %v3711_v12 = vadd.f32 1.0, %v4602_v44  ;;  %v7153_v43 = vadd.f32 %v2304_v58, %v6664_v30 }
 0x29a   :  { %v2841_v33 = vadd.f32 0.001143296, %v2840_v46  ;;  %v2664_v40 = vmul.f32 %v2663_v17, %v2639_v39  ;;  %vm2696_vm8 = vweird.f32 %v7091_v10  ;;  %v2754_v28 = vadd.f32 0.05243302, %v2753_v15  ;;  %v4766_v17 = vld [vmem:[#allocation10 + $0x40] sm:$0xff] }
 0x29b   :  { %v2806_v51 = vmul.f32 %v2805_v42, %v7086_v24  ;;  %v2694_v31 = vadd.f32 %v7091_v10, %v2693_v38  ;;  %v7158_v29 = vadd.f32 1.0, %v2768_v18  ;;  %v7162_v26 = vmul.f32 0.70710677, %v7146_v9  ;;  %v2240_v42 = vpop.f32.mrf.mxu1  ;;  %3975 = vmatpush.bf16.msra.mxu1 %v4766_v17 }
 0x29c   :  { %v2842_v22 = vmul.f32 %v2841_v33, %v7130_v20  ;;  %v7164_v41 = vpop.eup %4928  ;;  %v2678_v35 = vadd.f32 1.1283791, %v2677_v21  ;;  %v2701_v46 = vand.u32 2147483648, %v7045_v61  ;;  %v2717_v39 = vmul.f32 %v2716_v36, %v6982_v19  ;;  %v2208_v36 = vpop.f32.mrf.mxu0 }
 0x29d   :  { %v2792_v63 = vadd.f32 0.0036580483, %v2791_v57  ;;  %vm2695_vm9 = vweird.f32 %v7045_v61  ;;  %v2699_v8 = vand.u32 2147483647, %v7045_v61  ;;  %v2867_v2 = vmul.f32 %v7162_v26, %v7162_v26 }
 0x29e   :  { %v2843_v14 = vadd.f32 0.014752088, %v2842_v22  ;;  %v7173_v44 = vmul.f32 %v3711_v12, %v6941_v6  ;;  %v4603_v11 = vclamps-f32 %v2664_v40, 1.0  ;;  %vm7177_vm10 = vmor %vm2695_vm9, %vm2696_vm8  ;;  %v2755_v19 = vmul.f32 %v2754_v28, %v7015_v45  ;;  %3976 = vmatmul.bf16.vlgmr.msra.gmra.mxu1 %v3772_v1 }
 0x29f   :  { %v2807_v15 = vadd.f32 0.4994258, %v2806_v51  ;;  %v2698_v61 = vsel %vm7177_vm10, %v7091_v10, %v2694_v31  ;;  %v2731_v58 = vmul.f32 %v7164_v41, %v7121_v0  ;;  %4930 = vrcp.f32 %v7158_v29 }
 0x2a0   :  { %v2844_v6 = vmul.f32 %v2843_v14, %v7130_v20  ;;  %v2679_v38 = vmul.f32 %v2678_v35, %v6884_v7  ;;  %v2702_v18 = vor.u32 1.1754944e-38, %v2701_v46  ;;  %v2718_v21 = vadd.f32 1.1283791, %v2717_v39 }
 0x2a1   :  { %v2793_v57 = vmul.f32 %v2792_v63, %v7086_v24  ;;  %vm2700_vm11 = vcmp.eq.f32.partialorder %v2699_v8, 8.507059e+37  ;;  %v2829_v12 = vmul.f32 2.1237322e-06, %v7130_v20  ;;  %v7192_v33 = vmin.f32 %v2867_v2, 16.0 }
 0x2a2   :  { %v2845_v10 = vadd.f32 0.112945676, %v2844_v6  ;;  %v3712_v40 = vadd.f32 1.0, %v4603_v11  ;;  %v2703_v28 = vsel %vm2700_vm11, %v2702_v18, %v2698_v61  ;;  %v2756_v51 = vadd.f32 0.18741608, %v2755_v19 }
 0x2a3   :  { %v2808_v31 = vmul.f32 %v2807_v15, %v7086_v24  ;;  %v2732_v22 = vsub.f32 1.0, %v2731_v58  ;;  %v7196_v7 = vadd.f32 %v2208_v36, %v6620_v50  ;;  %v7199_v35 = vmul.f32 0.5, %v7053_v52 }
 0x2a4   :  { %v7202_v46 = vadd.f32 %v2240_v42, %v6794_v4  ;;  %v7205_v39 = vmul.f32 %v2718_v21, %v6956_v48  ;;  %v2794_v63 = vadd.f32 0.05243302, %v2793_v57  ;;  %v7208_v8 = vmul.f32 0.5, %v7072_v5  ;;  %v2338_v42 = vpop.f32.mrf.mxu3 }
 0x2a5   :  { %8661 = vst [vmem:[#allocation18_spill] sm:$0xff] %v7196_v7  ;;  %v2846_v14 = vmul.f32 %v2845_v10, %v7130_v20  ;;  %v7211_v2 = vpop.eup %4930  ;;  %v2704_v11 = vmul.f32 %v2703_v28, %v2679_v38  ;;  %v2739_v16 = vand.u32 2147483647, %v7121_v0  ;;  %v2830_v52 = vadd.f32 0.00028619796, %v2829_v12  ;;  %v2306_v10 = vpop.f32.mrf.mxu2 }
 0x2a6   :  { %v2880_v19 = vmul.f32 3.8918573e-05, %v7192_v33  ;;  %v7216_v4 = vmul.f32 %v3712_v40, %v6950_v56  ;;  %v2757_v48 = vmul.f32 %v2756_v51, %v7015_v45  ;;  %v7219_v15 = vadd.f32 1.0, %v2808_v31  ;;  %v2211_v40 = vpop.f32.mrf.mxu0 }
 0x2a7   :  { %v2847_v5 = vadd.f32 0.4994258, %v2846_v14  ;;  %v2733_v61 = vmul.f32 %v7164_v41, %v2732_v22  ;;  %vm2735_vm12 = vweird.f32 %v7121_v0  ;;  %v7224_v58 = vmul.f32 0.70710677, %v7202_v46 }
 0x2a8   :  { %v2881_v1 = vadd.f32 0.001143296, %v2880_v19  ;;  %v2741_v6 = vand.u32 2147483648, %v7121_v0  ;;  %v2771_v17 = vmul.f32 %v7211_v2, %v7158_v29  ;;  %v2795_v56 = vmul.f32 %v2794_v63, %v7086_v24  ;;  %v2242_v19 = vpop.f32.mrf.mxu1 }
 0x2a9   :  { %v2848_v45 = vmul.f32 %v2847_v5, %v7130_v20  ;;  %v4604_v38 = vclamps-f32 %v2704_v11, 1.0  ;;  %vm7231_vm13 = vcmp.eq.f32.partialorder %v2739_v16, 8.507059e+37  ;;  %v2831_v21 = vmul.f32 %v2830_v52, %v7130_v20 }
 0x2aa   :  { %v2882_v36 = vmul.f32 %v2881_v1, %v7192_v33  ;;  %v2907_v57 = vmul.f32 %v7224_v58, %v7224_v58  ;;  %vm2736_vm14 = vweird.f32 %v7164_v41  ;;  %v2758_v12 = vadd.f32 1.1283791, %v2757_v48 }
 0x2ab   :  { %4932 = vrcp.f32 %v7219_v15  ;;  %v2869_v28 = vmul.f32 2.1237322e-06, %v7192_v33  ;;  %v2734_v51 = vadd.f32 %v7164_v41, %v2733_v61  ;;  %v7243_v31 = vadd.f32 1.0, %v2848_v45  ;;  %vm7260_vm15 = vmor %vm2735_vm12, %vm2736_vm14 }
 0x2ac   :  { %v2883_v22 = vadd.f32 0.014752088, %v2882_v36  ;;  %v7245_v63 = vmin.f32 %v2907_v57, 16.0  ;;  %v2742_v14 = vor.u32 1.1754944e-38, %v2741_v6  ;;  %v2772_v11 = vsub.f32 1.0, %v2771_v17 }
 0x2ad   :  { %v2796_v16 = vadd.f32 0.18741608, %v2795_v56  ;;  %v7248_v52 = vadd.f32 %v2338_v42, %v6832_v62  ;;  %v3713_v48 = vadd.f32 1.0, %v4604_v38  ;;  %v2832_v5 = vadd.f32 0.0036580483, %v2831_v21 }
 0x2ae   :  { %v7251_v1 = vadd.f32 %v2306_v10, %v6664_v30  ;;  %v7254_v7 = vadd.f32 %v2211_v40, %v6620_v50  ;;  %v7265_v62 = vmul.f32 %v2758_v12, %v6993_v3  ;;  %v2779_v6 = vand.u32 2147483647, %v7158_v29 }
 0x2af   :  { %v2870_v17 = vadd.f32 0.00028619796, %v2869_v28  ;;  %v2884_v56 = vmul.f32 %v2883_v22, %v7192_v33  ;;  %v2738_v45 = vsel %vm7260_vm15, %v7164_v41, %v2734_v51  ;;  %4934 = vrcp.f32 %v7243_v31 }
 0x2b0   :  { %8664 = vst [vmem:[#allocation20_spill] sm:$0xff] %v7251_v1  ;;  %v2920_v0 = vmul.f32 3.8918573e-05, %v7245_v63  ;;  %v7275_v38 = vadd.f32 %v2242_v19, %v6861_v47  ;;  %v2773_v3 = vmul.f32 %v7211_v2, %v2772_v11  ;;  %v2797_v36 = vmul.f32 %v2796_v16, %v7086_v24 }
 0x2b1   :  { %8665 = vst [vmem:[#allocation23_spill] sm:$0xff] %v7254_v7  ;;  %v7277_v21 = vpop.eup %4932  ;;  %v2885_v57 = vadd.f32 0.112945676, %v2884_v56  ;;  %v7282_v42 = vmul.f32 0.70710677, %v7248_v52  ;;  %vm2775_vm0 = vweird.f32 %v7158_v29  ;;  %v2781_v41 = vand.u32 2147483648, %v7158_v29  ;;  %v2309_v56 = vpop.f32.mrf.mxu2 }
 0x2b2   :  { %v2833_v12 = vmul.f32 %v2832_v5, %v7130_v20  ;;  %v2921_v10 = vadd.f32 0.001143296, %v2920_v0  ;;  %v2743_v47 = vsel %vm7231_vm13, %v2742_v14, %v2738_v45  ;;  %v2871_v40 = vmul.f32 %v2870_v17, %v7192_v33 }
 0x2b3   :  { %v2886_v28 = vmul.f32 %v2885_v57, %v7192_v33  ;;  %v2947_v24 = vmul.f32 %v7282_v42, %v7282_v42  ;;  %v7294_v51 = vmul.f32 %v3713_v48, %v6998_v54  ;;  %v2811_v22 = vmul.f32 %v7277_v21, %v7219_v15 }
 0x2b4   :  { %v2922_v11 = vmul.f32 %v2921_v10, %v7245_v63  ;;  %v7300_v16 = vmul.f32 0.70710677, %v7275_v38  ;;  %v2774_v18 = vadd.f32 %v7211_v2, %v2773_v3  ;;  %vm2776_vm1 = vweird.f32 %v7211_v2 }
 0x2b5   :  { %vm7304_vm2 = vcmp.eq.f32.partialorder %v2779_v6, 8.507059e+37  ;;  %v2798_v19 = vadd.f32 1.1283791, %v2797_v36  ;;  %v7308_v5 = vpop.eup %4934  ;;  %v2744_v54 = vmul.f32 %v2743_v47, %v7205_v39  ;;  %v2834_v48 = vadd.f32 0.05243302, %v2833_v12  ;;  %vm7316_vm3 = vmor %vm2775_vm0, %vm2776_vm1 }
 0x2b6   :  { %v2887_v61 = vadd.f32 0.4994258, %v2886_v28  ;;  %v2923_v17 = vadd.f32 0.014752088, %v2922_v11  ;;  %v2782_v45 = vor.u32 1.1754944e-38, %v2781_v41  ;;  %v7312_v3 = vmin.f32 %v2947_v24, 16.0 }
 0x2b7   :  { %v2872_v0 = vadd.f32 0.0036580483, %v2871_v40  ;;  %v2909_v57 = vmul.f32 2.1237322e-06, %v7245_v63  ;;  %v2812_v36 = vsub.f32 1.0, %v2811_v22  ;;  %v7321_v10 = vmul.f32 0.5, %v7146_v9 }
 0x2b8   :  { %v2924_v39 = vmul.f32 %v2923_v17, %v7245_v63  ;;  %v2987_v41 = vmul.f32 %v7300_v16, %v7300_v16  ;;  %v2778_v12 = vsel %vm7316_vm3, %v7211_v2, %v2774_v18  ;;  %v2851_v29 = vmul.f32 %v7308_v5, %v7243_v31 }
 0x2b9   :  { %v2888_v47 = vmul.f32 %v2887_v61, %v7192_v33  ;;  %v7333_v40 = vadd.f32 %v2309_v56, %v6664_v30  ;;  %v4605_v28 = vclamps-f32 %v2744_v54, 1.0  ;;  %v2835_v9 = vmul.f32 %v2834_v48, %v7130_v20 }
 0x2ba   :  { %v7337_v24 = vmul.f32 0.5, %v7202_v46  ;;  %v2925_v22 = vadd.f32 0.112945676, %v2924_v39  ;;  %v7340_v11 = vmul.f32 %v2798_v19, %v7063_v25  ;;  %v2873_v2 = vmul.f32 %v2872_v0, %v7192_v33 }
 0x2bb   :  { %8672 = vst [vmem:[#allocation26_spill] sm:$0xff] %v7333_v40  ;;  %v2910_v18 = vadd.f32 0.00028619796, %v2909_v57  ;;  %v2960_v17 = vmul.f32 3.8918573e-05, %v7312_v3  ;;  %v2783_v61 = vsel %vm7304_vm2, %v2782_v45, %v2778_v12  ;;  %v2813_v56 = vmul.f32 %v7277_v21, %v2812_v36 }
 0x2bc   :  { %vm2815_vm4 = vweird.f32 %v7219_v15  ;;  %v7348_v54 = vmin.f32 %v2987_v41, 16.0  ;;  %v2819_v46 = vand.u32 2147483647, %v7219_v15  ;;  %v2852_v48 = vsub.f32 1.0, %v2851_v29 }
 0x2bd   :  { %v7351_v6 = vadd.f32 1.0, %v2888_v47  ;;  %v2949_v25 = vmul.f32 2.1237322e-06, %v7312_v3  ;;  %v2821_v19 = vand.u32 2147483648, %v7219_v15  ;;  %v2836_v0 = vadd.f32 0.18741608, %v2835_v9  ;;  %v2245_v15 = vpop.f32.mrf.mxu1 }
 0x2be   :  { %v2926_v57 = vmul.f32 %v2925_v22, %v7245_v63  ;;  %v2961_v14 = vadd.f32 0.001143296, %v2960_v17  ;;  %v7356_v45 = vadd.f32 1.0, %v4605_v28  ;;  %v2784_v36 = vmul.f32 %v2783_v61, %v7265_v62  ;;  %v2340_v22 = vpop.f32.mrf.mxu3 }
 0x2bf   :  { %v2874_v39 = vadd.f32 0.05243302, %v2873_v2  ;;  %v2911_v41 = vmul.f32 %v2910_v18, %v7245_v63  ;;  %v2814_v12 = vadd.f32 %v7277_v21, %v2813_v56  ;;  %vm2816_vm5 = vweird.f32 %v7277_v21 }
 0x2c0   :  { %v2962_v29 = vmul.f32 %v2961_v14, %v7312_v3  ;;  %v3000_v47 = vmul.f32 3.8918573e-05, %v7348_v54  ;;  %vm7364_vm6 = vcmp.eq.f32.partialorder %v2819_v46, 8.507059e+37  ;;  %v2853_v28 = vmul.f32 %v7308_v5, %v2852_v48  ;;  %vm7373_vm7 = vmor %vm2815_vm4, %vm2816_vm5 }
 0x2c1   :  { %4936 = vrcp.f32 %v7351_v6  ;;  %v2950_v62 = vadd.f32 0.00028619796, %v2949_v25  ;;  %v2837_v2 = vmul.f32 %v2836_v0, %v7130_v20  ;;  %v2927_v18 = vadd.f32 0.4994258, %v2926_v57 }
 0x2c2   :  { %v2963_v17 = vadd.f32 0.014752088, %v2962_v29  ;;  %v3001_v61 = vadd.f32 0.001143296, %v3000_v47  ;;  %v4606_v56 = vclamps-f32 %v2784_v36, 1.0  ;;  %v2822_v46 = vor.u32 1.1754944e-38, %v2821_v19 }
 0x2c3   :  { %v2875_v40 = vmul.f32 %v2874_v39, %v7192_v33  ;;  %v2912_v48 = vadd.f32 0.0036580483, %v2911_v41  ;;  %v2818_v25 = vsel %vm7373_vm7, %v7277_v21, %v2814_v12  ;;  %v2859_v20 = vand.u32 2147483647, %v7243_v31 }
 0x2c4   :  { %v2964_v0 = vmul.f32 %v2963_v17, %v7312_v3  ;;  %v7384_v57 = vadd.f32 %v2340_v22, %v6877_v49  ;;  %v2854_v36 = vadd.f32 %v7308_v5, %v2853_v28  ;;  %vm2856_vm8 = vweird.f32 %v7308_v5 }
 0x2c5   :  { %v2951_v19 = vmul.f32 %v2950_v62, %v7312_v3  ;;  %v3002_v39 = vmul.f32 %v3001_v61, %v7348_v54  ;;  %v2838_v41 = vadd.f32 1.1283791, %v2837_v2  ;;  %vm2855_vm9 = vweird.f32 %v7243_v31 }
 0x2c6   :  { %v2861_v21 = vand.u32 2147483648, %v7243_v31  ;;  %v2928_v12 = vmul.f32 %v2927_v18, %v7245_v63  ;;  %v2876_v49 = vadd.f32 0.18741608, %v2875_v40  ;;  %v2913_v47 = vmul.f32 %v2912_v48, %v7245_v63  ;;  %vm7401_vm10 = vmor %vm2855_vm9, %vm2856_vm8  ;;  %v2213_v48 = vpop.f32.mrf.mxu0 }
 0x2c7   :  { %v7393_v29 = vpop.eup %4936  ;;  %v2965_v22 = vadd.f32 0.112945676, %v2964_v0  ;;  %v7397_v28 = vadd.f32 %v2245_v15, %v6881_v60  ;;  %v2823_v62 = vsel %vm7364_vm6, %v2822_v46, %v2818_v25  ;;  %v2989_v31 = vmul.f32 2.1237322e-06, %v7348_v54 }
 0x2c8   :  { %v3003_v17 = vadd.f32 0.014752088, %v3002_v39  ;;  %v7407_v18 = vmul.f32 0.70710677, %v7384_v57  ;;  %v2858_v40 = vsel %vm7401_vm10, %v7308_v5, %v2854_v36  ;;  %vm7412_vm11 = vcmp.eq.f32.partialorder %v2859_v20, 8.507059e+37 }
 0x2c9   :  { %v2952_v9 = vadd.f32 0.0036580483, %v2951_v19  ;;  %v2966_v61 = vmul.f32 %v2965_v22, %v7312_v3  ;;  %v2891_v14 = vmul.f32 %v7393_v29, %v7351_v6  ;;  %v7419_v46 = vadd.f32 1.0, %v2928_v12 }
 0x2ca   :  { %v3004_v25 = vmul.f32 %v3003_v17, %v7348_v54  ;;  %v3027_v0 = vmul.f32 %v7407_v18, %v7407_v18  ;;  %v2824_v5 = vmul.f32 %v2823_v62, %v7340_v11  ;;  %v2862_v20 = vor.u32 1.1754944e-38, %v2861_v21 }
 0x2cb   :  { %v2914_v15 = vadd.f32 0.05243302, %v2913_v47  ;;  %v7426_v36 = vmul.f32 0.70710677, %v7397_v28  ;;  %v2877_v19 = vmul.f32 %v2876_v49, %v7192_v33  ;;  %v2990_v39 = vadd.f32 0.00028619796, %v2989_v31 }
 0x2cc   :  { %v3005_v22 = vadd.f32 0.112945676, %v3004_v25  ;;  %v7429_v2 = vmin.f32 %v3027_v0, 16.0  ;;  %v3715_v12 = vadd.f32 1.0, %v4606_v56  ;;  %v2863_v17 = vsel %vm7412_vm11, %v2862_v20, %v2858_v40 }
 0x2cd   :  { %v7434_v7 = vadd.f32 %v2213_v48, %v6620_v50  ;;  %v2967_v1 = vadd.f32 0.4994258, %v2966_v61  ;;  %v2892_v11 = vsub.f32 1.0, %v2891_v14  ;;  %4938 = vrcp.f32 %v7419_v46 }
 0x2ce   :  { %v2953_v21 = vmul.f32 %v2952_v9, %v7312_v3  ;;  %v3006_v47 = vmul.f32 %v3005_v22, %v7348_v54  ;;  %v2839_v33 = vmul.f32 %v2838_v41, %v7094_v27  ;;  %v2915_v49 = vmul.f32 %v2914_v15, %v7245_v63  ;;  %v2311_v9 = vpop.f32.mrf.mxu2 }
 0x2cf   :  { %v3040_v56 = vmul.f32 3.8918573e-05, %v7429_v2  ;;  %v3067_v62 = vmul.f32 %v7426_v36, %v7426_v36  ;;  %v7446_v50 = vmul.f32 %v7356_v45, %v7103_v53  ;;  %v4607_v31 = vclamps-f32 %v2824_v5, 1.0 }
 0x2d0   :  { %v2878_v40 = vadd.f32 1.1283791, %v2877_v19  ;;  %v2991_v60 = vmul.f32 %v2990_v39, %v7348_v54  ;;  %v2864_v61 = vmul.f32 %v2863_v17, %v2839_v33  ;;  %v7450_v14 = vmul.f32 0.5, %v7248_v52 }
 0x2d1   :  { %v2968_v27 = vmul.f32 %v2967_v1, %v7312_v3  ;;  %v3041_v41 = vadd.f32 0.001143296, %v3040_v56  ;;  %v7454_v48 = vmul.f32 %v3715_v12, %v7140_v37  ;;  %v2893_v25 = vmul.f32 %v7393_v29, %v2892_v11 }
 0x2d2   :  { %v2954_v0 = vadd.f32 0.05243302, %v2953_v21  ;;  %v3007_v53 = vadd.f32 0.4994258, %v3006_v47  ;;  %v2916_v45 = vadd.f32 0.18741608, %v2915_v49  ;;  %v7461_v20 = vadd.f32 %v2311_v9, %v6664_v30 }
 0x2d3   :  { %v7458_v5 = vmul.f32 0.5, %v7275_v38  ;;  %v7463_v15 = vmin.f32 %v3067_v62, 16.0  ;;  %v7465_v52 = vpop.eup %4938  ;;  %v3716_v1 = vadd.f32 1.0, %v4607_v31  ;;  %v2879_v19 = vmul.f32 %v2878_v40, %v7162_v26 }
 0x2d4   :  { %v2992_v37 = vadd.f32 0.0036580483, %v2991_v60  ;;  %v3042_v39 = vmul.f32 %v3041_v41, %v7429_v2  ;;  %v4608_v22 = vclamps-f32 %v2864_v61, 1.0  ;;  %vm2896_vm12 = vweird.f32 %v7393_v29  ;;  %v2343_v61 = vpop.f32.mrf.mxu3 }
 0x2d5   :  { %v7470_v12 = vadd.f32 1.0, %v2968_v27  ;;  %v3029_v38 = vmul.f32 2.1237322e-06, %v7429_v2  ;;  %v2894_v30 = vadd.f32 %v7393_v29, %v2893_v25  ;;  %v2955_v17 = vmul.f32 %v2954_v0, %v7312_v3 }
 0x2d6   :  { %v3008_v11 = vmul.f32 %v3007_v53, %v7348_v54  ;;  %v3043_v21 = vadd.f32 0.014752088, %v3042_v39  ;;  %v2901_v47 = vand.u32 2147483648, %v7351_v6  ;;  %v2917_v26 = vmul.f32 %v2916_v45, %v7245_v63 }
 0x2d7   :  { %v2931_v33 = vmul.f32 %v7465_v52, %v7419_v46  ;;  %v3080_v49 = vmul.f32 3.8918573e-05, %v7463_v15  ;;  %vm2895_vm13 = vweird.f32 %v7351_v6  ;;  %v2899_v56 = vand.u32 2147483647, %v7351_v6 }
 0x2d8   :  { %v2993_v62 = vmul.f32 %v2992_v37, %v7348_v54  ;;  %v3044_v31 = vmul.f32 %v3043_v21, %v7429_v2  ;;  %v7486_v40 = vmul.f32 %v3716_v1, %v7199_v35  ;;  %v3717_v60 = vadd.f32 1.0, %v4608_v22  ;;  %vm7490_vm14 = vmor %vm2895_vm13, %vm2896_vm12 }
 0x2d9   :  { %4940 = vrcp.f32 %v7470_v12  ;;  %v3030_v9 = vadd.f32 0.00028619796, %v3029_v38  ;;  %v2898_v6 = vsel %vm7490_vm14, %v7393_v29, %v2894_v30  ;;  %v2956_v27 = vadd.f32 0.18741608, %v2955_v17 }
 0x2da   :  { %v7498_v41 = vadd.f32 1.0, %v3008_v11  ;;  %v3045_v35 = vadd.f32 0.112945676, %v3044_v31  ;;  %v2902_v25 = vor.u32 1.1754944e-38, %v2901_v47  ;;  %v2918_v0 = vadd.f32 1.1283791, %v2917_v26 }
 0x2db   :  { %v2932_v53 = vsub.f32 1.0, %v2931_v33  ;;  %v3081_v45 = vadd.f32 0.001143296, %v3080_v49  ;;  %vm2900_vm15 = vcmp.eq.f32.partialorder %v2899_v56, 8.507059e+37  ;;  %v2994_v1 = vadd.f32 0.05243302, %v2993_v62  ;;  %v2247_v49 = vpop.f32.mrf.mxu1 }
 0x2dc   :  { %v3046_v37 = vmul.f32 %v3045_v35, %v7429_v2  ;;  %v7502_v39 = vadd.f32 %v2343_v61, %v6897_v59  ;;  %v2903_v22 = vsel %vm2900_vm15, %v2902_v25, %v2898_v6  ;;  %v7505_v38 = vmul.f32 0.5, %v7384_v57 }
 0x2dd   :  { %v3031_v29 = vmul.f32 %v3030_v9, %v7429_v2  ;;  %v3082_v30 = vmul.f32 %v3081_v45, %v7463_v15  ;;  %v7510_v17 = vmul.f32 %v3717_v60, %v7208_v8  ;;  %v2957_v11 = vmul.f32 %v2956_v27, %v7312_v3 }
 0x2de   :  { %4942 = vrcp.f32 %v7498_v41  ;;  %v3047_v21 = vadd.f32 0.4994258, %v3046_v37  ;;  %v2919_v59 = vmul.f32 %v2918_v0, %v7224_v58  ;;  %v2933_v26 = vmul.f32 %v7465_v52, %v2932_v53 }
 0x2df   :  { %v7514_v47 = vpop.eup %4940  ;;  %v2939_v57 = vand.u32 2147483647, %v7419_v46  ;;  %v3083_v33 = vadd.f32 0.014752088, %v3082_v30  ;;  %v2904_v56 = vmul.f32 %v2903_v22, %v2879_v19  ;;  %v2995_v62 = vmul.f32 %v2994_v1, %v7348_v54 }
 0x2e0   :  { %v3048_v8 = vmul.f32 %v3047_v21, %v7429_v2  ;;  %v7522_v3 = vmul.f32 0.70710677, %v7502_v39  ;;  %v2941_v31 = vand.u32 2147483648, %v7419_v46  ;;  %v3032_v60 = vadd.f32 0.0036580483, %v3031_v29 }
 0x2e1   :  { %v3069_v63 = vmul.f32 2.1237322e-06, %v7463_v15  ;;  %v3084_v58 = vmul.f32 %v3083_v33, %v7463_v15  ;;  %vm2936_vm0 = vweird.f32 %v7465_v52  ;;  %v2958_v9 = vadd.f32 1.1283791, %v2957_v11 }
 0x2e2   :  { %v2971_v19 = vmul.f32 %v7514_v47, %v7470_v12  ;;  %v7531_v61 = vadd.f32 %v2247_v49, %v6901_v32  ;;  %v2934_v6 = vadd.f32 %v7465_v52, %v2933_v26  ;;  %v7534_v27 = vadd.f32 1.0, %v3048_v8 }
 0x2e3   :  { %v3085_v35 = vadd.f32 0.112945676, %v3084_v58  ;;  %v3107_v25 = vmul.f32 %v7522_v3, %v7522_v3  ;;  %v4609_v53 = vclamps-f32 %v2904_v56, 1.0  ;;  %vm2935_vm1 = vweird.f32 %v7419_v46 }
 0x2e4   :  { %v7538_v0 = vpop.eup %4942  ;;  %vm7541_vm2 = vcmp.eq.f32.partialorder %v2939_v57, 8.507059e+37  ;;  %v2996_v1 = vadd.f32 0.18741608, %v2995_v62  ;;  %v2942_v32 = vor.u32 1.1754944e-38, %v2941_v31  ;;  %v3033_v37 = vmul.f32 %v3032_v60, %v7429_v2  ;;  %vm7551_vm3 = vmor %vm2935_vm1, %vm2936_vm0 }
 0x2e5   :  { %v7547_v22 = vmul.f32 0.5, %v7397_v28  ;;  %v3070_v29 = vadd.f32 0.00028619796, %v3069_v63  ;;  %v2972_v11 = vsub.f32 1.0, %v2971_v19  ;;  %v3086_v46 = vmul.f32 %v3085_v35, %v7463_v15 }
 0x2e6   :  { %v7556_v21 = vmin.f32 %v3107_v25, 16.0  ;;  %v7559_v26 = vmul.f32 0.70710677, %v7531_v61  ;;  %v2938_v28 = vsel %vm7551_vm3, %v7465_v52, %v2934_v6  ;;  %v7565_v57 = vmul.f32 %v2958_v9, %v7282_v42  ;;  %v2345_v25 = vpop.f32.mrf.mxu3 }
 0x2e7   :  { %v3011_v33 = vmul.f32 %v7538_v0, %v7498_v41  ;;  %4944 = vrcp.f32 %v7534_v27  ;;  %v3718_v49 = vadd.f32 1.0, %v4609_v53  ;;  %v2981_v56 = vand.u32 2147483648, %v7470_v12 }
 0x2e8   :  { %v2997_v62 = vmul.f32 %v2996_v1, %v7348_v54  ;;  %v3087_v8 = vadd.f32 0.4994258, %v3086_v46  ;;  %vm2975_vm4 = vweird.f32 %v7470_v12  ;;  %v3034_v31 = vadd.f32 0.05243302, %v3033_v37 }
 0x2e9   :  { %v3120_v60 = vmul.f32 3.8918573e-05, %v7556_v21  ;;  %v3147_v42 = vmul.f32 %v7559_v26, %v7559_v26  ;;  %v2943_v52 = vsel %vm7541_vm2, %v2942_v32, %v2938_v28  ;;  %v2973_v63 = vmul.f32 %v7514_v47, %v2972_v11 }
 0x2ea   :  { %v2979_v58 = vand.u32 2147483647, %v7470_v12  ;;  %v3071_v9 = vmul.f32 %v3070_v29, %v7463_v15  ;;  %v3012_v19 = vsub.f32 1.0, %v3011_v33  ;;  %v3109_v54 = vmul.f32 2.1237322e-06, %v7556_v21 }
 0x2eb   :  { %v3121_v6 = vadd.f32 0.001143296, %v3120_v60  ;;  %v7582_v35 = vmin.f32 %v3147_v42, 16.0  ;;  %v7585_v53 = vmul.f32 %v3718_v49, %v7321_v10  ;;  %v2982_v1 = vor.u32 1.1754944e-38, %v2981_v56 }
 0x2ec   :  { %v2998_v37 = vadd.f32 1.1283791, %v2997_v62  ;;  %v3088_v45 = vmul.f32 %v3087_v8, %v7463_v15  ;;  %v2944_v30 = vmul.f32 %v2943_v52, %v2919_v59  ;;  %v3035_v11 = vmul.f32 %v3034_v31, %v7429_v2 }
 0x2ed   :  { %v7588_v32 = vpop.eup %4944  ;;  %v3122_v29 = vmul.f32 %v3121_v6, %v7556_v21  ;;  %v3160_v46 = vmul.f32 3.8918573e-05, %v7582_v35  ;;  %v2974_v28 = vadd.f32 %v7514_v47, %v2973_v63  ;;  %vm2976_vm5 = vweird.f32 %v7514_v47 }
 0x2ee   :  { %vm7595_vm6 = vcmp.eq.f32.partialorder %v2979_v58, 8.507059e+37  ;;  %v3072_v33 = vadd.f32 0.0036580483, %v3071_v9  ;;  %v7600_v49 = vadd.f32 %v2345_v25, %v6914_v55  ;;  %v3013_v59 = vmul.f32 %v7538_v0, %v3012_v19  ;;  %vm7611_vm7 = vmor %vm2975_vm4, %vm2976_vm5 }
 0x2ef   :  { %v3019_v56 = vand.u32 2147483647, %v7498_v41  ;;  %v3110_v62 = vadd.f32 0.00028619796, %v3109_v54  ;;  %v3123_v8 = vadd.f32 0.014752088, %v3122_v29  ;;  %v3051_v60 = vmul.f32 %v7588_v32, %v7534_v27 }
 0x2f0   :  { %v3021_v31 = vand.u32 2147483648, %v7498_v41  ;;  %v7607_v42 = vadd.f32 1.0, %v3088_v45  ;;  %v3161_v52 = vadd.f32 0.001143296, %v3160_v46  ;;  %v4610_v63 = vclamps-f32 %v2944_v30, 1.0 }
 0x2f1   :  { %vm3016_vm8 = vweird.f32 %v7538_v0  ;;  %v3036_v58 = vadd.f32 0.18741608, %v3035_v11  ;;  %v3124_v9 = vmul.f32 %v3123_v8, %v7556_v21  ;;  %v2978_v19 = vsel %vm7611_vm7, %v7514_v47, %v2974_v28 }
 0x2f2   :  { %v3073_v54 = vmul.f32 %v3072_v33, %v7463_v15  ;;  %v3162_v6 = vmul.f32 %v3161_v52, %v7582_v35  ;;  %v7623_v25 = vmul.f32 0.70710677, %v7600_v49  ;;  %v3014_v12 = vadd.f32 %v7538_v0, %v3013_v59 }
 0x2f3   :  { %v3111_v45 = vmul.f32 %v3110_v62, %v7556_v21  ;;  %v3125_v30 = vadd.f32 0.112945676, %v3124_v9  ;;  %v3773_v11 = vpack.c.bf16 %v7294_v51, %v7173_v44  ;;  %v3052_v29 = vsub.f32 1.0, %v3051_v60 }
 0x2f4   :  { %4946 = vrcp.f32 %v7607_v42  ;;  %v3163_v46 = vadd.f32 0.014752088, %v3162_v6  ;;  %v3187_v47 = vmul.f32 %v7623_v25, %v7623_v25  ;;  %v3719_v28 = vadd.f32 1.0, %v4610_v63 }
 0x2f5   :  { %v2999_v33 = vmul.f32 %v2998_v37, %v7300_v16  ;;  %vm3015_vm9 = vweird.f32 %v7498_v41  ;;  %vm7634_vm10 = vcmp.eq.f32.partialorder %v3019_v56, 8.507059e+37  ;;  %3932 = vmatmul.bf16.gmra.mxu0 %v3773_v11  ;;  %v3074_v62 = vadd.f32 0.05243302, %v3073_v54 }
 0x2f6   :  { %v3126_v44 = vmul.f32 %v3125_v30, %v7556_v21  ;;  %v3164_v51 = vmul.f32 %v3163_v46, %v7582_v35  ;;  %v7640_v8 = vmin.f32 %v3187_v47, 16.0  ;;  %v2983_v60 = vsel %vm7595_vm6, %v2982_v1, %v2978_v19  ;;  %vm7646_vm11 = vmor %vm3015_vm9, %vm3016_vm8 }
 0x2f7   :  { %v3022_v41 = vor.u32 1.1754944e-38, %v3021_v31  ;;  %v3037_v37 = vmul.f32 %v3036_v58, %v7429_v2  ;;  %v3149_v56 = vmul.f32 2.1237322e-06, %v7582_v35  ;;  %v3018_v52 = vsel %vm7646_vm11, %v7538_v0, %v3014_v12  ;;  %v2250_v2 = vpop.f32.mrf.mxu1 }
 0x2f8   :  { %v3053_v63 = vmul.f32 %v7588_v32, %v3052_v29  ;;  %v3112_v55 = vadd.f32 0.0036580483, %v3111_v45  ;;  %v3165_v10 = vadd.f32 0.112945676, %v3164_v51  ;;  %v7657_v1 = vmul.f32 %v3719_v28, %v7337_v24  ;;  %v2348_v29 = vpop.f32.mrf.mxu3 }
 0x2f9   :  { %v7660_v9 = vmul.f32 0.5, %v7502_v39  ;;  %v3127_v19 = vadd.f32 0.4994258, %v3126_v44  ;;  %v7663_v31 = vmul.f32 0.5, %v7531_v61  ;;  %v2984_v54 = vmul.f32 %v2983_v60, %v7565_v57 }
 0x2fa   :  { %v7665_v58 = vpop.eup %4946  ;;  %v3075_v0 = vmul.f32 %v3074_v62, %v7463_v15  ;;  %v3166_v6 = vmul.f32 %v3165_v10, %v7582_v35  ;;  %v3200_v12 = vmul.f32 3.8918573e-05, %v7640_v8  ;;  %v3023_v24 = vsel %vm7634_vm10, %v3022_v41, %v3018_v52 }
 0x2fb   :  { %v3038_v39 = vadd.f32 1.1283791, %v3037_v37  ;;  %v3061_v45 = vand.u32 2147483648, %v7534_v27  ;;  %v3150_v30 = vadd.f32 0.00028619796, %v3149_v56  ;;  %v3054_v61 = vadd.f32 %v7588_v32, %v3053_v63 }
 0x2fc   :  { %vm3056_vm12 = vweird.f32 %v7588_v32  ;;  %v3113_v11 = vmul.f32 %v3112_v55, %v7556_v21  ;;  %v7678_v57 = vadd.f32 %v2250_v2, %v6921_v34  ;;  %v3091_v46 = vmul.f32 %v7665_v58, %v7607_v42 }
 0x2fd   :  { %v3128_v47 = vmul.f32 %v3127_v19, %v7556_v21  ;;  %v3167_v28 = vadd.f32 0.4994258, %v3166_v6  ;;  %v3201_v59 = vadd.f32 0.001143296, %v3200_v12  ;;  %v4611_v62 = vclamps-f32 %v2984_v54, 1.0 }
 0x2fe   :  { %vm3055_vm13 = vweird.f32 %v7534_v27  ;;  %v3059_v44 = vand.u32 2147483647, %v7534_v27  ;;  %v3076_v51 = vadd.f32 0.18741608, %v3075_v0  ;;  %v3024_v60 = vmul.f32 %v3023_v24, %v2999_v33 }
 0x2ff   :  { %vm7685_vm14 = vmor %vm3055_vm13, %vm3056_vm12  ;;  %v3151_v34 = vmul.f32 %v3150_v30, %v7582_v35  ;;  %v3189_v41 = vmul.f32 2.1237322e-06, %v7640_v8  ;;  %v7692_v37 = vadd.f32 %v2348_v29, %v6944_v23  ;;  %v3114_v52 = vadd.f32 0.05243302, %v3113_v11 }
 0x300   :  { %v3058_v56 = vsel %vm7685_vm14, %v7588_v32, %v3054_v61  ;;  %v3202_v27 = vmul.f32 %v3201_v59, %v7640_v8  ;;  %v7699_v33 = vmul.f32 0.70710677, %v7678_v57  ;;  %v3062_v63 = vor.u32 1.1754944e-38, %v3061_v45 }
 0x301   :  { %v3092_v55 = vsub.f32 1.0, %v3091_v46  ;;  %v7701_v10 = vadd.f32 1.0, %v3128_v47  ;;  %v3168_v19 = vmul.f32 %v3167_v28, %v7582_v35  ;;  %vm3060_vm15 = vcmp.eq.f32.partialorder %v3059_v44, 8.507059e+37 }
 0x302   :  { %v3077_v23 = vmul.f32 %v3076_v51, %v7463_v15  ;;  %v3203_v2 = vadd.f32 0.014752088, %v3202_v27  ;;  %v3227_v54 = vmul.f32 %v7699_v33, %v7699_v33  ;;  %v3063_v32 = vsel %vm3060_vm15, %v3062_v63, %v3058_v56 }
 0x303   :  { %v3152_v0 = vadd.f32 0.0036580483, %v3151_v34  ;;  %v3190_v6 = vadd.f32 0.00028619796, %v3189_v41  ;;  %v7708_v12 = vmul.f32 0.70710677, %v7692_v37  ;;  %v3039_v45 = vmul.f32 %v3038_v39, %v7407_v18 }
 0x304   :  { %v4612_v24 = vclamps-f32 %v3024_v60, 1.0  ;;  %v3115_v30 = vmul.f32 %v3114_v52, %v7556_v21  ;;  %v3204_v61 = vmul.f32 %v3203_v2, %v7640_v8  ;;  %v3093_v11 = vmul.f32 %v7665_v58, %v3092_v55 }
 0x305   :  { %4948 = vrcp.f32 %v7701_v10  ;;  %v7715_v15 = vadd.f32 1.0, %v3168_v19  ;;  %v7717_v29 = vmin.f32 %v3227_v54, 16.0  ;;  %v3720_v46 = vadd.f32 1.0, %v4611_v62 }
 0x306   :  { %v3064_v47 = vmul.f32 %v3063_v32, %v3039_v45  ;;  %v3078_v28 = vadd.f32 1.1283791, %v3077_v23  ;;  %v3205_v59 = vadd.f32 0.112945676, %v3204_v61  ;;  %v3153_v44 = vmul.f32 %v3152_v0, %v7582_v35  ;;  %v2350_v0 = vpop.f32.mrf.mxu3 }
 0x307   :  { %v3191_v18 = vmul.f32 %v3190_v6, %v7640_v8  ;;  %v3240_v39 = vmul.f32 3.8918573e-05, %v7717_v29  ;;  %v3267_v51 = vmul.f32 %v7708_v12, %v7708_v12  ;;  %v3721_v60 = vadd.f32 1.0, %v4612_v24 }
 0x308   :  { %vm3096_vm0 = vweird.f32 %v7665_v58  ;;  %v3206_v16 = vmul.f32 %v3205_v59, %v7640_v8  ;;  %v3774_v62 = vpack.c.bf16 %v7446_v50, %v7216_v4  ;;  %v3094_v34 = vadd.f32 %v7665_v58, %v3093_v11  ;;  %v2252_v11 = vpop.f32.mrf.mxu1 }
 0x309   :  { %v3116_v41 = vadd.f32 0.18741608, %v3115_v30  ;;  %4950 = vrcp.f32 %v7715_v15  ;;  %v3241_v56 = vadd.f32 0.001143296, %v3240_v39  ;;  %v4613_v52 = vclamps-f32 %v3064_v47, 1.0 }
 0x30a   :  { %vm3095_vm1 = vweird.f32 %v7607_v42  ;;  %v3101_v27 = vand.u32 2147483648, %v7607_v42  ;;  %v7732_v63 = vmin.f32 %v3267_v51, 16.0  ;;  %3981 = vmatmul.bf16.gmra.mxu1 %v3774_v62  ;;  %v3099_v19 = vand.u32 2147483647, %v7607_v42 }
 0x30b   :  { %v7734_v55 = vpop.eup %4948  ;;  %v3154_v23 = vadd.f32 0.05243302, %v3153_v44  ;;  %v3192_v4 = vadd.f32 0.0036580483, %v3191_v18  ;;  %v3242_v50 = vmul.f32 %v3241_v56, %v7717_v29  ;;  %v7739_v2 = vmul.f32 %v3720_v46, %v7450_v14  ;;  %vm7747_vm2 = vmor %vm3095_vm1, %vm3096_vm0 }
 0x30c   :  { %v7742_v54 = vmul.f32 %v3721_v60, %v7458_v5  ;;  %v3079_v32 = vmul.f32 %v3078_v28, %v7426_v36  ;;  %v3207_v6 = vadd.f32 0.4994258, %v3206_v16  ;;  %v3098_v42 = vsel %vm7747_vm2, %v7665_v58, %v3094_v34  ;;  %v8699_v16 = vld [vmem:[#allocation30_spill] sm:$0xff] }
 0x30d   :  { %v3117_v24 = vmul.f32 %v3116_v41, %v7556_v21  ;;  %v3229_v14 = vmul.f32 2.1237322e-06, %v7717_v29  ;;  %v3243_v45 = vadd.f32 0.014752088, %v3242_v50  ;;  %v3722_v5 = vadd.f32 1.0, %v4613_v52 }
 0x30e   :  { %v3102_v30 = vor.u32 1.1754944e-38, %v3101_v27  ;;  %v3131_v36 = vmul.f32 %v7734_v55, %v7701_v10  ;;  %v3280_v61 = vmul.f32 3.8918573e-05, %v7732_v63  ;;  %vm3100_vm3 = vcmp.eq.f32.partialorder %v3099_v19, 8.507059e+37 }
 0x30f   :  { %v7759_v46 = vpop.eup %4950  ;;  %v3155_v47 = vmul.f32 %v3154_v23, %v7582_v35  ;;  %v3193_v58 = vmul.f32 %v3192_v4, %v7640_v8  ;;  %v3244_v21 = vmul.f32 %v3243_v45, %v7717_v29  ;;  %v7765_v59 = vmul.f32 0.5, %v7600_v49 }
 0x310   :  { %v3103_v28 = vsel %vm3100_vm3, %v3102_v30, %v3098_v42  ;;  %v3208_v44 = vmul.f32 %v3207_v6, %v7640_v8  ;;  %v7769_v18 = vmul.f32 0.5, %v7678_v57  ;;  %v3118_v39 = vadd.f32 1.1283791, %v3117_v24 }
 0x311   :  { %v3230_v51 = vadd.f32 0.00028619796, %v3229_v14  ;;  %v3245_v60 = vadd.f32 0.112945676, %v3244_v21  ;;  %v7772_v62 = vadd.f32 %v2252_v11, %v8699_v16  ;;  %v7775_v34 = vmul.f32 %v3722_v5, %v7505_v38 }
 0x312   :  { %v3132_v41 = vsub.f32 1.0, %v3131_v36  ;;  %v3171_v56 = vmul.f32 %v7759_v46, %v7715_v15  ;;  %v3281_v49 = vadd.f32 0.001143296, %v3280_v61  ;;  %v3104_v52 = vmul.f32 %v3103_v28, %v3079_v32 }
 0x313   :  { %v3156_v27 = vadd.f32 0.18741608, %v3155_v47  ;;  %v3194_v19 = vadd.f32 0.05243302, %v3193_v58  ;;  %v7780_v57 = vmul.f32 0.5, %v7692_v37  ;;  %v7782_v23 = vadd.f32 1.0, %v3208_v44 }
 0x314   :  { %v3246_v4 = vmul.f32 %v3245_v60, %v7717_v29  ;;  %v3269_v50 = vmul.f32 2.1237322e-06, %v7732_v63  ;;  %v3282_v38 = vmul.f32 %v3281_v49, %v7732_v63  ;;  %v7788_v6 = vmul.f32 %v3118_v39, %v7522_v3 }
 0x315   :  { %v3139_v42 = vand.u32 2147483647, %v7701_v10  ;;  %v3231_v32 = vmul.f32 %v3230_v51, %v7717_v29  ;;  %v7793_v24 = vmul.f32 0.70710677, %v7772_v62  ;;  %v3133_v37 = vmul.f32 %v7734_v55, %v3132_v41 }
 0x316   :  { %v3141_v14 = vand.u32 2147483648, %v7701_v10  ;;  %v3172_v45 = vsub.f32 1.0, %v3171_v56  ;;  %v3247_v5 = vadd.f32 0.4994258, %v3246_v4  ;;  %v3157_v30 = vmul.f32 %v3156_v27, %v7582_v35 }
 0x317   :  { %v3195_v36 = vmul.f32 %v3194_v19, %v7640_v8  ;;  %v3283_v61 = vadd.f32 0.014752088, %v3282_v38  ;;  %v7800_v3 = vadd.f32 %v2350_v0, %v7019_v13  ;;  %v4614_v11 = vclamps-f32 %v3104_v52, 1.0 }
 0x318   :  { %4952 = vrcp.f32 %v7782_v23  ;;  %v3270_v47 = vadd.f32 0.00028619796, %v3269_v50  ;;  %v3307_v58 = vmul.f32 %v7793_v24, %v7793_v24  ;;  %vm7805_vm4 = vcmp.eq.f32.partialorder %v3139_v42, 8.507059e+37 }
 0x319   :  { %v3232_v28 = vadd.f32 0.0036580483, %v3231_v32  ;;  %v3248_v35 = vmul.f32 %v3247_v5, %v7717_v29  ;;  %v3284_v44 = vmul.f32 %v3283_v61, %v7732_v63  ;;  %v3134_v39 = vadd.f32 %v7734_v55, %v3133_v37 }
 0x31a   :  { %vm3136_vm5 = vweird.f32 %v7734_v55  ;;  %v3173_v13 = vmul.f32 %v7759_v46, %v3172_v45  ;;  %v7814_v51 = vmin.f32 %v3307_v58, 16.0  ;;  %vm3135_vm6 = vweird.f32 %v7701_v10 }
 0x31b   :  { %v3196_v60 = vadd.f32 0.18741608, %v3195_v36  ;;  %v3285_v16 = vadd.f32 0.112945676, %v3284_v44  ;;  %v7818_v41 = vmul.f32 0.70710677, %v7800_v3  ;;  %v3271_v27 = vmul.f32 %v3270_v47, %v7732_v63  ;;  %vm7821_vm7 = vmor %vm3135_vm6, %vm3136_vm5  ;;  %v2255_v44 = vpop.f32.mrf.mxu1 }
 0x31c   :  { %v3723_v56 = vadd.f32 1.0, %v4614_v11  ;;  %v3142_v49 = vor.u32 1.1754944e-38, %v3141_v14  ;;  %v3158_v52 = vadd.f32 1.1283791, %v3157_v30  ;;  %vm3176_vm8 = vweird.f32 %v7759_v46 }
 0x31d   :  { %v3233_v4 = vmul.f32 %v3232_v28, %v7717_v29  ;;  %v7827_v50 = vadd.f32 1.0, %v3248_v35  ;;  %v3286_v10 = vmul.f32 %v3285_v16, %v7732_v63  ;;  %v3138_v0 = vsel %vm7821_vm7, %v7734_v55, %v3134_v39 }
 0x31e   :  { %v7830_v38 = vpop.eup %4952  ;;  %v3174_v42 = vadd.f32 %v7759_v46, %v3173_v13  ;;  %v3320_v32 = vmul.f32 3.8918573e-05, %v7814_v51  ;;  %v3347_v37 = vmul.f32 %v7818_v41, %v7818_v41  ;;  %v3179_v14 = vand.u32 2147483647, %v7715_v15 }
 0x31f   :  { %v3181_v45 = vand.u32 2147483648, %v7715_v15  ;;  %v3197_v5 = vmul.f32 %v3196_v60, %v7640_v8  ;;  %v3287_v30 = vadd.f32 0.4994258, %v3286_v10  ;;  %vm3175_vm9 = vweird.f32 %v7715_v15 }
 0x320   :  { %v3272_v36 = vadd.f32 0.0036580483, %v3271_v27  ;;  %v3321_v61 = vadd.f32 0.001143296, %v3320_v32  ;;  %v7843_v11 = vmin.f32 %v3347_v37, 16.0  ;;  %v3143_v55 = vsel %vm7805_vm4, %v3142_v49, %v3138_v0  ;;  %vm7849_vm10 = vmor %vm3175_vm9, %vm3176_vm8  ;;  %v8706_v0 = vld [vmem:[#allocation16_spill] sm:$0xff] }
 0x321   :  { %v3211_v58 = vmul.f32 %v7830_v38, %v7782_v23  ;;  %v3234_v8 = vadd.f32 0.05243302, %v3233_v4  ;;  %4954 = vrcp.f32 %v7827_v50  ;;  %v3178_v15 = vsel %vm7849_vm10, %v7759_v46, %v3174_v42 }
 0x322   :  { %v3288_v28 = vmul.f32 %v3287_v30, %v7732_v63  ;;  %v3309_v21 = vmul.f32 2.1237322e-06, %v7814_v51  ;;  %v3322_v35 = vmul.f32 %v3321_v61, %v7814_v51  ;;  %vm3180_vm11 = vcmp.eq.f32.partialorder %v3179_v14, 8.507059e+37 }
 0x323   :  { %v3182_v39 = vor.u32 1.1754944e-38, %v3181_v45  ;;  %v3198_v13 = vadd.f32 1.1283791, %v3197_v5  ;;  %v3360_v60 = vmul.f32 3.8918573e-05, %v7843_v11  ;;  %v3144_v16 = vmul.f32 %v3143_v55, %v7788_v6 }
 0x324   :  { %v3273_v49 = vmul.f32 %v3272_v36, %v7732_v63  ;;  %v3323_v27 = vadd.f32 0.014752088, %v3322_v35  ;;  %v3775_v46 = vpack.c.bf16 %v7510_v17, %v7454_v48  ;;  %v3212_v4 = vsub.f32 1.0, %v3211_v58 }
 0x325   :  { %v3183_v19 = vsel %vm3180_vm11, %v3182_v39, %v3178_v15  ;;  %v3235_v10 = vmul.f32 %v3234_v8, %v7717_v29  ;;  %v7869_v42 = vadd.f32 %v2255_v44, %v8706_v0  ;;  %v3159_v32 = vmul.f32 %v3158_v52, %v7559_v26 }
 0x326   :  { %v7872_v37 = vadd.f32 1.0, %v3288_v28  ;;  %v3310_v14 = vadd.f32 0.00028619796, %v3309_v21  ;;  %v3324_v6 = vmul.f32 %v3323_v27, %v7814_v51  ;;  %3937 = vmatmul.bf16.gmra.mxu0 %v3775_v46  ;;  %v7878_v5 = vmul.f32 %v3723_v56, %v7547_v22 }
 0x327   :  { %v7875_v45 = vpop.eup %4954  ;;  %v7881_v48 = vmul.f32 %v3198_v13, %v7623_v25  ;;  %v3219_v17 = vand.u32 2147483647, %v7782_v23  ;;  %v3361_v30 = vadd.f32 0.001143296, %v3360_v60  ;;  %v4615_v36 = vclamps-f32 %v3144_v16, 1.0 }
 0x328   :  { %v3184_v61 = vmul.f32 %v3183_v19, %v3159_v32  ;;  %v3274_v26 = vadd.f32 0.05243302, %v3273_v49  ;;  %v3325_v52 = vadd.f32 0.112945676, %v3324_v6  ;;  %v3213_v55 = vmul.f32 %v7830_v38, %v3212_v4 }
 0x329   :  { %v3236_v47 = vadd.f32 0.18741608, %v3235_v10  ;;  %v3362_v58 = vmul.f32 %v3361_v30, %v7843_v11  ;;  %v7887_v8 = vmul.f32 0.70710677, %v7869_v42  ;;  %v3251_v22 = vmul.f32 %v7875_v45, %v7827_v50 }
 0x32a   :  { %4956 = vrcp.f32 %v7872_v37  ;;  %v3311_v25 = vmul.f32 %v3310_v14, %v7814_v51  ;;  %v3776_v56 = vpack.c.bf16 %v7585_v53, %v7486_v40  ;;  %v3221_v15 = vand.u32 2147483648, %v7782_v23 }
 0x32b   :  { %v3326_v28 = vmul.f32 %v3325_v52, %v7814_v51  ;;  %v3363_v21 = vadd.f32 0.014752088, %v3362_v58  ;;  %v3387_v35 = vmul.f32 %v7887_v8, %v7887_v8  ;;  %v3724_v44 = vadd.f32 1.0, %v4615_v36  ;;  %v2353_v36 = vpop.f32.mrf.mxu3 }
 0x32c   :  { %v4616_v39 = vclamps-f32 %v3184_v61, 1.0  ;;  %vm3215_vm12 = vweird.f32 %v7782_v23  ;;  %v3275_v13 = vmul.f32 %v3274_v26, %v7732_v63  ;;  %3986 = vmatmul.bf16.gmra.mxu1 %v3776_v56  ;;  %vm3216_vm13 = vweird.f32 %v7830_v38 }
 0x32d   :  { %v3237_v60 = vmul.f32 %v3236_v47, %v7717_v29  ;;  %v3349_v40 = vmul.f32 2.1237322e-06, %v7843_v11  ;;  %v3364_v53 = vmul.f32 %v3363_v21, %v7843_v11  ;;  %v3214_v16 = vadd.f32 %v7830_v38, %v3213_v55  ;;  %vm7922_vm15 = vmor %vm3215_vm12, %vm3216_vm13 }
 0x32e   :  { %v3252_v49 = vsub.f32 1.0, %v3251_v22  ;;  %v3312_v27 = vadd.f32 0.0036580483, %v3311_v25  ;;  %v7906_v46 = vmin.f32 %v3387_v35, 16.0  ;;  %vm7908_vm14 = vcmp.eq.f32.partialorder %v3219_v17, 8.507059e+37 }
 0x32f   :  { %v3222_v4 = vor.u32 1.1754944e-38, %v3221_v15  ;;  %v3327_v10 = vadd.f32 0.4994258, %v3326_v28  ;;  %v3365_v0 = vadd.f32 0.112945676, %v3364_v53  ;;  %v7915_v29 = vmul.f32 %v3724_v44, %v7660_v9 }
 0x330   :  { %v7912_v32 = vpop.eup %4956  ;;  %v3725_v14 = vadd.f32 1.0, %v4616_v39  ;;  %v3276_v6 = vadd.f32 0.18741608, %v3275_v13  ;;  %v3400_v30 = vmul.f32 3.8918573e-05, %v7906_v46  ;;  %v7927_v26 = vmul.f32 0.5, %v7772_v62 }
 0x331   :  { %v3238_v61 = vadd.f32 1.1283791, %v3237_v60  ;;  %v3350_v52 = vadd.f32 0.00028619796, %v3349_v40  ;;  %v3366_v9 = vmul.f32 %v3365_v0, %v7843_v11  ;;  %v3218_v55 = vsel %vm7922_vm15, %v7830_v38, %v3214_v16  ;;  %v2257_v60 = vpop.f32.mrf.mxu1 }
 0x332   :  { %v3253_v47 = vmul.f32 %v7875_v45, %v3252_v49  ;;  %v3313_v58 = vmul.f32 %v3312_v27, %v7814_v51  ;;  %v3401_v23 = vadd.f32 0.001143296, %v3400_v30  ;;  %v3291_v22 = vmul.f32 %v7912_v32, %v7872_v37 }
 0x333   :  { %v3328_v25 = vmul.f32 %v3327_v10, %v7814_v51  ;;  %v7939_v62 = vmul.f32 0.5, %v7800_v3  ;;  %v7942_v56 = vadd.f32 %v2353_v36, %v7153_v43  ;;  %v7945_v15 = vmul.f32 %v3725_v14, %v7663_v31 }
 0x334   :  { %v3259_v38 = vand.u32 2147483647, %v7827_v50  ;;  %v3277_v28 = vmul.f32 %v3276_v6, %v7732_v63  ;;  %v3367_v21 = vadd.f32 0.4994258, %v3366_v9  ;;  %v3223_v35 = vsel %vm7908_vm14, %v3222_v4, %v3218_v55  ;;  %v8713_v6 = vld [vmem:[#allocation18_spill] sm:$0xff] }
 0x335   :  { %v3261_v44 = vand.u32 2147483648, %v7827_v50  ;;  %v3351_v39 = vmul.f32 %v3350_v52, %v7843_v11  ;;  %v3402_v3 = vmul.f32 %v3401_v23, %v7906_v46  ;;  %v3254_v43 = vadd.f32 %v7875_v45, %v3253_v47 }
 0x336   :  { %vm3256_vm0 = vweird.f32 %v7875_v45  ;;  %v3314_v31 = vadd.f32 0.05243302, %v3313_v58  ;;  %v3389_v13 = vmul.f32 2.1237322e-06, %v7906_v46  ;;  %v3292_v40 = vsub.f32 1.0, %v3291_v22 }
 0x337   :  { %v7957_v63 = vadd.f32 1.0, %v3328_v25  ;;  %v3403_v53 = vadd.f32 0.014752088, %v3402_v3  ;;  %v7960_v16 = vmul.f32 0.70710677, %v7942_v56  ;;  %v3224_v49 = vmul.f32 %v3223_v35, %v7881_v48 }
 0x338   :  { %vm3255_vm1 = vweird.f32 %v7827_v50  ;;  %v3278_v27 = vadd.f32 1.1283791, %v3277_v28  ;;  %v3368_v19 = vmul.f32 %v3367_v21, %v7843_v11  ;;  %v3352_v10 = vadd.f32 0.0036580483, %v3351_v39 }
 0x339   :  { %vm7965_vm2 = vmor %vm3255_vm1, %vm3256_vm0  ;;  %v3404_v0 = vmul.f32 %v3403_v53, %v7906_v46  ;;  %v3427_v14 = vmul.f32 %v7960_v16, %v7960_v16  ;;  %v7973_v30 = vadd.f32 %v2257_v60, %v8713_v6  ;;  %v3239_v48 = vmul.f32 %v3238_v61, %v7699_v33  ;;  %v8716_v6 = vld [vmem:[#allocation20_spill] sm:$0xff] }
 0x33a   :  { %v3258_v50 = vsel %vm7965_vm2, %v7875_v45, %v3254_v43  ;;  %vm3260_vm3 = vcmp.eq.f32.partialorder %v3259_v38, 8.507059e+37  ;;  %v3315_v36 = vmul.f32 %v3314_v31, %v7814_v51  ;;  %v3262_v17 = vor.u32 1.1754944e-38, %v3261_v44  ;;  %v2355_v31 = vpop.f32.mrf.mxu3 }
 0x33b   :  { %v3293_v52 = vmul.f32 %v7912_v32, %v3292_v40  ;;  %4958 = vrcp.f32 %v7957_v63  ;;  %v3390_v9 = vadd.f32 0.00028619796, %v3389_v13  ;;  %v3279_v55 = vmul.f32 %v3278_v27, %v7708_v12 }
 0x33c   :  { %v7983_v47 = vadd.f32 1.0, %v3368_v19  ;;  %v3405_v58 = vadd.f32 0.112945676, %v3404_v0  ;;  %v7985_v23 = vmin.f32 %v3427_v14, 16.0  ;;  %v4617_v33 = vclamps-f32 %v3224_v49, 1.0 }
 0x33d   :  { %v3263_v61 = vsel %vm3260_vm3, %v3262_v17, %v3258_v50  ;;  %v3353_v45 = vmul.f32 %v3352_v10, %v7843_v11  ;;  %v7989_v22 = vmul.f32 0.70710677, %v7973_v30  ;;  %v3299_v25 = vand.u32 2147483647, %v7872_v37 }
 0x33e   :  { %v3316_v38 = vadd.f32 0.18741608, %v3315_v36  ;;  %v3406_v28 = vmul.f32 %v3405_v58, %v7906_v46  ;;  %v3440_v21 = vmul.f32 3.8918573e-05, %v7985_v23  ;;  %v3294_v12 = vadd.f32 %v7912_v32, %v3293_v52 }
 0x33f   :  { %vm3296_vm4 = vweird.f32 %v7912_v32  ;;  %v3391_v35 = vmul.f32 %v3390_v9, %v7906_v46  ;;  %v3467_v44 = vmul.f32 %v7989_v22, %v7989_v22  ;;  %v3264_v39 = vmul.f32 %v3263_v61, %v3239_v48 }
 0x340   :  { %v3301_v3 = vand.u32 2147483648, %v7872_v37  ;;  %4960 = vrcp.f32 %v7983_v47  ;;  %v3441_v43 = vadd.f32 0.001143296, %v3440_v21  ;;  %vm3295_vm5 = vweird.f32 %v7872_v37 }
 0x341   :  { %v8001_v13 = vpop.eup %4958  ;;  %v3354_v60 = vadd.f32 0.05243302, %v3353_v45  ;;  %v3429_v40 = vmul.f32 2.1237322e-06, %v7985_v23  ;;  %v8005_v53 = vmin.f32 %v3467_v44, 16.0  ;;  %v3726_v49 = vadd.f32 1.0, %v4617_v33  ;;  %vm8007_vm6 = vmor %vm3295_vm5, %vm3296_vm4 }
 0x342   :  { %v3317_v19 = vmul.f32 %v3316_v38, %v7814_v51  ;;  %v3407_v4 = vadd.f32 0.4994258, %v3406_v28  ;;  %v3442_v10 = vmul.f32 %v3441_v43, %v7985_v23  ;;  %v3298_v0 = vsel %vm8007_vm6, %v7912_v32, %v3294_v12 }
 0x343   :  { %v8017_v37 = vmul.f32 0.5, %v7869_v42  ;;  %v3392_v14 = vadd.f32 0.0036580483, %v3391_v35  ;;  %v8020_v48 = vadd.f32 %v2355_v31, %v8716_v6  ;;  %v4618_v50 = vclamps-f32 %v3264_v39, 1.0 }
 0x344   :  { %v3302_v36 = vor.u32 1.1754944e-38, %v3301_v3  ;;  %v3331_v17 = vmul.f32 %v8001_v13, %v7957_v63  ;;  %v3443_v51 = vadd.f32 0.014752088, %v3442_v10  ;;  %vm3300_vm7 = vcmp.eq.f32.partialorder %v3299_v25, 8.507059e+37 }
 0x345   :  { %v3355_v52 = vmul.f32 %v3354_v60, %v7843_v11  ;;  %v3430_v9 = vadd.f32 0.00028619796, %v3429_v40  ;;  %v3480_v58 = vmul.f32 3.8918573e-05, %v8005_v53  ;;  %v8029_v42 = vmul.f32 %v3726_v49, %v7765_v59 }
 0x346   :  { %v8026_v32 = vpop.eup %4960  ;;  %v3303_v33 = vsel %vm3300_vm7, %v3302_v36, %v3298_v0  ;;  %v3318_v61 = vadd.f32 1.1283791, %v3317_v19  ;;  %v3408_v45 = vmul.f32 %v3407_v4, %v7906_v46  ;;  %v3393_v38 = vmul.f32 %v3392_v14, %v7906_v46 }
 0x347   :  { %v3444_v28 = vmul.f32 %v3443_v51, %v7985_v23  ;;  %v3469_v25 = vmul.f32 2.1237322e-06, %v8005_v53  ;;  %v8036_v21 = vmul.f32 0.70710677, %v8020_v48  ;;  %v3727_v12 = vadd.f32 1.0, %v4618_v50  ;;  %v2260_v51 = vpop.f32.mrf.mxu1 }
 0x348   :  { %v3332_v35 = vsub.f32 1.0, %v3331_v17  ;;  %v8039_v44 = vmul.f32 0.5, %v7942_v56  ;;  %v3481_v59 = vadd.f32 0.001143296, %v3480_v58  ;;  %v3356_v39 = vadd.f32 0.18741608, %v3355_v52 }
 0x349   :  { %v3371_v3 = vmul.f32 %v8026_v32, %v7983_v47  ;;  %v3431_v43 = vmul.f32 %v3430_v9, %v7985_v23  ;;  %v3445_v31 = vadd.f32 0.112945676, %v3444_v28  ;;  %v3304_v60 = vmul.f32 %v3303_v33, %v3279_v55 }
 0x34a   :  { %v8045_v40 = vmul.f32 %v3318_v61, %v7793_v24  ;;  %v8047_v49 = vadd.f32 1.0, %v3408_v45  ;;  %v3482_v27 = vmul.f32 %v3481_v59, %v8005_v53  ;;  %v3339_v19 = vand.u32 2147483647, %v7957_v63  ;;  %v8719_v45 = vld [vmem:[#allocation23_spill] sm:$0xff] }
 0x34b   :  { %v3394_v56 = vadd.f32 0.05243302, %v3393_v38  ;;  %v3470_v4 = vadd.f32 0.00028619796, %v3469_v25  ;;  %v3507_v10 = vmul.f32 %v8036_v21, %v8036_v21  ;;  %v3333_v0 = vmul.f32 %v8001_v13, %v3332_v35 }
 0x34c   :  { %v3341_v14 = vand.u32 2147483648, %v7957_v63  ;;  %v3483_v6 = vadd.f32 0.014752088, %v3482_v27  ;;  %v3777_v24 = vpack.c.bf16 %v7742_v54, %v7657_v1  ;;  %v3357_v55 = vmul.f32 %v3356_v39, %v7843_v11 }
 0x34d   :  { %v3372_v50 = vsub.f32 1.0, %v3371_v3  ;;  %v3432_v36 = vadd.f32 0.0036580483, %v3431_v43  ;;  %v3446_v17 = vmul.f32 %v3445_v31, %v7985_v23  ;;  %v4619_v52 = vclamps-f32 %v3304_v60, 1.0 }
 0x34e   :  { %4962 = vrcp.f32 %v8047_v49  ;;  %v3484_v9 = vmul.f32 %v3483_v6, %v8005_v53  ;;  %v8061_v58 = vmin.f32 %v3507_v10, 16.0  ;;  %3942 = vmatmul.bf16.gmra.mxu0 %v3777_v24  ;;  %vm3335_vm8 = vweird.f32 %v7957_v63  ;;  %v2358_v24 = vpop.f32.mrf.mxu3 }
 0x34f   :  { %vm8064_vm9 = vcmp.eq.f32.partialorder %v3339_v19, 8.507059e+37  ;;  %v3395_v1 = vmul.f32 %v3394_v56, %v7906_v46  ;;  %v3471_v54 = vmul.f32 %v3470_v4, %v8005_v53  ;;  %v3334_v11 = vadd.f32 %v8001_v13, %v3333_v0 }
 0x350   :  { %vm3336_vm10 = vweird.f32 %v8001_v13  ;;  %v3485_v61 = vadd.f32 0.112945676, %v3484_v9  ;;  %v8073_v38 = vadd.f32 %v2260_v51, %v8719_v45  ;;  %v3373_v28 = vmul.f32 %v8026_v32, %v3372_v50 }
 0x351   :  { %v3433_v25 = vmul.f32 %v3432_v36, %v7985_v23  ;;  %v3447_v35 = vadd.f32 0.4994258, %v3446_v17  ;;  %v3520_v59 = vmul.f32 3.8918573e-05, %v8061_v58  ;;  %v3728_v39 = vadd.f32 1.0, %v4619_v52  ;;  %vm8084_vm11 = vmor %vm3335_vm8, %vm3336_vm10 }
 0x352   :  { %v3342_v3 = vor.u32 1.1754944e-38, %v3341_v14  ;;  %v3358_v43 = vadd.f32 1.1283791, %v3357_v55  ;;  %v3486_v31 = vmul.f32 %v3485_v61, %v8005_v53  ;;  %v8080_v60 = vmul.f32 %v3727_v12, %v7769_v18 }
 0x353   :  { %v3396_v19 = vadd.f32 0.18741608, %v3395_v1  ;;  %v3472_v56 = vadd.f32 0.0036580483, %v3471_v54  ;;  %v3521_v4 = vadd.f32 0.001143296, %v3520_v59  ;;  %v3338_v0 = vsel %vm8084_vm11, %v8001_v13, %v3334_v11 }
 0x354   :  { %v8088_v10 = vpop.eup %4962  ;;  %vm3375_vm12 = vweird.f32 %v7983_v47  ;;  %vm3376_vm13 = vweird.f32 %v8026_v32  ;;  %v8096_v18 = vmul.f32 0.70710677, %v8073_v38  ;;  %v3374_v63 = vadd.f32 %v8026_v32, %v3373_v28  ;;  %v8724_v11 = vld [vmem:[#allocation26_spill] sm:$0xff] }
 0x355   :  { %v3434_v12 = vadd.f32 0.05243302, %v3433_v25  ;;  %v3448_v14 = vmul.f32 %v3447_v35, %v7985_v23  ;;  %v3509_v6 = vmul.f32 2.1237322e-06, %v8061_v58  ;;  %v3379_v55 = vand.u32 2147483647, %v7983_v47  ;;  %vm8114_vm14 = vmor %vm3375_vm12, %vm3376_vm13 }
 0x356   :  { %v3381_v50 = vand.u32 2147483648, %v7983_v47  ;;  %v3487_v13 = vadd.f32 0.4994258, %v3486_v31  ;;  %v3522_v36 = vmul.f32 %v3521_v4, %v8061_v58  ;;  %v3343_v17 = vsel %vm8064_vm9, %v3342_v3, %v3338_v0 }
 0x357   :  { %v3397_v51 = vmul.f32 %v3396_v19, %v7906_v46  ;;  %v3411_v52 = vmul.f32 %v8088_v10, %v8047_v49  ;;  %v3473_v9 = vmul.f32 %v3472_v56, %v8005_v53  ;;  %v3547_v33 = vmul.f32 %v8096_v18, %v8096_v18 }
 0x358   :  { %v3523_v54 = vadd.f32 0.014752088, %v3522_v36  ;;  %v8121_v61 = vadd.f32 %v2358_v24, %v8724_v11  ;;  %v3778_v46 = vpack.c.bf16 %v7775_v34, %v7739_v2  ;;  %v3378_v45 = vsel %vm8114_vm14, %v8026_v32, %v3374_v63 }
 0x359   :  { %v3435_v47 = vmul.f32 %v3434_v12, %v7985_v23  ;;  %v8129_v28 = vadd.f32 1.0, %v3448_v14  ;;  %v3510_v25 = vadd.f32 0.00028619796, %v3509_v6  ;;  %v3382_v35 = vor.u32 1.1754944e-38, %v3381_v50 }
 0x35a   :  { %v3488_v59 = vmul.f32 %v3487_v13, %v8005_v53  ;;  %v3524_v3 = vmul.f32 %v3523_v54, %v8061_v58  ;;  %v8133_v31 = vmin.f32 %v3547_v33, 16.0  ;;  %3991 = vmatmul.bf16.gmra.mxu1 %v3778_v46  ;;  %v3344_v27 = vmul.f32 %v3343_v17, %v8045_v40 }
 0x35b   :  { %v3359_v2 = vmul.f32 %v3358_v43, %v7818_v41  ;;  %vm3380_vm15 = vcmp.eq.f32.partialorder %v3379_v55, 8.507059e+37  ;;  %v8138_v34 = vmul.f32 0.70710677, %v8121_v61  ;;  %v3398_v19 = vadd.f32 1.1283791, %v3397_v51 }
 0x35c   :  { %v3383_v32 = vsel %vm3380_vm15, %v3382_v35, %v3378_v45  ;;  %v3412_v56 = vsub.f32 1.0, %v3411_v52  ;;  %v3474_v4 = vadd.f32 0.05243302, %v3473_v9  ;;  %v3436_v0 = vadd.f32 0.18741608, %v3435_v47 }
 0x35d   :  { %4964 = vrcp.f32 %v8129_v28  ;;  %v3511_v63 = vmul.f32 %v3510_v25, %v8061_v58  ;;  %v3525_v12 = vadd.f32 0.112945676, %v3524_v3  ;;  %v8143_v14 = vmul.f32 %v3728_v39, %v7780_v57 }
 0x35e   :  { %v8146_v40 = vmul.f32 0.5, %v7973_v30  ;;  %v8148_v41 = vadd.f32 1.0, %v3488_v59  ;;  %v3560_v43 = vmul.f32 3.8918573e-05, %v8133_v31  ;;  %v4620_v6 = vclamps-f32 %v3344_v27, 1.0 }
 0x35f   :  { %v3384_v24 = vmul.f32 %v3383_v32, %v3359_v2  ;;  %v3526_v55 = vmul.f32 %v3525_v12, %v8061_v58  ;;  %v3587_v50 = vmul.f32 %v8138_v34, %v8138_v34  ;;  %v3399_v13 = vmul.f32 %v3398_v19, %v7887_v8 }
 0x360   :  { %v3413_v36 = vmul.f32 %v8088_v10, %v3412_v56  ;;  %v3475_v57 = vmul.f32 %v3474_v4, %v8005_v53  ;;  %v3561_v39 = vadd.f32 0.001143296, %v3560_v43  ;;  %v3419_v30 = vand.u32 2147483647, %v8047_v49  ;;  %v2262_v56 = vpop.f32.mrf.mxu1 }
 0x361   :  { %v3437_v17 = vmul.f32 %v3436_v0, %v7985_v23  ;;  %v3512_v51 = vadd.f32 0.0036580483, %v3511_v63  ;;  %v3527_v52 = vadd.f32 0.4994258, %v3526_v55  ;;  %vm3415_vm0 = vweird.f32 %v8047_v49 }
 0x362   :  { %4966 = vrcp.f32 %v8148_v41  ;;  %v3562_v9 = vmul.f32 %v3561_v39, %v8133_v31  ;;  %v8162_v1 = vmin.f32 %v3587_v50, 16.0  ;;  %v3729_v54 = vadd.f32 1.0, %v4620_v6  ;;  %v2360_v39 = vpop.f32.mrf.mxu3 }
 0x363   :  { %v8164_v8 = vpop.eup %4964  ;;  %v4621_v33 = vclamps-f32 %v3384_v24, 1.0  ;;  %v3421_v11 = vand.u32 2147483648, %v8047_v49  ;;  %v3528_v46 = vmul.f32 %v3527_v52, %v8061_v58  ;;  %v3414_v23 = vadd.f32 %v8088_v10, %v3413_v36 }
 0x364   :  { %vm3416_vm1 = vweird.f32 %v8088_v10  ;;  %v3476_v45 = vadd.f32 0.18741608, %v3475_v57  ;;  %v3563_v47 = vadd.f32 0.014752088, %v3562_v9  ;;  %vm8170_vm2 = vcmp.eq.f32.partialorder %v3419_v30, 8.507059e+37 }
 0x365   :  { %v3438_v35 = vadd.f32 1.1283791, %v3437_v17  ;;  %v3513_v59 = vmul.f32 %v3512_v51, %v8061_v58  ;;  %v8175_v3 = vadd.f32 1.0, %v3528_v46  ;;  %v3451_v27 = vmul.f32 %v8164_v8, %v8129_v28  ;;  %vm8189_vm3 = vmor %vm3415_vm0, %vm3416_vm1 }
 0x366   :  { %v3549_v2 = vmul.f32 2.1237322e-06, %v8133_v31  ;;  %v3564_v32 = vmul.f32 %v3563_v47, %v8133_v31  ;;  %v3600_v19 = vmul.f32 3.8918573e-05, %v8162_v1  ;;  %v8183_v4 = vmul.f32 %v3729_v54, %v7927_v26 }
 0x367   :  { %v8185_v0 = vadd.f32 1.0, %v4621_v33  ;;  %v3422_v12 = vor.u32 1.1754944e-38, %v3421_v11  ;;  %4968 = vrcp.f32 %v8175_v3  ;;  %v3418_v6 = vsel %vm8189_vm3, %v8088_v10, %v3414_v23 }
 0x368   :  { %v8194_v43 = vpop.eup %4966  ;;  %v3477_v26 = vmul.f32 %v3476_v45, %v8005_v53  ;;  %v3565_v24 = vadd.f32 0.112945676, %v3564_v32  ;;  %v3589_v55 = vmul.f32 2.1237322e-06, %v8162_v1  ;;  %v8202_v49 = vmul.f32 %v3438_v35, %v7960_v16 }
 0x369   :  { %v3461_v50 = vand.u32 2147483648, %v8129_v28  ;;  %v3601_v36 = vadd.f32 0.001143296, %v3600_v19  ;;  %v8206_v57 = vadd.f32 %v2262_v56, %v7434_v7  ;;  %v3452_v30 = vsub.f32 1.0, %v3451_v27 }
 0x36a   :  { %v3514_v17 = vadd.f32 0.05243302, %v3513_v59  ;;  %v3550_v51 = vadd.f32 0.00028619796, %v3549_v2  ;;  %v3566_v10 = vmul.f32 %v3565_v24, %v8133_v31  ;;  %v3423_v53 = vsel %vm8170_vm2, %v3422_v12, %v3418_v6 }
 0x36b   :  { %v3459_v52 = vand.u32 2147483647, %v8129_v28  ;;  %v3491_v16 = vmul.f32 %v8194_v43, %v8148_v41  ;;  %v3602_v9 = vmul.f32 %v3601_v36, %v8162_v1  ;;  %v3478_v54 = vadd.f32 1.1283791, %v3477_v26 }
 0x36c   :  { %v3567_v33 = vadd.f32 0.4994258, %v3566_v10  ;;  %v3590_v7 = vadd.f32 0.00028619796, %v3589_v55  ;;  %v8216_v11 = vadd.f32 %v2360_v39, %v7461_v20  ;;  %vm3455_vm4 = vweird.f32 %v8129_v28 }
 0x36d   :  { %v8218_v46 = vpop.eup %4968  ;;  %v3462_v23 = vor.u32 1.1754944e-38, %v3461_v50  ;;  %v3603_v45 = vadd.f32 0.014752088, %v3602_v9  ;;  %v8222_v47 = vmul.f32 0.70710677, %v8206_v57  ;;  %v8224_v25 = vmul.f32 %v3423_v53, %v3399_v13 }
 0x36e   :  { %v3453_v35 = vmul.f32 %v8164_v8, %v3452_v30  ;;  %v3515_v59 = vmul.f32 %v3514_v17, %v8061_v58  ;;  %v3551_v27 = vmul.f32 %v3550_v51, %v8133_v31  ;;  %v3492_v2 = vsub.f32 1.0, %v3491_v16 }
 0x36f   :  { %v3568_v20 = vmul.f32 %v3567_v33, %v8133_v31  ;;  %v3604_v32 = vmul.f32 %v3603_v45, %v8162_v1  ;;  %v3627_v19 = vmul.f32 %v8222_v47, %v8222_v47  ;;  %v8234_v56 = vmul.f32 %v3478_v54, %v7989_v22 }
 0x370   :  { %v3531_v13 = vmul.f32 %v8218_v46, %v8175_v3  ;;  %v3591_v63 = vmul.f32 %v3590_v7, %v8162_v1  ;;  %v8240_v12 = vmul.f32 0.70710677, %v8216_v11  ;;  %vm3456_vm5 = vweird.f32 %v8164_v8 }
 0x371   :  { %vm8243_vm6 = vcmp.eq.f32.partialorder %v3459_v52, 8.507059e+37  ;;  %v8247_v26 = vadd.f32 1.0, %v3568_v20  ;;  %v3605_v24 = vadd.f32 0.112945676, %v3604_v32  ;;  %v8249_v55 = vmin.f32 %v3627_v19, 16.0  ;;  %vm8264_vm8 = vmor %vm3455_vm4, %vm3456_vm5 }
 0x372   :  { %v3454_v22 = vadd.f32 %v8164_v8, %v3453_v35  ;;  %v3499_v50 = vand.u32 2147483647, %v8148_v41  ;;  %v3552_v36 = vadd.f32 0.0036580483, %v3551_v27  ;;  %v3667_v39 = vmul.f32 %v8240_v12, %v8240_v12 }
 0x373   :  { %v3493_v30 = vmul.f32 %v8194_v43, %v3492_v2  ;;  %vm3495_vm7 = vweird.f32 %v8148_v41  ;;  %v3501_v17 = vand.u32 2147483648, %v8148_v41  ;;  %v3516_v51 = vadd.f32 0.18741608, %v3515_v59 }
 0x374   :  { %v3532_v10 = vsub.f32 1.0, %v3531_v13  ;;  %v3592_v53 = vadd.f32 0.0036580483, %v3591_v63  ;;  %v3606_v52 = vmul.f32 %v3605_v24, %v8162_v1  ;;  %v3629_v16 = vmul.f32 2.1237322e-06, %v8249_v55 }
 0x375   :  { %vm3496_vm9 = vweird.f32 %v8194_v43  ;;  %4970 = vrcp.f32 %v8247_v26  ;;  %v3640_v54 = vmul.f32 3.8918573e-05, %v8249_v55  ;;  %v8271_v33 = vmin.f32 %v3667_v39, 16.0 }
 0x376   :  { %v3458_v7 = vsel %vm8264_vm8, %v8164_v8, %v3454_v22  ;;  %vm8276_vm10 = vcmp.eq.f32.partialorder %v3499_v50, 8.507059e+37  ;;  %v3553_v28 = vmul.f32 %v3552_v36, %v8133_v31  ;;  %v3607_v35 = vadd.f32 0.4994258, %v3606_v52  ;;  %vm8296_vm11 = vmor %vm3495_vm7, %vm3496_vm9 }
 0x377   :  { %v3630_v59 = vadd.f32 0.00028619796, %v3629_v16  ;;  %v3494_v27 = vadd.f32 %v8194_v43, %v3493_v30  ;;  %v3641_v2 = vadd.f32 0.001143296, %v3640_v54  ;;  %v3669_v20 = vmul.f32 2.1237322e-06, %v8271_v33 }
 0x378   :  { %v3680_v32 = vmul.f32 3.8918573e-05, %v8271_v33  ;;  %v3502_v19 = vor.u32 1.1754944e-38, %v3501_v17  ;;  %v3533_v13 = vmul.f32 %v8218_v46, %v3532_v10  ;;  %v3593_v8 = vmul.f32 %v3592_v53, %v8162_v1 }
 0x379   :  { %v3608_v63 = vmul.f32 %v3607_v35, %v8162_v1  ;;  %v3642_v24 = vmul.f32 %v3641_v2, %v8249_v55  ;;  %v3670_v22 = vadd.f32 0.00028619796, %v3669_v20  ;;  %v3779_v36 = vpack.c.bf16 %v7945_v15, %v7878_v5 }
 0x37a   :  { %v3681_v50 = vadd.f32 0.001143296, %v3680_v32  ;;  %v3463_v39 = vsel %vm8243_vm6, %v3462_v23, %v3458_v7  ;;  %v3517_v17 = vmul.f32 %v3516_v51, %v8061_v58  ;;  %v3554_v10 = vadd.f32 0.05243302, %v3553_v28 }
 0x37b   :  { %v3631_v53 = vmul.f32 %v3630_v59, %v8249_v55  ;;  %v8302_v52 = vpop.eup %4970  ;;  %v3498_v5 = vsel %vm8296_vm11, %v8194_v43, %v3494_v27  ;;  %v8307_v15 = vadd.f32 1.0, %v3608_v63  ;;  %v3643_v23 = vadd.f32 0.014752088, %v3642_v24  ;;  %3947 = vmatmul.bf16.gmra.mxu0 %v3779_v36 }
 0x37c   :  { %v3671_v41 = vmul.f32 %v3670_v22, %v8271_v33  ;;  %v3534_v6 = vadd.f32 %v8218_v46, %v3533_v13  ;;  %vm3536_vm12 = vweird.f32 %v8218_v46  ;;  %v3682_v58 = vmul.f32 %v3681_v50, %v8271_v33 }
 0x37d   :  { %v3780_v51 = vpack.c.bf16 %v8029_v42, %v7915_v29  ;;  %v3539_v16 = vand.u32 2147483647, %v8175_v3  ;;  %v3541_v9 = vand.u32 2147483648, %v8175_v3  ;;  %v3594_v43 = vadd.f32 0.05243302, %v3593_v8 }
 0x37e   :  { %4972 = vrcp.f32 %v8307_v15  ;;  %vm3535_vm13 = vweird.f32 %v8175_v3  ;;  %v3571_v54 = vmul.f32 %v8302_v52, %v8247_v26  ;;  %v3632_v7 = vadd.f32 0.0036580483, %v3631_v53 }
 0x37f   :  { %v3644_v28 = vmul.f32 %v3643_v23, %v8249_v55  ;;  %3996 = vmatmul.bf16.gmra.mxu1 %v3780_v51  ;;  %v3503_v35 = vsel %vm8276_vm10, %v3502_v19, %v3498_v5  ;;  %v3518_v29 = vadd.f32 1.1283791, %v3517_v17  ;;  %vm8324_vm14 = vmor %vm3535_vm13, %vm3536_vm12  ;;  %v3672_v59 = vadd.f32 0.0036580483, %v3671_v41 }
 0x380   :  { %v3683_v27 = vadd.f32 0.014752088, %v3682_v58  ;;  %v3464_v2 = vmul.f32 %v3463_v39, %v8202_v49  ;;  %v3538_v3 = vsel %vm8324_vm14, %v8218_v46, %v3534_v6  ;;  %v3555_v20 = vmul.f32 %v3554_v10, %v8133_v31 }
 0x381   :  { %v3645_v32 = vadd.f32 0.112945676, %v3644_v28  ;;  %vm3540_vm15 = vcmp.eq.f32.partialorder %v3539_v16, 8.507059e+37  ;;  %v3542_v13 = vor.u32 1.1754944e-38, %v3541_v9  ;;  %v3595_v45 = vmul.f32 %v3594_v43, %v8162_v1 }
 0x382   :  { %v3684_v19 = vmul.f32 %v3683_v27, %v8271_v33  ;;  %v3504_v8 = vmul.f32 %v3503_v35, %v8234_v56  ;;  %v3572_v63 = vsub.f32 1.0, %v3571_v54  ;;  %v3633_v24 = vmul.f32 %v3632_v7, %v8249_v55 }
 0x383   :  { %v3646_v49 = vmul.f32 %v3645_v32, %v8249_v55  ;;  %v3762_v46 = vmul.f32 %v8185_v0, %v7939_v62  ;;  %v3543_v50 = vsel %vm3540_vm15, %v3542_v13, %v3538_v3  ;;  %v3673_v36 = vmul.f32 %v3672_v59, %v8271_v33 }
 0x384   :  { %v8338_v22 = vpop.eup %4972  ;;  %v3685_v39 = vadd.f32 0.112945676, %v3684_v19  ;;  %v4622_v30 = vclamps-f32 %v8224_v25, 1.0  ;;  %v4623_v17 = vclamps-f32 %v3464_v2, 1.0  ;;  %v3519_v10 = vmul.f32 %v3518_v29, %v8036_v21 }
 0x385   :  { %v3556_v56 = vadd.f32 0.18741608, %v3555_v20  ;;  %v3596_v53 = vadd.f32 0.18741608, %v3595_v45  ;;  %v3611_v5 = vmul.f32 %v8338_v22, %v8307_v15  ;;  %v3647_v23 = vadd.f32 0.4994258, %v3646_v49 }
 0x386   :  { %v3686_v41 = vmul.f32 %v3685_v39, %v8271_v33  ;;  %v4624_v6 = vclamps-f32 %v3504_v8, 1.0  ;;  %v3544_v58 = vmul.f32 %v3543_v50, %v3519_v10  ;;  %v3573_v62 = vmul.f32 %v8302_v52, %v3572_v63  ;;  %v3928_v63 = vpop.f32.mrf.mxu0 }
 0x387   :  { %v3634_v0 = vadd.f32 0.05243302, %v3633_v24  ;;  %v3648_v51 = vmul.f32 %v3647_v23, %v8249_v55  ;;  %v3674_v16 = vadd.f32 0.05243302, %v3673_v36  ;;  %v3781_v21 = vpack.c.bf16 %v8183_v4, %v8080_v60  ;;  %v3977_v24 = vpop.f32.mrf.mxu1 }
 0x388   :  { %v3687_v25 = vadd.f32 0.4994258, %v3686_v41  ;;  %v3731_v9 = vadd.f32 1.0, %v4622_v30  ;;  %v3732_v43 = vadd.f32 1.0, %v4623_v17  ;;  %v2390_v54 = vmul.f32 0.5, %v8020_v48 }
 0x389   :  { %v3557_v7 = vmul.f32 %v3556_v56, %v8133_v31  ;;  %v3597_v28 = vmul.f32 %v3596_v53, %v8162_v1  ;;  %v3612_v35 = vsub.f32 1.0, %v3611_v5  ;;  %v8355_v29 = vadd.f32 1.0, %v3648_v51 }
 0x38a   :  { %v3688_v42 = vmul.f32 %v3687_v25, %v8271_v33  ;;  %v3733_v59 = vadd.f32 1.0, %v4624_v6  ;;  %v4625_v27 = vclamps-f32 %v3544_v58, 1.0  ;;  %v3635_v2 = vmul.f32 %v3634_v0, %v8249_v55 }
 0x38b   :  { %v3782_v3 = vpack.c.bf16 %v3762_v46, %v8143_v14  ;;  %v3574_v60 = vadd.f32 %v8302_v52, %v3573_v62  ;;  %vm3576_vm0 = vweird.f32 %v8302_v52  ;;  %4974 = vrcp.f32 %v8355_v29  ;;  %3952 = vmatmul.bf16.gmra.mxu0 %v3781_v21 }
 0x38c   :  { %v3675_v48 = vmul.f32 %v3674_v16, %v8271_v33  ;;  %v8365_v31 = vmul.f32 %v3731_v9, %v8017_v37  ;;  %v3558_v1 = vadd.f32 1.1283791, %v3557_v7  ;;  %v3581_v4 = vand.u32 2147483648, %v8247_v26 }
 0x38d   :  { %v8368_v20 = vadd.f32 1.0, %v3688_v42  ;;  %vm3575_vm1 = vweird.f32 %v8247_v26  ;;  %v3579_v14 = vand.u32 2147483647, %v8247_v26  ;;  %v3598_v32 = vadd.f32 1.1283791, %v3597_v28 }
 0x38e   :  { %v3613_v13 = vmul.f32 %v8338_v22, %v3612_v35  ;;  %v8374_v45 = vmul.f32 %v3732_v43, %v8039_v44  ;;  %v8377_v19 = vmul.f32 %v3733_v59, %v8146_v40  ;;  %vm8379_vm2 = vmor %vm3575_vm1, %vm3576_vm0  ;;  %v3636_v8 = vadd.f32 0.18741608, %v3635_v2  ;;  %v8387_v26 = vld [vmem:[%s8564_s6] ss:$0 sm:$0xff]  ;;  %s5173_s6 = smov [#allocation11]  }
 0x38f   :  { %4976 = vrcp.f32 %v8368_v20  ;;  %4001 = vmatmul.bf16.gmra.mxu1 %v3782_v3  ;;  %v3734_v44 = vadd.f32 1.0, %v4625_v27  ;;  %v3578_v40 = vsel %vm8379_vm2, %v8302_v52, %v3574_v60  ;;  %v3619_v49 = vand.u32 2147483647, %v8307_v15  ;;  %v3979_v7 = vpop.f32.mrf.mxu1  ;;  %s4293_s30 = sshll.u32 %s5173_s6, 4  ;;  %s4294_s30 = int_to_ptr.vmem [resolvable:$true] %s4293_s30 }
 0x390   :  { %v3676_v46 = vadd.f32 0.18741608, %v3675_v48  ;;  %v3559_v50 = vmul.f32 %v3558_v1, %v8096_v18  ;;  %v3582_v36 = vor.u32 1.1754944e-38, %v3581_v4  ;;  %v3621_v39 = vand.u32 2147483648, %v8307_v15 }
 0x391   :  { %v3929_v30 = vadd.f32 %v8387_v26, %v3928_v63  ;;  %v4975_v17 = vpop.eup %4974  ;;  %vm3580_vm3 = vcmp.eq.f32.partialorder %v3579_v14, 8.507059e+37  ;;  %v3599_v10 = vmul.f32 %v3598_v32, %v8138_v34  ;;  %v3614_v56 = vadd.f32 %v8338_v22, %v3613_v13 }
 0x392   :  { %vm3616_vm4 = vweird.f32 %v8338_v22  ;;  %v3583_v53 = vsel %vm3580_vm3, %v3582_v36, %v3578_v40  ;;  %v3637_v52 = vmul.f32 %v3636_v8, %v8249_v55  ;;  %v3651_v5 = vmul.f32 %v4975_v17, %v8355_v29 }
 0x393   :  { %v8401_v23 = vadd.f32 %v3977_v24, %v3929_v30  ;;  %v3766_v18 = vmul.f32 %v3734_v44, %v2390_v54  ;;  %vm3615_vm5 = vweird.f32 %v8307_v15  ;;  %vm8404_vm6 = vcmp.eq.f32.partialorder %v3619_v49, 8.507059e+37  ;;  %v3930_v54 = vpop.f32.mrf.mxu0 }
 0x394   :  { %v3677_v34 = vmul.f32 %v3676_v46, %v8271_v33  ;;  %vm8409_vm7 = vmor %vm3615_vm5, %vm3616_vm4  ;;  %v3622_v62 = vor.u32 1.1754944e-38, %v3621_v39  ;;  %v3652_v55 = vsub.f32 1.0, %v3651_v5  ;;  %v3661_v0 = vand.u32 2147483648, %v8355_v29 }
 0x395   :  { %v4977_v6 = vpop.eup %4976  ;;  %v4017_v51 = vmul.f32 %v8401_v23, %v8401_v23  ;;  %v3584_v16 = vmul.f32 %v3583_v53, %v3559_v50  ;;  %v3618_v15 = vsel %vm8409_vm7, %v8338_v22, %v3614_v56  ;;  %v3783_v33 = vpack.c.bf16 %v8377_v19, %v8365_v31 }
 0x396   :  { %v3691_v25 = vmul.f32 %v4977_v6, %v8368_v20  ;;  %v3638_v21 = vadd.f32 1.1283791, %v3637_v52  ;;  %v3653_v9 = vmul.f32 %v4975_v17, %v3652_v55  ;;  %vm3656_vm8 = vweird.f32 %v4975_v17 }
 0x397   :  { %v3659_v43 = vand.u32 2147483647, %v8355_v29  ;;  %4033 = vadd.xlane.f32.xlu0 %v4017_v51  ;;  %vm3655_vm9 = vweird.f32 %v8355_v29  ;;  %v3678_v28 = vadd.f32 1.1283791, %v3677_v34  ;;  %v3931_v42 = vadd.f32 %v8387_v26, %v3930_v54  ;;  %v3982_v40 = vpop.f32.mrf.mxu1 }
 0x398   :  { %v3692_v35 = vsub.f32 1.0, %v3691_v25  ;;  %v3623_v22 = vsel %vm8404_vm6, %v3622_v62, %v3618_v15  ;;  %v3654_v59 = vadd.f32 %v4975_v17, %v3653_v9  ;;  %v3662_v27 = vor.u32 1.1754944e-38, %v3661_v0  ;;  %vm3657_vm10 = vmor %vm3655_vm9, %vm3656_vm8 }
 0x399   :  { %v3701_v2 = vand.u32 2147483648, %v8368_v20  ;;  %vm3696_vm11 = vweird.f32 %v4977_v6  ;;  %v3699_v60 = vand.u32 2147483647, %v8368_v20  ;;  %v8429_v48 = vadd.f32 %v3979_v7, %v3931_v42 }
 0x39a   :  { %v3693_v3 = vmul.f32 %v4977_v6, %v3692_v35  ;;  %v3639_v29 = vmul.f32 %v3638_v21, %v8222_v47  ;;  %v3658_v31 = vsel %vm3657_vm10, %v4975_v17, %v3654_v59  ;;  %vm3660_vm12 = vcmp.eq.f32.partialorder %v3659_v43, 8.507059e+37 }
 0x39b   :  { %v3784_v1 = vpack.c.bf16 %v3766_v18, %v8374_v45  ;;  %v3663_v4 = vsel %vm3660_vm12, %v3662_v27, %v3658_v31  ;;  %vm3695_vm13 = vweird.f32 %v8368_v20  ;;  %3957 = vmatmul.bf16.gmra.mxu0 %v3783_v33  ;;  %v4018_v32 = vmul.f32 %v8429_v48, %v8429_v48  ;;  %v3933_v45 = vpop.f32.mrf.mxu0 }
 0x39c   :  { %v3694_v14 = vadd.f32 %v4977_v6, %v3693_v3  ;;  %v3624_v13 = vmul.f32 %v3623_v22, %v3599_v10  ;;  %v3664_v19 = vmul.f32 %v3663_v4, %v3639_v29  ;;  %vm3697_vm14 = vmor %vm3695_vm13, %vm3696_vm11  ;;  %v3702_v37 = vor.u32 1.1754944e-38, %v3701_v2 }
 0x39d   :  { %v4626_v8 = vclamps-f32 %v3584_v16, 1.0  ;;  %v3679_v63 = vmul.f32 %v3678_v28, %v8240_v12  ;;  %vm3700_vm15 = vcmp.eq.f32.partialorder %v3699_v60, 8.507059e+37  ;;  %v3934_v49 = vadd.f32 %v8387_v26, %v3933_v45 }
 0x39e   :  { %v3698_v47 = vsel %vm3697_vm14, %v4977_v6, %v3694_v14  ;;  %v4628_v24 = vclamps-f32 %v3664_v19, 1.0  ;;  %v4627_v46 = vclamps-f32 %v3624_v13, 1.0  ;;  %v2393_v39 = vmul.f32 0.5, %v8206_v57 }
 0x39f   :  { %v3703_v44 = vsel %vm3700_vm15, %v3702_v37, %v3698_v47  ;;  %4006 = vmatmul.bf16.gmra.mxu1 %v3784_v1  ;;  %4035 = vadd.xlane.f32.xlu0 %v4018_v32  ;;  %v3735_v36 = vadd.f32 1.0, %v4626_v8  ;;  %v8439_v17 = vadd.f32 %v3982_v40, %v3934_v49  ;;  %v2391_v12 = vmul.f32 0.5, %v8073_v38  ;;  %v3984_v57 = vpop.f32.mrf.mxu1 }
 0x3a0   :  { %v3704_v20 = vmul.f32 %v3703_v44, %v3679_v63  ;;  %v3737_v50 = vadd.f32 1.0, %v4628_v24  ;;  %v3736_v52 = vadd.f32 1.0, %v4627_v46  ;;  %v2394_v5 = vmul.f32 0.5, %v8216_v11 }
 0x3a1   :  { %v4019_v53 = vmul.f32 %v8439_v17, %v8439_v17  ;;  %v3767_v18 = vmul.f32 %v3735_v36, %v2391_v12  ;;  %v2392_v41 = vmul.f32 0.5, %v8121_v61 }
 0x3a2   :  { %v4629_v30 = vclamps-f32 %v3704_v20, 1.0  ;;  %v3769_v10 = vmul.f32 %v3737_v50, %v2393_v39 }
 0x3a3   :  { %4037 = vadd.xlane.f32.xlu1 %v4019_v53  ;;  %v3935_v6 = vpop.f32.mrf.mxu0  ;;  %v3768_v55 = vmul.f32 %v3736_v52, %v2392_v41 }
 0x3a4   :  { %v3738_v56 = vadd.f32 1.0, %v4629_v30  ;;  %v3785_v58 = vpack.c.bf16 %v3769_v10, %v3767_v18  ;;  %v3936_v62 = vadd.f32 %v8387_v26, %v3935_v6 }
 0x3a6   :  { %v3770_v34 = vmul.f32 %v3738_v56, %v2394_v5  ;;  %v8447_v38 = vadd.f32 %v3984_v57, %v3936_v62 }
 0x3a8   :  { %v3786_v0 = vpack.c.bf16 %v3770_v34, %v3768_v55  ;;  %v4020_v51 = vmul.f32 %v8447_v38, %v8447_v38 }
 0x3a9   :  { %v3987_v16 = vpop.f32.mrf.mxu1 }
 0x3ab   :  { %3962 = vmatmul.bf16.gmra.mxu0 %v3785_v58  ;;  %4039 = vadd.xlane.f32.xlu1 %v4020_v51  ;;  %v3938_v11 = vpop.f32.mrf.mxu0 }
 0x3ac   :  { %v3939_v61 = vadd.f32 %v8387_v26, %v3938_v11 }
 0x3ae   :  { %v8452_v15 = vadd.f32 %v3987_v16, %v3939_v61 }
 0x3af   :  { %4011 = vmatmul.bf16.gmra.mxu1 %v3786_v0 }
 0x3b0   :  { %v4021_v25 = vmul.f32 %v8452_v15, %v8452_v15 }
 0x3b1   :  { %v3989_v21 = vpop.f32.mrf.mxu1 }
 0x3b2   :  { %4041 = vadd.xlane.f32.xlu2 %v4021_v25 }
 0x3b3   :  { %v3940_v33 = vpop.f32.mrf.mxu0 }
 0x3b4   :  { %v3941_v9 = vadd.f32 %v8387_v26, %v3940_v33 }
 0x3b6   :  { %v8457_v43 = vadd.f32 %v3989_v21, %v3941_v9 }
 0x3b8   :  { %v4022_v54 = vmul.f32 %v8457_v43, %v8457_v43 }
 0x3ba   :  { %4043 = vadd.xlane.f32.xlu2 %v4022_v54 }
 0x3cb   :  { %v3943_v7 = vpop.f32.mrf.mxu0 }
 0x3cc   :  { %v3944_v28 = vadd.f32 %v8387_v26, %v3943_v7 }
 0x3d3   :  { %v3945_v59 = vpop.f32.mrf.mxu0 }
 0x3d4   :  { %v3946_v27 = vadd.f32 %v8387_v26, %v3945_v59 }
 0x3d7   :  { %v3992_v35 = vpop.f32.mrf.mxu1 }
 0x3d8   :  { %v8462_v42 = vadd.f32 %v3992_v35, %v3944_v28 }
 0x3da   :  { %v4023_v22 = vmul.f32 %v8462_v42, %v8462_v42 }
 0x3dc   :  { %4045 = vadd.xlane.f32.xlu0 %v4023_v22 }
 0x3df   :  { %v3994_v2 = vpop.f32.mrf.mxu1 }
 0x3e0   :  { %v8467_v3 = vadd.f32 %v3994_v2, %v3946_v27 }
 0x3e2   :  { %v4024_v60 = vmul.f32 %v8467_v3, %v8467_v3 }
 0x3e4   :  { %4047 = vadd.xlane.f32.xlu1 %v4024_v60 }
 0x3f8   :  { %v3948_v29 = vpop.f32.mrf.mxu0 }
 0x3f9   :  { %v3949_v31 = vadd.f32 %v8387_v26, %v3948_v29 }
 0x3fc   :  { %v3997_v1 = vpop.f32.mrf.mxu1 }
 0x3fd   :  { %v8472_v4 = vadd.f32 %v3997_v1, %v3949_v31 }
 0x3ff   :  { %v4025_v14 = vmul.f32 %v8472_v4, %v8472_v4 }
 0x400   :  { %v3950_v32 = vpop.f32.mrf.mxu0 }
 0x401   :  { %4049 = vadd.xlane.f32.xlu2 %v4025_v14  ;;  %v3951_v13 = vadd.f32 %v8387_v26, %v3950_v32 }
 0x404   :  { %v3999_v19 = vpop.f32.mrf.mxu1 }
 0x405   :  { %v8477_v37 = vadd.f32 %v3999_v19, %v3951_v13 }
 0x407   :  { %v4026_v8 = vmul.f32 %v8477_v37, %v8477_v37 }
 0x408   :  { %v3953_v63 = vpop.f32.mrf.mxu0 }
 0x409   :  { %4051 = vadd.xlane.f32.xlu0 %v4026_v8  ;;  %v3954_v47 = vadd.f32 %v8387_v26, %v3953_v63 }
 0x40a   :  { %v4034_v50 = vpop.xlane.xlu0 %4033 }
 0x40b   :  { %v4065_v36 = vmax.f32 %v4034_v50, 1e-24 }
 0x40c   :  { %v4002_v24 = vpop.f32.mrf.mxu1 }
 0x40d   :  { %v8482_v44 = vadd.f32 %v4002_v24, %v3954_v47  ;;  %4978 = vrsqrt.f32 %v4065_v36  ;;  %vm4087_vm1 = vweird.f32 %v4065_v36 }
 0x40f   :  { %v4027_v45 = vmul.f32 %v8482_v44, %v8482_v44 }
 0x410   :  { %v3955_v40 = vpop.f32.mrf.mxu0 }
 0x411   :  { %4053 = vadd.xlane.f32.xlu1 %v4027_v45  ;;  %v3956_v20 = vadd.f32 %v8387_v26, %v3955_v40 }
 0x412   :  { %v4036_v5 = vpop.xlane.xlu0 %4035 }
 0x413   :  { %v4979_v18 = vpop.eup %4978  ;;  %v4066_v41 = vmax.f32 %v4036_v5, 1e-24 }
 0x414   :  { %v4004_v49 = vpop.f32.mrf.mxu1  ;;  %v4082_v6 = vmul.f32 %v4979_v18, %v4065_v36  ;;  %vm4088_vm0 = vweird.f32 %v4979_v18 }
 0x415   :  { %v8487_v46 = vadd.f32 %v4004_v49, %v3956_v20  ;;  %vm8515_vm2 = vmor %vm4087_vm1, %vm4088_vm0  ;;  %vm4097_vm4 = vweird.f32 %v4066_v41 }
 0x416   :  { %v4038_v12 = vpop.xlane.xlu1 %4037  ;;  %v4083_v58 = vmul.f32 %v4979_v18, %v4082_v6 }
 0x417   :  { %v4028_v39 = vmul.f32 %v8487_v46, %v8487_v46  ;;  %v8491_v10 = vmax.f32 %v4038_v12, 1e-24 }
 0x418   :  { %v3958_v30 = vpop.f32.mrf.mxu0  ;;  %v4084_v11 = vmul.f32 0.5, %v4083_v58 }
 0x419   :  { %4055 = vadd.xlane.f32.xlu2 %v4028_v39  ;;  %v3959_v56 = vadd.f32 %v8387_v26, %v3958_v30  ;;  %4980 = vrsqrt.f32 %v8491_v10  ;;  %vm4107_vm7 = vweird.f32 %v8491_v10 }
 0x41a   :  { %4982 = vrsqrt.f32 %v4066_v41  ;;  %v4085_v9 = vsub.f32 1.5, %v4084_v11 }
 0x41c   :  { %v4007_v53 = vpop.f32.mrf.mxu1  ;;  %v4086_v2 = vmul.f32 %v4979_v18, %v4085_v9 }
 0x41d   :  { %v8495_v52 = vadd.f32 %v4007_v53, %v3959_v56 }
 0x41e   :  { %v4040_v62 = vpop.xlane.xlu1 %4039  ;;  %v4090_v47 = vsel %vm8515_vm2, %v4979_v18, %v4086_v2 }
 0x41f   :  { %v4029_v34 = vmul.f32 %v8495_v52, %v8495_v52  ;;  %v8499_v55 = vpop.eup %4980  ;;  %v4068_v0 = vmax.f32 %v4040_v62, 1e-24  ;;  %v4241_v12 = vmul.f32 %v4090_v47, %v8401_v23 }
 0x420   :  { %v3960_v57 = vpop.f32.mrf.mxu0  ;;  %v4102_v16 = vmul.f32 %v8499_v55, %v8491_v10  ;;  %v4983_v21 = vpop.eup %4982  ;;  %vm4108_vm5 = vweird.f32 %v8499_v55 }
 0x421   :  { %4057 = vadd.xlane.f32.xlu0 %v4029_v34  ;;  %v3961_v51 = vadd.f32 %v8387_v26, %v3960_v57  ;;  %4984 = vrsqrt.f32 %v4068_v0  ;;  %v4092_v7 = vmul.f32 %v4983_v21, %v4066_v41  ;;  %vm4098_vm3 = vweird.f32 %v4983_v21  ;;  %vm4109_vm9 = vmor %vm4107_vm7, %vm4108_vm5 }
 0x422   :  { %v4103_v33 = vmul.f32 %v8499_v55, %v4102_v16  ;;  %vm4099_vm6 = vmor %vm4097_vm4, %vm4098_vm3  ;;  %vm4117_vm10 = vweird.f32 %v4068_v0 }
 0x423   :  { %v4093_v22 = vmul.f32 %v4983_v21, %v4092_v7 }
 0x424   :  { %v4009_v61 = vpop.f32.mrf.mxu1  ;;  %v4104_v28 = vmul.f32 0.5, %v4103_v33 }
 0x425   :  { %v8504_v25 = vadd.f32 %v4009_v61, %v3961_v51  ;;  %v4042_v59 = vpop.xlane.xlu2 %4041  ;;  %v4094_v31 = vmul.f32 0.5, %v4093_v22 }
 0x426   :  { %v8509_v60 = vmax.f32 %v4042_v59, 1e-24  ;;  %v4105_v1 = vsub.f32 1.5, %v4104_v28 }
 0x427   :  { %v4030_v54 = vmul.f32 %v8504_v25, %v8504_v25  ;;  %v4985_v27 = vpop.eup %4984  ;;  %v4095_v8 = vsub.f32 1.5, %v4094_v31 }
 0x428   :  { %v3963_v35 = vpop.f32.mrf.mxu0  ;;  %v4112_v14 = vmul.f32 %v4985_v27, %v4068_v0  ;;  %4986 = vrsqrt.f32 %v8509_v60  ;;  %v4106_v40 = vmul.f32 %v8499_v55, %v4105_v1  ;;  %vm4118_vm8 = vweird.f32 %v4985_v27 }
 0x429   :  { %4059 = vadd.xlane.f32.xlu1 %v4030_v54  ;;  %v3964_v29 = vadd.f32 %v8387_v26, %v3963_v35  ;;  %v4096_v45 = vmul.f32 %v4983_v21, %v4095_v8  ;;  %vm4119_vm11 = vmor %vm4117_vm10, %vm4118_vm8  ;;  %vm4127_vm13 = vweird.f32 %v8509_v60 }
 0x42a   :  { %v4113_v63 = vmul.f32 %v4985_v27, %v4112_v14  ;;  %v4110_v18 = vsel %vm4109_vm9, %v8499_v55, %v4106_v40 }
 0x42b   :  { %v4100_v50 = vsel %vm4099_vm6, %v4983_v21, %v4096_v45  ;;  %v4243_v58 = vmul.f32 %v4110_v18, %v8439_v17 }
 0x42c   :  { %v4012_v32 = vpop.f32.mrf.mxu1  ;;  %v4114_v20 = vmul.f32 0.5, %v4113_v63  ;;  %v4242_v56 = vmul.f32 %v4100_v50, %v8429_v48 }
 0x42d   :  { %v8513_v13 = vadd.f32 %v4012_v32, %v3964_v29  ;;  %v4044_v39 = vpop.xlane.xlu2 %4043 }
 0x42e   :  { %v4115_v36 = vsub.f32 1.5, %v4114_v20  ;;  %v4987_v30 = vpop.eup %4986  ;;  %v4070_v53 = vmax.f32 %v4044_v39, 1e-24  ;;  %v4777_v6 = vpack.c.bf16 %v4242_v56, %v4241_v12 }
 0x42f   :  { %v4031_v24 = vmul.f32 %v8513_v13, %v8513_v13  ;;  %v4122_v10 = vmul.f32 %v4987_v30, %v8509_v60  ;;  %vm4128_vm12 = vweird.f32 %v4987_v30 }
 0x430   :  { %v3965_v49 = vpop.f32.mrf.mxu0  ;;  %v4116_v41 = vmul.f32 %v4985_v27, %v4115_v36  ;;  %4988 = vrsqrt.f32 %v4070_v53  ;;  %4778 = vst [vmem:[#allocation11] sm:$0xff] %v4777_v6   ;;  %vm4129_vm15 = vmor %vm4127_vm13, %vm4128_vm12  ;;  %vm4137_vm0 = vweird.f32 %v4070_v53 }
 0x431   :  { %4061 = vadd.xlane.f32.xlu2 %v4031_v24  ;;  %v3966_v5 = vadd.f32 %v8387_v26, %v3965_v49  ;;  %v4123_v48 = vmul.f32 %v4987_v30, %v4122_v10 }
 0x432   :  { %v4120_v23 = vsel %vm4119_vm11, %v4985_v27, %v4116_v41 }
 0x433   :  { %v4244_v62 = vmul.f32 %v4120_v23, %v8447_v38  ;;  %v4124_v55 = vmul.f32 0.5, %v4123_v48 }
 0x434   :  { %v4014_v34 = vpop.f32.mrf.mxu1 }
 0x435   :  { %v8533_v57 = vadd.f32 %v4014_v34, %v3966_v5  ;;  %v4782_v0 = vpack.c.bf16 %v4244_v62, %v4243_v58  ;;  %v4125_v11 = vsub.f32 1.5, %v4124_v55 }
 0x436   :  { %v4989_v51 = vpop.eup %4988 }
 0x437   :  { %v4032_v26 = vmul.f32 %v8533_v57, %v8533_v57  ;;  %4814 = vst [vmem:[#allocation11 + $0x8] sm:$0xff] %v4782_v0   ;;  %v4132_v16 = vmul.f32 %v4989_v51, %v4070_v53  ;;  %v4126_v33 = vmul.f32 %v4987_v30, %v4125_v11  ;;  %vm4138_vm14 = vweird.f32 %v4989_v51 }
 0x438   :  { %vm4139_vm1 = vmor %vm4137_vm0, %vm4138_vm14 }
 0x439   :  { %4063 = vadd.xlane.f32.xlu0 %v4032_v26  ;;  %v4133_v61 = vmul.f32 %v4989_v51, %v4132_v16  ;;  %v4130_v17 = vsel %vm4129_vm15, %v4987_v30, %v4126_v33 }
 0x43a   :  { %v4245_v7 = vmul.f32 %v4130_v17, %v8452_v15 }
 0x43b   :  { %v4134_v21 = vmul.f32 0.5, %v4133_v61 }
 0x43d   :  { %v4135_v9 = vsub.f32 1.5, %v4134_v21 }
 0x43f   :  { %v4136_v38 = vmul.f32 %v4989_v51, %v4135_v9 }
 0x441   :  { %v4140_v54 = vsel %vm4139_vm1, %v4989_v51, %v4136_v38 }
 0x442   :  { %v4246_v28 = vmul.f32 %v4140_v54, %v8457_v43 }
 0x444   :  { %v4787_v35 = vpack.c.bf16 %v4246_v28, %v4245_v7 }
 0x446   :  { %4815 = vst [vmem:[#allocation11 + $0x10] sm:$0xff] %v4787_v35  }
 0x44f   :  { %v4046_v22 = vpop.xlane.xlu0 %4045 }
 0x450   :  { %v4071_v59 = vmax.f32 %v4046_v22, 1e-24 }
 0x452   :  { %4990 = vrsqrt.f32 %v4071_v59  ;;  %vm4147_vm3 = vweird.f32 %v4071_v59 }
 0x457   :  { %v4048_v27 = vpop.xlane.xlu1 %4047 }
 0x458   :  { %v4991_v2 = vpop.eup %4990  ;;  %v4072_v60 = vmax.f32 %v4048_v27, 1e-24 }
 0x459   :  { %v4142_v29 = vmul.f32 %v4991_v2, %v4071_v59  ;;  %vm4148_vm2 = vweird.f32 %v4991_v2 }
 0x45a   :  { %4992 = vrsqrt.f32 %v4072_v60  ;;  %vm4149_vm5 = vmor %vm4147_vm3, %vm4148_vm2  ;;  %vm4157_vm6 = vweird.f32 %v4072_v60 }
 0x45b   :  { %v4143_v31 = vmul.f32 %v4991_v2, %v4142_v29 }
 0x45d   :  { %v4144_v1 = vmul.f32 0.5, %v4143_v31 }
 0x45f   :  { %v4145_v32 = vsub.f32 1.5, %v4144_v1 }
 0x460   :  { %v4993_v14 = vpop.eup %4992 }
 0x461   :  { %v4152_v19 = vmul.f32 %v4993_v14, %v4072_v60  ;;  %v4146_v63 = vmul.f32 %v4991_v2, %v4145_v32  ;;  %vm4158_vm4 = vweird.f32 %v4993_v14 }
 0x462   :  { %vm4159_vm7 = vmor %vm4157_vm6, %vm4158_vm4 }
 0x463   :  { %v4153_v8 = vmul.f32 %v4993_v14, %v4152_v19  ;;  %v4150_v47 = vsel %vm4149_vm5, %v4991_v2, %v4146_v63 }
 0x464   :  { %v4247_v40 = vmul.f32 %v4150_v47, %v8462_v42 }
 0x465   :  { %v4154_v15 = vmul.f32 0.5, %v4153_v8 }
 0x467   :  { %v4155_v43 = vsub.f32 1.5, %v4154_v15 }
 0x469   :  { %v4156_v24 = vmul.f32 %v4993_v14, %v4155_v43 }
 0x46b   :  { %v4160_v45 = vsel %vm4159_vm7, %v4993_v14, %v4156_v24 }
 0x46c   :  { %v4248_v20 = vmul.f32 %v4160_v45, %v8467_v3 }
 0x46e   :  { %v4792_v49 = vpack.c.bf16 %v4248_v20, %v4247_v40 }
 0x470   :  { %4816 = vst [vmem:[#allocation11 + $0x18] sm:$0xff] %v4792_v49  }
 0x474   :  { %v4050_v50 = vpop.xlane.xlu2 %4049 }
 0x475   :  { %v4073_v36 = vmax.f32 %v4050_v50, 1e-24 }
 0x477   :  { %4994 = vrsqrt.f32 %v4073_v36  ;;  %vm4167_vm9 = vweird.f32 %v4073_v36 }
 0x47c   :  { %v4052_v39 = vpop.xlane.xlu0 %4051 }
 0x47d   :  { %v4995_v30 = vpop.eup %4994  ;;  %v4074_v12 = vmax.f32 %v4052_v39, 1e-24 }
 0x47e   :  { %v4162_v56 = vmul.f32 %v4995_v30, %v4073_v36  ;;  %vm4168_vm8 = vweird.f32 %v4995_v30 }
 0x47f   :  { %4996 = vrsqrt.f32 %v4074_v12  ;;  %vm4169_vm11 = vmor %vm4167_vm9, %vm4168_vm8  ;;  %vm4177_vm12 = vweird.f32 %v4074_v12 }
 0x480   :  { %v4163_v53 = vmul.f32 %v4995_v30, %v4162_v56 }
 0x482   :  { %v4164_v5 = vmul.f32 0.5, %v4163_v53 }
 0x484   :  { %v4054_v18 = vpop.xlane.xlu1 %4053  ;;  %v4165_v34 = vsub.f32 1.5, %v4164_v5 }
 0x485   :  { %v4997_v41 = vpop.eup %4996  ;;  %v4075_v10 = vmax.f32 %v4054_v18, 1e-24 }
 0x486   :  { %v4172_v6 = vmul.f32 %v4997_v41, %v4074_v12  ;;  %v4166_v3 = vmul.f32 %v4995_v30, %v4165_v34  ;;  %vm4178_vm10 = vweird.f32 %v4997_v41 }
 0x487   :  { %4998 = vrsqrt.f32 %v4075_v10  ;;  %vm4179_vm13 = vmor %vm4177_vm12, %vm4178_vm10  ;;  %vm4187_vm15 = vweird.f32 %v4075_v10 }
 0x488   :  { %v4173_v42 = vmul.f32 %v4997_v41, %v4172_v6  ;;  %v4170_v55 = vsel %vm4169_vm11, %v4995_v30, %v4166_v3 }
 0x489   :  { %v4249_v61 = vmul.f32 %v4170_v55, %v8472_v4 }
 0x48a   :  { %v4174_v23 = vmul.f32 0.5, %v4173_v42 }
 0x48c   :  { %v4175_v48 = vsub.f32 1.5, %v4174_v23  ;;  %v4056_v58 = vpop.xlane.xlu2 %4055 }
 0x48d   :  { %v4999_v62 = vpop.eup %4998  ;;  %v4076_v26 = vmax.f32 %v4056_v58, 1e-24 }
 0x48e   :  { %v4176_v0 = vmul.f32 %v4997_v41, %v4175_v48  ;;  %v4182_v51 = vmul.f32 %v4999_v62, %v4075_v10  ;;  %vm4188_vm14 = vweird.f32 %v4999_v62 }
 0x48f   :  { %5000 = vrsqrt.f32 %v4076_v26  ;;  %vm4189_vm1 = vmor %vm4187_vm15, %vm4188_vm14  ;;  %vm4197_vm2 = vweird.f32 %v4076_v26 }
 0x490   :  { %v4180_v11 = vsel %vm4179_vm13, %v4997_v41, %v4176_v0  ;;  %v4183_v16 = vmul.f32 %v4999_v62, %v4182_v51 }
 0x491   :  { %v4250_v33 = vmul.f32 %v4180_v11, %v8477_v37 }
 0x492   :  { %v4184_v21 = vmul.f32 0.5, %v4183_v16 }
 0x493   :  { %v4797_v9 = vpack.c.bf16 %v4250_v33, %v4249_v61 }
 0x494   :  { %v4058_v17 = vpop.xlane.xlu0 %4057  ;;  %v4185_v7 = vsub.f32 1.5, %v4184_v21 }
 0x495   :  { %v5001_v38 = vpop.eup %5000  ;;  %4817 = vst [vmem:[#allocation11 + $0x20] sm:$0xff] %v4797_v9   ;;  %v4077_v54 = vmax.f32 %v4058_v17, 1e-24 }
 0x496   :  { %v4192_v28 = vmul.f32 %v5001_v38, %v4076_v26  ;;  %v4186_v22 = vmul.f32 %v4999_v62, %v4185_v7  ;;  %vm4198_vm0 = vweird.f32 %v5001_v38 }
 0x497   :  { %5002 = vrsqrt.f32 %v4077_v54  ;;  %vm4199_vm3 = vmor %vm4197_vm2, %vm4198_vm0  ;;  %vm4207_vm5 = vweird.f32 %v4077_v54 }
 0x498   :  { %v4193_v35 = vmul.f32 %v5001_v38, %v4192_v28  ;;  %v4190_v60 = vsel %vm4189_vm1, %v4999_v62, %v4186_v22 }
 0x499   :  { %v4251_v32 = vmul.f32 %v4190_v60, %v8482_v44 }
 0x49a   :  { %v4194_v59 = vmul.f32 0.5, %v4193_v35 }
 0x49c   :  { %v4195_v27 = vsub.f32 1.5, %v4194_v59  ;;  %v4060_v2 = vpop.xlane.xlu1 %4059 }
 0x49d   :  { %v5003_v4 = vpop.eup %5002  ;;  %v4078_v37 = vmax.f32 %v4060_v2, 1e-24 }
 0x49e   :  { %v4196_v29 = vmul.f32 %v5001_v38, %v4195_v27  ;;  %v4202_v31 = vmul.f32 %v5003_v4, %v4077_v54  ;;  %vm4208_vm4 = vweird.f32 %v5003_v4 }
 0x49f   :  { %5004 = vrsqrt.f32 %v4078_v37  ;;  %vm4209_vm7 = vmor %vm4207_vm5, %vm4208_vm4  ;;  %vm4217_vm8 = vweird.f32 %v4078_v37 }
 0x4a0   :  { %v4200_v1 = vsel %vm4199_vm3, %v5001_v38, %v4196_v29  ;;  %v4203_v14 = vmul.f32 %v5003_v4, %v4202_v31 }
 0x4a1   :  { %v4252_v19 = vmul.f32 %v4200_v1, %v8487_v46 }
 0x4a2   :  { %v4204_v8 = vmul.f32 0.5, %v4203_v14 }
 0x4a3   :  { %v4802_v63 = vpack.c.bf16 %v4252_v19, %v4251_v32 }
 0x4a4   :  { %v4062_v15 = vpop.xlane.xlu2 %4061  ;;  %v4205_v24 = vsub.f32 1.5, %v4204_v8 }
 0x4a5   :  { %v5005_v43 = vpop.eup %5004  ;;  %4818 = vst [vmem:[#allocation11 + $0x28] sm:$0xff] %v4802_v63   ;;  %v4079_v47 = vmax.f32 %v4062_v15, 1e-24 }
 0x4a6   :  { %v4212_v45 = vmul.f32 %v5005_v43, %v4078_v37  ;;  %v4206_v20 = vmul.f32 %v5003_v4, %v4205_v24  ;;  %vm4218_vm6 = vweird.f32 %v5005_v43 }
 0x4a7   :  { %5006 = vrsqrt.f32 %v4079_v47  ;;  %vm4219_vm9 = vmor %vm4217_vm8, %vm4218_vm6  ;;  %vm4227_vm11 = vweird.f32 %v4079_v47 }
 0x4a8   :  { %v4213_v40 = vmul.f32 %v5005_v43, %v4212_v45  ;;  %v4210_v39 = vsel %vm4209_vm7, %v5003_v4, %v4206_v20 }
 0x4a9   :  { %v4253_v5 = vmul.f32 %v4210_v39, %v8495_v52 }
 0x4aa   :  { %v4214_v49 = vmul.f32 0.5, %v4213_v40 }
 0x4ac   :  { %v4215_v50 = vsub.f32 1.5, %v4214_v49  ;;  %v4064_v36 = vpop.xlane.xlu0 %4063 }
 0x4ad   :  { %v5007_v44 = vpop.eup %5006  ;;  %v4080_v46 = vmax.f32 %v4064_v36, 1e-24 }
 0x4ae   :  { %v4216_v30 = vmul.f32 %v5005_v43, %v4215_v50  ;;  %v4222_v12 = vmul.f32 %v5007_v44, %v4079_v47  ;;  %vm4228_vm10 = vweird.f32 %v5007_v44 }
 0x4af   :  { %5008 = vrsqrt.f32 %v4080_v46  ;;  %vm4229_vm13 = vmor %vm4227_vm11, %vm4228_vm10  ;;  %vm4237_vm14 = vweird.f32 %v4080_v46 }
 0x4b0   :  { %v4220_v56 = vsel %vm4219_vm9, %v5005_v43, %v4216_v30  ;;  %v4223_v53 = vmul.f32 %v5007_v44, %v4222_v12 }
 0x4b1   :  { %v4254_v18 = vmul.f32 %v4220_v56, %v8504_v25 }
 0x4b2   :  { %v4224_v41 = vmul.f32 0.5, %v4223_v53 }
 0x4b3   :  { %v4807_v10 = vpack.c.bf16 %v4254_v18, %v4253_v5 }
 0x4b4   :  { %v4225_v6 = vsub.f32 1.5, %v4224_v41 }
 0x4b5   :  { %v5009_v34 = vpop.eup %5008  ;;  %4819 = vst [vmem:[#allocation11 + $0x30] sm:$0xff] %v4807_v10  }
 0x4b6   :  { %v4232_v42 = vmul.f32 %v5009_v34, %v4080_v46  ;;  %v4226_v23 = vmul.f32 %v5007_v44, %v4225_v6  ;;  %vm4238_vm12 = vweird.f32 %v5009_v34 }
 0x4b7   :  { %vm4239_vm15 = vmor %vm4237_vm14, %vm4238_vm12 }
 0x4b8   :  { %v4233_v3 = vmul.f32 %v5009_v34, %v4232_v42  ;;  %v4230_v62 = vsel %vm4229_vm13, %v5007_v44, %v4226_v23 }
 0x4b9   :  { %v4255_v25 = vmul.f32 %v4230_v62, %v8513_v13 }
 0x4ba   :  { %v4234_v48 = vmul.f32 0.5, %v4233_v3 }
 0x4bc   :  { %v4235_v58 = vsub.f32 1.5, %v4234_v48 }
 0x4be   :  { %v4236_v26 = vmul.f32 %v5009_v34, %v4235_v58 }
 0x4c0   :  { %v4240_v52 = vsel %vm4239_vm15, %v5009_v34, %v4236_v26 }
 0x4c1   :  { %v4256_v55 = vmul.f32 %v4240_v52, %v8533_v57 }
 0x4c3   :  { %v4812_v0 = vpack.c.bf16 %v4256_v55, %v4255_v25 }
 0x4c5   :  { %4820 = vst [vmem:[#allocation11 + $0x38] sm:$0xff] %v4812_v0  }
 0x4c6   :  { %4301 = dma.vmem_to_hbm [thread:$0]  %s4294_s30, 1024, %s4296_s10, [#allocation4], %s5171_s27, %s5171_s27, %s5172_s28  }
 0x4c7   :  { %5160 = dma.done.wait [#allocation4], 1024  }
 0x4c8   :  { %5161 = vsyncadd [#allocation4], 4294966272 }
 0x4c9   :  { %4306 = vsyncpa [#allocation3], 1 }
 0x4ca   :  { %4307 = vsyncpa [#allocation6], 1 }
 0x4cb   :  { %4308 = vsyncpa [#allocation9], 1 }
 0x4cc   :  { %4309 = vsyncpa [#allocation4], 1 }

</bundles_post_ra>
